<compile_context>
chip_gen: v7x
topology: tpu7x:2x2x1
jax: 0.10.0
libtpu: 0.0.40
codegen_flags: <defaults>
</compile_context>

<pallas_src>
import functools

import jax
import jax.numpy as jnp
from jax.experimental import pallas as pl
from jax.experimental.pallas import tpu as pltpu


CIN1_PAD = 8     # conv1 input channels padded 3 -> 8   (aligned contraction dim)
CMID_PAD = 128   # conv1 output / conv2 input channels padded 32 -> 128 (lane-dense)
COUT_PAD = 128   # conv2 output channels padded 64 -> 128 (lane-dense)


# ---------------- fused conv3x3 + bias + ReLU + 2x2 max-pool (one sample / step) ----------------

def _conv_relu_pool_kernel(xe_ref, xo_ref, w_ref, b_ref, o_ref, *, H, W, Cout_p):
    """xe_ref / xo_ref: even / odd column planes of the zero-padded input, flattened to
    (Hp*Wh, Cin_p) with Wh=(W+2)//2, so every 3x3 tap applied to all output positions of
    one column parity is a *contiguous* (H*Wh, Cin_p) slice -> unit-stride loads + MXU
    matmuls, no im2col.  w_ref: (9, Cin_p, Cout_p) bf16.  b_ref: (1, Cout_p) f32.
    o_ref: ((H//2)*(W//2), Cout_p) bf16, pooled rows in (h, w) row-major order."""
    Wh = (W + 2) // 2
    M = H * Wh                       # conv rows per column parity (incl. one junk column)
    Ho, Wo = H // 2, W // 2

    acc_e = jnp.zeros((M, Cout_p), jnp.float32)   # even output columns
    acc_o = jnp.zeros((M, Cout_p), jnp.float32)   # odd output columns
    planes = (xe_ref, xo_ref)
    for t in range(9):
        dh, dw = divmod(t, 3)
        wt = w_ref[t]                                                  # (Cin_p, Cout_p)
        lhs_e = planes[dw % 2][pl.ds(dh * Wh + dw // 2, M), :]
        acc_e = acc_e + jnp.dot(lhs_e, wt, preferred_element_type=jnp.float32)
        lhs_o = planes[(dw + 1) % 2][pl.ds(dh * Wh + (dw + 1) // 2, M), :]
        acc_o = acc_o + jnp.dot(lhs_o, wt, preferred_element_type=jnp.float32)

    bias = b_ref[...]                               # (1, Cout_p), broadcasts over rows
    y_e = jnp.maximum(acc_e + bias, 0.0)
    y_o = jnp.maximum(acc_o + bias, 0.0)
    colmax = jnp.maximum(y_e, y_o)                  # max over each 2-wide column pair

    # Row pooling: pooled row hp = max over conv rows 2hp and 2hp+1 (valid cols < Wo).
    for hp in range(Ho):
        r0 = colmax[(2 * hp) * Wh:(2 * hp) * Wh + Wo, :]
        r1 = colmax[(2 * hp + 1) * Wh:(2 * hp + 1) * Wh + Wo, :]
        o_ref[pl.ds(hp * Wo, Wo), :] = jnp.maximum(r0, r1).astype(o_ref.dtype)


def conv3x3_relu_pool(x_nhwc, w9, bias):
    """x: (N,H,W,Cin_p) bf16, w9: (9,Cin_p,Cout_p) bf16, bias: (1,Cout_p) f32
       -> (N, (H//2)*(W//2), Cout_p) bf16 (pooled activations, (h,w) row-major)."""
    N, H, W, Cin_p = x_nhwc.shape
    assert H % 2 == 0 and W % 2 == 0
    _, cin_w, Cout_p = w9.shape
    assert cin_w == Cin_p
    Wh = (W + 2) // 2
    Hp = H + 3        # 1 top pad, 1 bottom pad, +2 extra zero rows so flattened windows stay in bounds
    # TODO(synk): for large spatial sizes (e.g. 224x224) add a row-block grid axis with halo
    # handling instead of one whole sample per grid step.
    xp = jnp.pad(x_nhwc, ((0, 0), (1, 2), (1, 1), (0, 0)))
    xe = xp[:, :, 0::2, :].reshape(N, Hp * Wh, Cin_p)
    xo = xp[:, :, 1::2, :].reshape(N, Hp * Wh, Cin_p)
    P = (H // 2) * (W // 2)
    kernel = functools.partial(_conv_relu_pool_kernel, H=H, W=W, Cout_p=Cout_p)
    return pl.pallas_call(
        kernel,
        out_shape=jax.ShapeDtypeStruct((N, P, Cout_p), jnp.bfloat16),
        grid_spec=pltpu.PrefetchScalarGridSpec(
            num_scalar_prefetch=0,
            grid=(N,),
            in_specs=[
                pl.BlockSpec((None, Hp * Wh, Cin_p), lambda n: (n, 0, 0)),
                pl.BlockSpec((None, Hp * Wh, Cin_p), lambda n: (n, 0, 0)),
                pl.BlockSpec((9, Cin_p, Cout_p), lambda n: (0, 0, 0)),
                pl.BlockSpec((1, Cout_p), lambda n: (0, 0)),
            ],
            out_specs=pl.BlockSpec((None, P, Cout_p), lambda n: (n, 0, 0)),
        ),
        compiler_params=pltpu.CompilerParams(
            dimension_semantics=("parallel",),
            vmem_limit_bytes=32 * 1024 * 1024,
        ),
    )(xe, xo, w9, bias)


# ---------------- fused fc1 + ReLU + (dropout eval) + fc2 + sigmoid, K-tiled ----------------

def _fc_head_kernel(x_ref, w1_ref, b1_ref, w2_ref, b2_ref, o_ref, acc_ref):
    k = pl.program_id(0)

    @pl.when(k == 0)
    def _():
        acc_ref[...] = jnp.zeros_like(acc_ref)

    acc_ref[...] += jnp.dot(x_ref[...], w1_ref[...], preferred_element_type=jnp.float32)

    @pl.when(k == pl.num_programs(0) - 1)
    def _():
        h = jnp.maximum(acc_ref[...] + b1_ref[...], 0.0)                  # fc1 + ReLU
        # TODO(synk): nn.Dropout(0.6) is training-only; identity at inference (eval mode).
        z = jnp.sum(h * w2_ref[...], axis=1, keepdims=True) + b2_ref[...]  # fc2 (128 -> 1)
        o_ref[...] = jax.nn.sigmoid(z)


def fc_head(x_flat, w1, b1, w2_row, b2, *, tk=256):
    """x_flat: (B,K) bf16, w1: (K,128) bf16, b1: (1,128) f32,
       w2_row: (1,128) f32, b2: (1,1) f32 -> (B,1) f32 sigmoid outputs."""
    B, K = x_flat.shape
    assert K % tk == 0
    N1 = w1.shape[1]
    return pl.pallas_call(
        _fc_head_kernel,
        out_shape=jax.ShapeDtypeStruct((B, 1), jnp.float32),
        grid_spec=pltpu.PrefetchScalarGridSpec(
            num_scalar_prefetch=0,
            grid=(K // tk,),
            in_specs=[
                pl.BlockSpec((B, tk), lambda k: (0, k)),
                pl.BlockSpec((tk, N1), lambda k: (k, 0)),
                pl.BlockSpec((1, N1), lambda k: (0, 0)),
                pl.BlockSpec((1, N1), lambda k: (0, 0)),
                pl.BlockSpec((1, 1), lambda k: (0, 0)),
            ],
            out_specs=pl.BlockSpec((B, 1), lambda k: (0, 0)),
            scratch_shapes=[pltpu.VMEM((B, N1), jnp.float32)],
        ),
        compiler_params=pltpu.CompilerParams(
            dimension_semantics=("arbitrary",),
            vmem_limit_bytes=32 * 1024 * 1024,
        ),
    )(x_flat, w1, b1, w2_row, b2)


# ------------------------------------ full forward ------------------------------------

def cnn_forward(x_nchw, params):
    """Reproduces CNNModel.forward (dropout in eval mode / identity)."""
    N = x_nchw.shape[0]
    x = jnp.transpose(x_nchw, (0, 2, 3, 1)).astype(jnp.bfloat16)        # NCHW -> NHWC
    x = jnp.pad(x, ((0, 0), (0, 0), (0, 0), (0, CIN1_PAD - x.shape[-1])))
    H, W = x.shape[1], x.shape[2]

    y = conv3x3_relu_pool(x, params["w1"], params["b1"])                # (N, H/2*W/2, 128)
    y = y.reshape(N, H // 2, W // 2, CMID_PAD)
    y = conv3x3_relu_pool(y, params["w2"], params["b2"])                # (N, H/4*W/4, 128)

    x_flat = y.reshape(N, (H // 4) * (W // 4) * COUT_PAD)               # (h,w,c)-order flatten
    return fc_head(x_flat, params["wfc1"], params["bfc1"],
                   params["wfc2"], params["bfc2"])


def init_params(key, target_size=(16, 16)):
    H, W = target_size
    assert H % 4 == 0 and W % 4 == 0
    h4, w4 = H // 4, W // 4
    fc1_in = 64 * h4 * w4
    ks = jax.random.split(key, 8)
    s = 0.05
    # PyTorch-layout parameters (what nn.Conv2d / nn.Linear would hold).
    w1_t = s * jax.random.normal(ks[0], (32, 3, 3, 3), jnp.float32)     # (Cout,Cin,KH,KW)
    b1_t = s * jax.random.normal(ks[1], (32,), jnp.float32)
    w2_t = s * jax.random.normal(ks[2], (64, 32, 3, 3), jnp.float32)
    b2_t = s * jax.random.normal(ks[3], (64,), jnp.float32)
    wf1_t = s * jax.random.normal(ks[4], (128, fc1_in), jnp.float32)    # (out, in)
    bf1_t = s * jax.random.normal(ks[5], (128,), jnp.float32)
    wf2_t = s * jax.random.normal(ks[6], (1, 128), jnp.float32)
    bf2_t = s * jax.random.normal(ks[7], (1,), jnp.float32)

    def conv_w(w, cin_p, cout_p):
        cout, cin, kh, kw = w.shape
        w = jnp.transpose(w, (2, 3, 1, 0)).reshape(kh * kw, cin, cout)  # (9, Cin, Cout)
        w = jnp.pad(w, ((0, 0), (0, cin_p - cin), (0, cout_p - cout)))  # zero-pad channels
        return w.astype(jnp.bfloat16)

    def bias_p(b, cp):
        return jnp.pad(b, (0, cp - b.shape[0])).reshape(1, cp).astype(jnp.float32)

    # fc1: fold the torch (C,H,W)-flatten order + Cout zero-padding into a one-time
    # row permutation / zero-embedding of the weight (no runtime transpose of activations).
    wf1 = wf1_t.T.reshape(64, h4, w4, 128)          # (c, h, w, out)
    wf1 = jnp.transpose(wf1, (1, 2, 0, 3))          # (h, w, c, out)
    wf1 = jnp.pad(wf1, ((0, 0), (0, 0), (0, COUT_PAD - 64), (0, 0)))
    wf1 = wf1.reshape(h4 * w4 * COUT_PAD, 128).astype(jnp.bfloat16)

    return {
        "w1": conv_w(w1_t, CIN1_PAD, CMID_PAD),
        "b1": bias_p(b1_t, CMID_PAD),
        "w2": conv_w(w2_t, CMID_PAD, COUT_PAD),
        "b2": bias_p(b2_t, COUT_PAD),
        "wfc1": wf1,
        "bfc1": bf1_t.reshape(1, 128).astype(jnp.float32),
        "wfc2": wf2_t.astype(jnp.float32),            # (1, 128) row vector
        "bfc2": bf2_t.reshape(1, 1).astype(jnp.float32),
    }


if __name__ == "__main__":
    key = jax.random.PRNGKey(0)
    k_x, k_p = jax.random.split(key)

    target_size = (16, 16)                    # small stand-in for (224, 224)
    x = jax.random.normal(k_x, (2, 3, target_size[0], target_size[1]), jnp.float32)
    params = init_params(k_p, target_size)

    out = jax.jit(cnn_forward)(x, params)
    out = jax.block_until_ready(out)

    assert out.shape == (2, 1), out.shape
    assert bool(jnp.all(jnp.isfinite(out)))
    assert bool(jnp.all((out >= 0.0) & (out <= 1.0)))  # sigmoid range sanity check
    print("KERNEL_OK")
</pallas_src>

<mosaic_0001>
module attributes {stable_mosaic.version = 11 : i64} {
  func.func @_conv_relu_pool_kernel(%arg0: i32, %arg1: memref<1x171x8xbf16, #tpu.memory_space<vmem>>, %arg2: memref<1x171x8xbf16, #tpu.memory_space<vmem>>, %arg3: memref<9x8x128xbf16, #tpu.memory_space<vmem>>, %arg4: memref<1x128xf32, #tpu.memory_space<vmem>>, %arg5: memref<1x64x128xbf16, #tpu.memory_space<vmem>>) attributes {dimension_semantics = [#tpu.dimension_semantics<parallel>], iteration_bounds = array<i64: 2>, scalar_prefetch = 0 : i64, scratch_operands = 0 : i64, tpu.core_type = #tpu.core_type<tc>, window_params = [{transform_indices = @transform_0, window_bounds = array<i64: 1, 171, 8>}, {transform_indices = @transform_1, window_bounds = array<i64: 1, 171, 8>}, {pipeline_mode = #tpu.pipeline_mode<synchronous>, transform_indices = @transform_2, window_bounds = array<i64: 9, 8, 128>}, {pipeline_mode = #tpu.pipeline_mode<synchronous>, transform_indices = @transform_3, window_bounds = array<i64: 1, 128>}, {transform_indices = @transform_4, window_bounds = array<i64: 1, 64, 128>}]} {
    %cst = arith.constant 0.000000e+00 : f32
    %0 = vector.broadcast %cst : f32 to vector<144x128xf32>
    %cst_0 = arith.constant 0.000000e+00 : f32
    %1 = vector.broadcast %cst_0 : f32 to vector<144x128xf32>
    %c0 = arith.constant 0 : index
    %c0_1 = arith.constant 0 : index
    %c0_2 = arith.constant 0 : index
    %2 = vector.load %arg3[%c0, %c0_1, %c0_2] : memref<9x8x128xbf16, #tpu.memory_space<vmem>>, vector<1x8x128xbf16>
    %3 = vector.shape_cast %2 : vector<1x8x128xbf16> to vector<8x128xbf16>
    %c0_3 = arith.constant 0 : index
    %c0_4 = arith.constant 0 : index
    %c0_5 = arith.constant 0 : index
    %4 = vector.load %arg1[%c0_3, %c0_4, %c0_5] : memref<1x171x8xbf16, #tpu.memory_space<vmem>>, vector<1x144x8xbf16>
    %5 = vector.shape_cast %4 : vector<1x144x8xbf16> to vector<144x8xbf16>
    %cst_6 = arith.constant dense<0.000000e+00> : vector<144x128xf32>
    %6 = tpu.matmul %5, %3, %cst_6 {dimension_numbers = #tpu.dot_dimension_numbers<[1], [0], [0], [1], [0, 0, 1, 1], [], []>} : vector<144x8xbf16>, vector<8x128xbf16>, vector<144x128xf32> -> vector<144x128xf32>
    %7 = arith.addf %0, %6 : vector<144x128xf32>
    %c0_7 = arith.constant 0 : index
    %c0_8 = arith.constant 0 : index
    %c0_9 = arith.constant 0 : index
    %8 = vector.load %arg2[%c0_7, %c0_8, %c0_9] : memref<1x171x8xbf16, #tpu.memory_space<vmem>>, vector<1x144x8xbf16>
    %9 = vector.shape_cast %8 : vector<1x144x8xbf16> to vector<144x8xbf16>
    %cst_10 = arith.constant dense<0.000000e+00> : vector<144x128xf32>
    %10 = tpu.matmul %9, %3, %cst_10 {dimension_numbers = #tpu.dot_dimension_numbers<[1], [0], [0], [1], [0, 0, 1, 1], [], []>} : vector<144x8xbf16>, vector<8x128xbf16>, vector<144x128xf32> -> vector<144x128xf32>
    %11 = arith.addf %1, %10 : vector<144x128xf32>
    %c1 = arith.constant 1 : index
    %c0_11 = arith.constant 0 : index
    %c0_12 = arith.constant 0 : index
    %12 = vector.load %arg3[%c1, %c0_11, %c0_12] : memref<9x8x128xbf16, #tpu.memory_space<vmem>>, vector<1x8x128xbf16>
    %13 = vector.shape_cast %12 : vector<1x8x128xbf16> to vector<8x128xbf16>
    %c0_13 = arith.constant 0 : index
    %c0_14 = arith.constant 0 : index
    %c0_15 = arith.constant 0 : index
    %14 = vector.load %arg2[%c0_13, %c0_14, %c0_15] : memref<1x171x8xbf16, #tpu.memory_space<vmem>>, vector<1x144x8xbf16>
    %15 = vector.shape_cast %14 : vector<1x144x8xbf16> to vector<144x8xbf16>
    %cst_16 = arith.constant dense<0.000000e+00> : vector<144x128xf32>
    %16 = tpu.matmul %15, %13, %cst_16 {dimension_numbers = #tpu.dot_dimension_numbers<[1], [0], [0], [1], [0, 0, 1, 1], [], []>} : vector<144x8xbf16>, vector<8x128xbf16>, vector<144x128xf32> -> vector<144x128xf32>
    %17 = arith.addf %7, %16 : vector<144x128xf32>
    %c0_17 = arith.constant 0 : index
    %c1_18 = arith.constant 1 : index
    %c0_19 = arith.constant 0 : index
    %18 = vector.load %arg1[%c0_17, %c1_18, %c0_19] : memref<1x171x8xbf16, #tpu.memory_space<vmem>>, vector<1x144x8xbf16>
    %19 = vector.shape_cast %18 : vector<1x144x8xbf16> to vector<144x8xbf16>
    %cst_20 = arith.constant dense<0.000000e+00> : vector<144x128xf32>
    %20 = tpu.matmul %19, %13, %cst_20 {dimension_numbers = #tpu.dot_dimension_numbers<[1], [0], [0], [1], [0, 0, 1, 1], [], []>} : vector<144x8xbf16>, vector<8x128xbf16>, vector<144x128xf32> -> vector<144x128xf32>
    %21 = arith.addf %11, %20 : vector<144x128xf32>
    %c2 = arith.constant 2 : index
    %c0_21 = arith.constant 0 : index
    %c0_22 = arith.constant 0 : index
    %22 = vector.load %arg3[%c2, %c0_21, %c0_22] : memref<9x8x128xbf16, #tpu.memory_space<vmem>>, vector<1x8x128xbf16>
    %23 = vector.shape_cast %22 : vector<1x8x128xbf16> to vector<8x128xbf16>
    %c0_23 = arith.constant 0 : index
    %c1_24 = arith.constant 1 : index
    %c0_25 = arith.constant 0 : index
    %24 = vector.load %arg1[%c0_23, %c1_24, %c0_25] : memref<1x171x8xbf16, #tpu.memory_space<vmem>>, vector<1x144x8xbf16>
    %25 = vector.shape_cast %24 : vector<1x144x8xbf16> to vector<144x8xbf16>
    %cst_26 = arith.constant dense<0.000000e+00> : vector<144x128xf32>
    %26 = tpu.matmul %25, %23, %cst_26 {dimension_numbers = #tpu.dot_dimension_numbers<[1], [0], [0], [1], [0, 0, 1, 1], [], []>} : vector<144x8xbf16>, vector<8x128xbf16>, vector<144x128xf32> -> vector<144x128xf32>
    %27 = arith.addf %17, %26 : vector<144x128xf32>
    %c0_27 = arith.constant 0 : index
    %c1_28 = arith.constant 1 : index
    %c0_29 = arith.constant 0 : index
    %28 = vector.load %arg2[%c0_27, %c1_28, %c0_29] : memref<1x171x8xbf16, #tpu.memory_space<vmem>>, vector<1x144x8xbf16>
    %29 = vector.shape_cast %28 : vector<1x144x8xbf16> to vector<144x8xbf16>
    %cst_30 = arith.constant dense<0.000000e+00> : vector<144x128xf32>
    %30 = tpu.matmul %29, %23, %cst_30 {dimension_numbers = #tpu.dot_dimension_numbers<[1], [0], [0], [1], [0, 0, 1, 1], [], []>} : vector<144x8xbf16>, vector<8x128xbf16>, vector<144x128xf32> -> vector<144x128xf32>
    %31 = arith.addf %21, %30 : vector<144x128xf32>
    %c3 = arith.constant 3 : index
    %c0_31 = arith.constant 0 : index
    %c0_32 = arith.constant 0 : index
    %32 = vector.load %arg3[%c3, %c0_31, %c0_32] : memref<9x8x128xbf16, #tpu.memory_space<vmem>>, vector<1x8x128xbf16>
    %33 = vector.shape_cast %32 : vector<1x8x128xbf16> to vector<8x128xbf16>
    %c0_33 = arith.constant 0 : index
    %c9 = arith.constant 9 : index
    %c0_34 = arith.constant 0 : index
    %34 = vector.load %arg1[%c0_33, %c9, %c0_34] : memref<1x171x8xbf16, #tpu.memory_space<vmem>>, vector<1x144x8xbf16>
    %35 = vector.shape_cast %34 : vector<1x144x8xbf16> to vector<144x8xbf16>
    %cst_35 = arith.constant dense<0.000000e+00> : vector<144x128xf32>
    %36 = tpu.matmul %35, %33, %cst_35 {dimension_numbers = #tpu.dot_dimension_numbers<[1], [0], [0], [1], [0, 0, 1, 1], [], []>} : vector<144x8xbf16>, vector<8x128xbf16>, vector<144x128xf32> -> vector<144x128xf32>
    %37 = arith.addf %27, %36 : vector<144x128xf32>
    %c0_36 = arith.constant 0 : index
    %c9_37 = arith.constant 9 : index
    %c0_38 = arith.constant 0 : index
    %38 = vector.load %arg2[%c0_36, %c9_37, %c0_38] : memref<1x171x8xbf16, #tpu.memory_space<vmem>>, vector<1x144x8xbf16>
    %39 = vector.shape_cast %38 : vector<1x144x8xbf16> to vector<144x8xbf16>
    %cst_39 = arith.constant dense<0.000000e+00> : vector<144x128xf32>
    %40 = tpu.matmul %39, %33, %cst_39 {dimension_numbers = #tpu.dot_dimension_numbers<[1], [0], [0], [1], [0, 0, 1, 1], [], []>} : vector<144x8xbf16>, vector<8x128xbf16>, vector<144x128xf32> -> vector<144x128xf32>
    %41 = arith.addf %31, %40 : vector<144x128xf32>
    %c4 = arith.constant 4 : index
    %c0_40 = arith.constant 0 : index
    %c0_41 = arith.constant 0 : index
    %42 = vector.load %arg3[%c4, %c0_40, %c0_41] : memref<9x8x128xbf16, #tpu.memory_space<vmem>>, vector<1x8x128xbf16>
    %43 = vector.shape_cast %42 : vector<1x8x128xbf16> to vector<8x128xbf16>
    %c0_42 = arith.constant 0 : index
    %c9_43 = arith.constant 9 : index
    %c0_44 = arith.constant 0 : index
    %44 = vector.load %arg2[%c0_42, %c9_43, %c0_44] : memref<1x171x8xbf16, #tpu.memory_space<vmem>>, vector<1x144x8xbf16>
    %45 = vector.shape_cast %44 : vector<1x144x8xbf16> to vector<144x8xbf16>
    %cst_45 = arith.constant dense<0.000000e+00> : vector<144x128xf32>
    %46 = tpu.matmul %45, %43, %cst_45 {dimension_numbers = #tpu.dot_dimension_numbers<[1], [0], [0], [1], [0, 0, 1, 1], [], []>} : vector<144x8xbf16>, vector<8x128xbf16>, vector<144x128xf32> -> vector<144x128xf32>
    %47 = arith.addf %37, %46 : vector<144x128xf32>
    %c0_46 = arith.constant 0 : index
    %c10 = arith.constant 10 : index
    %c0_47 = arith.constant 0 : index
    %48 = vector.load %arg1[%c0_46, %c10, %c0_47] : memref<1x171x8xbf16, #tpu.memory_space<vmem>>, vector<1x144x8xbf16>
    %49 = vector.shape_cast %48 : vector<1x144x8xbf16> to vector<144x8xbf16>
    %cst_48 = arith.constant dense<0.000000e+00> : vector<144x128xf32>
    %50 = tpu.matmul %49, %43, %cst_48 {dimension_numbers = #tpu.dot_dimension_numbers<[1], [0], [0], [1], [0, 0, 1, 1], [], []>} : vector<144x8xbf16>, vector<8x128xbf16>, vector<144x128xf32> -> vector<144x128xf32>
    %51 = arith.addf %41, %50 : vector<144x128xf32>
    %c5 = arith.constant 5 : index
    %c0_49 = arith.constant 0 : index
    %c0_50 = arith.constant 0 : index
    %52 = vector.load %arg3[%c5, %c0_49, %c0_50] : memref<9x8x128xbf16, #tpu.memory_space<vmem>>, vector<1x8x128xbf16>
    %53 = vector.shape_cast %52 : vector<1x8x128xbf16> to vector<8x128xbf16>
    %c0_51 = arith.constant 0 : index
    %c10_52 = arith.constant 10 : index
    %c0_53 = arith.constant 0 : index
    %54 = vector.load %arg1[%c0_51, %c10_52, %c0_53] : memref<1x171x8xbf16, #tpu.memory_space<vmem>>, vector<1x144x8xbf16>
    %55 = vector.shape_cast %54 : vector<1x144x8xbf16> to vector<144x8xbf16>
    %cst_54 = arith.constant dense<0.000000e+00> : vector<144x128xf32>
    %56 = tpu.matmul %55, %53, %cst_54 {dimension_numbers = #tpu.dot_dimension_numbers<[1], [0], [0], [1], [0, 0, 1, 1], [], []>} : vector<144x8xbf16>, vector<8x128xbf16>, vector<144x128xf32> -> vector<144x128xf32>
    %57 = arith.addf %47, %56 : vector<144x128xf32>
    %c0_55 = arith.constant 0 : index
    %c10_56 = arith.constant 10 : index
    %c0_57 = arith.constant 0 : index
    %58 = vector.load %arg2[%c0_55, %c10_56, %c0_57] : memref<1x171x8xbf16, #tpu.memory_space<vmem>>, vector<1x144x8xbf16>
    %59 = vector.shape_cast %58 : vector<1x144x8xbf16> to vector<144x8xbf16>
    %cst_58 = arith.constant dense<0.000000e+00> : vector<144x128xf32>
    %60 = tpu.matmul %59, %53, %cst_58 {dimension_numbers = #tpu.dot_dimension_numbers<[1], [0], [0], [1], [0, 0, 1, 1], [], []>} : vector<144x8xbf16>, vector<8x128xbf16>, vector<144x128xf32> -> vector<144x128xf32>
    %61 = arith.addf %51, %60 : vector<144x128xf32>
    %c6 = arith.constant 6 : index
    %c0_59 = arith.constant 0 : index
    %c0_60 = arith.constant 0 : index
    %62 = vector.load %arg3[%c6, %c0_59, %c0_60] : memref<9x8x128xbf16, #tpu.memory_space<vmem>>, vector<1x8x128xbf16>
    %63 = vector.shape_cast %62 : vector<1x8x128xbf16> to vector<8x128xbf16>
    %c0_61 = arith.constant 0 : index
    %c18 = arith.constant 18 : index
    %c0_62 = arith.constant 0 : index
    %64 = vector.load %arg1[%c0_61, %c18, %c0_62] : memref<1x171x8xbf16, #tpu.memory_space<vmem>>, vector<1x144x8xbf16>
    %65 = vector.shape_cast %64 : vector<1x144x8xbf16> to vector<144x8xbf16>
    %cst_63 = arith.constant dense<0.000000e+00> : vector<144x128xf32>
    %66 = tpu.matmul %65, %63, %cst_63 {dimension_numbers = #tpu.dot_dimension_numbers<[1], [0], [0], [1], [0, 0, 1, 1], [], []>} : vector<144x8xbf16>, vector<8x128xbf16>, vector<144x128xf32> -> vector<144x128xf32>
    %67 = arith.addf %57, %66 : vector<144x128xf32>
    %c0_64 = arith.constant 0 : index
    %c18_65 = arith.constant 18 : index
    %c0_66 = arith.constant 0 : index
    %68 = vector.load %arg2[%c0_64, %c18_65, %c0_66] : memref<1x171x8xbf16, #tpu.memory_space<vmem>>, vector<1x144x8xbf16>
    %69 = vector.shape_cast %68 : vector<1x144x8xbf16> to vector<144x8xbf16>
    %cst_67 = arith.constant dense<0.000000e+00> : vector<144x128xf32>
    %70 = tpu.matmul %69, %63, %cst_67 {dimension_numbers = #tpu.dot_dimension_numbers<[1], [0], [0], [1], [0, 0, 1, 1], [], []>} : vector<144x8xbf16>, vector<8x128xbf16>, vector<144x128xf32> -> vector<144x128xf32>
    %71 = arith.addf %61, %70 : vector<144x128xf32>
    %c7 = arith.constant 7 : index
    %c0_68 = arith.constant 0 : index
    %c0_69 = arith.constant 0 : index
    %72 = vector.load %arg3[%c7, %c0_68, %c0_69] : memref<9x8x128xbf16, #tpu.memory_space<vmem>>, vector<1x8x128xbf16>
    %73 = vector.shape_cast %72 : vector<1x8x128xbf16> to vector<8x128xbf16>
    %c0_70 = arith.constant 0 : index
    %c18_71 = arith.constant 18 : index
    %c0_72 = arith.constant 0 : index
    %74 = vector.load %arg2[%c0_70, %c18_71, %c0_72] : memref<1x171x8xbf16, #tpu.memory_space<vmem>>, vector<1x144x8xbf16>
    %75 = vector.shape_cast %74 : vector<1x144x8xbf16> to vector<144x8xbf16>
    %cst_73 = arith.constant dense<0.000000e+00> : vector<144x128xf32>
    %76 = tpu.matmul %75, %73, %cst_73 {dimension_numbers = #tpu.dot_dimension_numbers<[1], [0], [0], [1], [0, 0, 1, 1], [], []>} : vector<144x8xbf16>, vector<8x128xbf16>, vector<144x128xf32> -> vector<144x128xf32>
    %77 = arith.addf %67, %76 : vector<144x128xf32>
    %c0_74 = arith.constant 0 : index
    %c19 = arith.constant 19 : index
    %c0_75 = arith.constant 0 : index
    %78 = vector.load %arg1[%c0_74, %c19, %c0_75] : memref<1x171x8xbf16, #tpu.memory_space<vmem>>, vector<1x144x8xbf16>
    %79 = vector.shape_cast %78 : vector<1x144x8xbf16> to vector<144x8xbf16>
    %cst_76 = arith.constant dense<0.000000e+00> : vector<144x128xf32>
    %80 = tpu.matmul %79, %73, %cst_76 {dimension_numbers = #tpu.dot_dimension_numbers<[1], [0], [0], [1], [0, 0, 1, 1], [], []>} : vector<144x8xbf16>, vector<8x128xbf16>, vector<144x128xf32> -> vector<144x128xf32>
    %81 = arith.addf %71, %80 : vector<144x128xf32>
    %c8 = arith.constant 8 : index
    %c0_77 = arith.constant 0 : index
    %c0_78 = arith.constant 0 : index
    %82 = vector.load %arg3[%c8, %c0_77, %c0_78] : memref<9x8x128xbf16, #tpu.memory_space<vmem>>, vector<1x8x128xbf16>
    %83 = vector.shape_cast %82 : vector<1x8x128xbf16> to vector<8x128xbf16>
    %c0_79 = arith.constant 0 : index
    %c19_80 = arith.constant 19 : index
    %c0_81 = arith.constant 0 : index
    %84 = vector.load %arg1[%c0_79, %c19_80, %c0_81] : memref<1x171x8xbf16, #tpu.memory_space<vmem>>, vector<1x144x8xbf16>
    %85 = vector.shape_cast %84 : vector<1x144x8xbf16> to vector<144x8xbf16>
    %cst_82 = arith.constant dense<0.000000e+00> : vector<144x128xf32>
    %86 = tpu.matmul %85, %83, %cst_82 {dimension_numbers = #tpu.dot_dimension_numbers<[1], [0], [0], [1], [0, 0, 1, 1], [], []>} : vector<144x8xbf16>, vector<8x128xbf16>, vector<144x128xf32> -> vector<144x128xf32>
    %87 = arith.addf %77, %86 : vector<144x128xf32>
    %c0_83 = arith.constant 0 : index
    %c19_84 = arith.constant 19 : index
    %c0_85 = arith.constant 0 : index
    %88 = vector.load %arg2[%c0_83, %c19_84, %c0_85] : memref<1x171x8xbf16, #tpu.memory_space<vmem>>, vector<1x144x8xbf16>
    %89 = vector.shape_cast %88 : vector<1x144x8xbf16> to vector<144x8xbf16>
    %cst_86 = arith.constant dense<0.000000e+00> : vector<144x128xf32>
    %90 = tpu.matmul %89, %83, %cst_86 {dimension_numbers = #tpu.dot_dimension_numbers<[1], [0], [0], [1], [0, 0, 1, 1], [], []>} : vector<144x8xbf16>, vector<8x128xbf16>, vector<144x128xf32> -> vector<144x128xf32>
    %91 = arith.addf %81, %90 : vector<144x128xf32>
    %c0_87 = arith.constant 0 : index
    %c0_88 = arith.constant 0 : index
    %92 = vector.load %arg4[%c0_87, %c0_88] : memref<1x128xf32, #tpu.memory_space<vmem>>, vector<1x128xf32>
    %93 = vector.broadcast %92 : vector<1x128xf32> to vector<144x128xf32>
    %94 = arith.addf %87, %93 : vector<144x128xf32>
    %cst_89 = arith.constant 0.000000e+00 : f32
    %95 = vector.broadcast %cst_89 : f32 to vector<144x128xf32>
    %96 = arith.maximumf %94, %95 : vector<144x128xf32>
    %97 = vector.broadcast %92 : vector<1x128xf32> to vector<144x128xf32>
    %98 = arith.addf %91, %97 : vector<144x128xf32>
    %cst_90 = arith.constant 0.000000e+00 : f32
    %99 = vector.broadcast %cst_90 : f32 to vector<144x128xf32>
    %100 = arith.maximumf %98, %99 : vector<144x128xf32>
    %101 = arith.maximumf %96, %100 : vector<144x128xf32>
    %102 = vector.extract_strided_slice %101 {offsets = [0, 0], sizes = [8, 128], strides = [1, 1]} : vector<144x128xf32> to vector<8x128xf32>
    %103 = vector.extract_strided_slice %101 {offsets = [9, 0], sizes = [8, 128], strides = [1, 1]} : vector<144x128xf32> to vector<8x128xf32>
    %104 = arith.maximumf %102, %103 : vector<8x128xf32>
    %105 = arith.truncf %104 : vector<8x128xf32> to vector<8x128xbf16>
    %c0_91 = arith.constant 0 : index
    %c0_92 = arith.constant 0 : index
    %c0_93 = arith.constant 0 : index
    %106 = vector.load %arg5[%c0_91, %c0_92, %c0_93] : memref<1x64x128xbf16, #tpu.memory_space<vmem>>, vector<1x8x128xbf16>
    %107 = vector.shape_cast %106 : vector<1x8x128xbf16> to vector<8x128xbf16>
    %108 = vector.shape_cast %105 : vector<8x128xbf16> to vector<1x8x128xbf16>
    tpu.vector_store %arg5[%c0_91, %c0_92, %c0_93], %108 {strides = array<i32>} : memref<1x64x128xbf16, #tpu.memory_space<vmem>>, vector<1x8x128xbf16>,
    %109 = vector.extract_strided_slice %101 {offsets = [18, 0], sizes = [8, 128], strides = [1, 1]} : vector<144x128xf32> to vector<8x128xf32>
    %110 = vector.extract_strided_slice %101 {offsets = [27, 0], sizes = [8, 128], strides = [1, 1]} : vector<144x128xf32> to vector<8x128xf32>
    %111 = arith.maximumf %109, %110 : vector<8x128xf32>
    %112 = arith.truncf %111 : vector<8x128xf32> to vector<8x128xbf16>
    %c0_94 = arith.constant 0 : index
    %c8_95 = arith.constant 8 : index
    %c0_96 = arith.constant 0 : index
    %113 = vector.load %arg5[%c0_94, %c8_95, %c0_96] : memref<1x64x128xbf16, #tpu.memory_space<vmem>>, vector<1x8x128xbf16>
    %114 = vector.shape_cast %113 : vector<1x8x128xbf16> to vector<8x128xbf16>
    %115 = vector.shape_cast %112 : vector<8x128xbf16> to vector<1x8x128xbf16>
    tpu.vector_store %arg5[%c0_94, %c8_95, %c0_96], %115 {strides = array<i32>} : memref<1x64x128xbf16, #tpu.memory_space<vmem>>, vector<1x8x128xbf16>,
    %116 = vector.extract_strided_slice %101 {offsets = [36, 0], sizes = [8, 128], strides = [1, 1]} : vector<144x128xf32> to vector<8x128xf32>
    %117 = vector.extract_strided_slice %101 {offsets = [45, 0], sizes = [8, 128], strides = [1, 1]} : vector<144x128xf32> to vector<8x128xf32>
    %118 = arith.maximumf %116, %117 : vector<8x128xf32>
    %119 = arith.truncf %118 : vector<8x128xf32> to vector<8x128xbf16>
    %c0_97 = arith.constant 0 : index
    %c16 = arith.constant 16 : index
    %c0_98 = arith.constant 0 : index
    %120 = vector.load %arg5[%c0_97, %c16, %c0_98] : memref<1x64x128xbf16, #tpu.memory_space<vmem>>, vector<1x8x128xbf16>
    %121 = vector.shape_cast %120 : vector<1x8x128xbf16> to vector<8x128xbf16>
    %122 = vector.shape_cast %119 : vector<8x128xbf16> to vector<1x8x128xbf16>
    tpu.vector_store %arg5[%c0_97, %c16, %c0_98], %122 {strides = array<i32>} : memref<1x64x128xbf16, #tpu.memory_space<vmem>>, vector<1x8x128xbf16>,
    %123 = vector.extract_strided_slice %101 {offsets = [54, 0], sizes = [8, 128], strides = [1, 1]} : vector<144x128xf32> to vector<8x128xf32>
    %124 = vector.extract_strided_slice %101 {offsets = [63, 0], sizes = [8, 128], strides = [1, 1]} : vector<144x128xf32> to vector<8x128xf32>
    %125 = arith.maximumf %123, %124 : vector<8x128xf32>
    %126 = arith.truncf %125 : vector<8x128xf32> to vector<8x128xbf16>
    %c0_99 = arith.constant 0 : index
    %c24 = arith.constant 24 : index
    %c0_100 = arith.constant 0 : index
    %127 = vector.load %arg5[%c0_99, %c24, %c0_100] : memref<1x64x128xbf16, #tpu.memory_space<vmem>>, vector<1x8x128xbf16>
    %128 = vector.shape_cast %127 : vector<1x8x128xbf16> to vector<8x128xbf16>
    %129 = vector.shape_cast %126 : vector<8x128xbf16> to vector<1x8x128xbf16>
    tpu.vector_store %arg5[%c0_99, %c24, %c0_100], %129 {strides = array<i32>} : memref<1x64x128xbf16, #tpu.memory_space<vmem>>, vector<1x8x128xbf16>,
    %130 = vector.extract_strided_slice %101 {offsets = [72, 0], sizes = [8, 128], strides = [1, 1]} : vector<144x128xf32> to vector<8x128xf32>
    %131 = vector.extract_strided_slice %101 {offsets = [81, 0], sizes = [8, 128], strides = [1, 1]} : vector<144x128xf32> to vector<8x128xf32>
    %132 = arith.maximumf %130, %131 : vector<8x128xf32>
    %133 = arith.truncf %132 : vector<8x128xf32> to vector<8x128xbf16>
    %c0_101 = arith.constant 0 : index
    %c32 = arith.constant 32 : index
    %c0_102 = arith.constant 0 : index
    %134 = vector.load %arg5[%c0_101, %c32, %c0_102] : memref<1x64x128xbf16, #tpu.memory_space<vmem>>, vector<1x8x128xbf16>
    %135 = vector.shape_cast %134 : vector<1x8x128xbf16> to vector<8x128xbf16>
    %136 = vector.shape_cast %133 : vector<8x128xbf16> to vector<1x8x128xbf16>
    tpu.vector_store %arg5[%c0_101, %c32, %c0_102], %136 {strides = array<i32>} : memref<1x64x128xbf16, #tpu.memory_space<vmem>>, vector<1x8x128xbf16>,
    %137 = vector.extract_strided_slice %101 {offsets = [90, 0], sizes = [8, 128], strides = [1, 1]} : vector<144x128xf32> to vector<8x128xf32>
    %138 = vector.extract_strided_slice %101 {offsets = [99, 0], sizes = [8, 128], strides = [1, 1]} : vector<144x128xf32> to vector<8x128xf32>
    %139 = arith.maximumf %137, %138 : vector<8x128xf32>
    %140 = arith.truncf %139 : vector<8x128xf32> to vector<8x128xbf16>
    %c0_103 = arith.constant 0 : index
    %c40 = arith.constant 40 : index
    %c0_104 = arith.constant 0 : index
    %141 = vector.load %arg5[%c0_103, %c40, %c0_104] : memref<1x64x128xbf16, #tpu.memory_space<vmem>>, vector<1x8x128xbf16>
    %142 = vector.shape_cast %141 : vector<1x8x128xbf16> to vector<8x128xbf16>
    %143 = vector.shape_cast %140 : vector<8x128xbf16> to vector<1x8x128xbf16>
    tpu.vector_store %arg5[%c0_103, %c40, %c0_104], %143 {strides = array<i32>} : memref<1x64x128xbf16, #tpu.memory_space<vmem>>, vector<1x8x128xbf16>,
    %144 = vector.extract_strided_slice %101 {offsets = [108, 0], sizes = [8, 128], strides = [1, 1]} : vector<144x128xf32> to vector<8x128xf32>
    %145 = vector.extract_strided_slice %101 {offsets = [117, 0], sizes = [8, 128], strides = [1, 1]} : vector<144x128xf32> to vector<8x128xf32>
    %146 = arith.maximumf %144, %145 : vector<8x128xf32>
    %147 = arith.truncf %146 : vector<8x128xf32> to vector<8x128xbf16>
    %c0_105 = arith.constant 0 : index
    %c48 = arith.constant 48 : index
    %c0_106 = arith.constant 0 : index
    %148 = vector.load %arg5[%c0_105, %c48, %c0_106] : memref<1x64x128xbf16, #tpu.memory_space<vmem>>, vector<1x8x128xbf16>
    %149 = vector.shape_cast %148 : vector<1x8x128xbf16> to vector<8x128xbf16>
    %150 = vector.shape_cast %147 : vector<8x128xbf16> to vector<1x8x128xbf16>
    tpu.vector_store %arg5[%c0_105, %c48, %c0_106], %150 {strides = array<i32>} : memref<1x64x128xbf16, #tpu.memory_space<vmem>>, vector<1x8x128xbf16>,
    %151 = vector.extract_strided_slice %101 {offsets = [126, 0], sizes = [8, 128], strides = [1, 1]} : vector<144x128xf32> to vector<8x128xf32>
    %152 = vector.extract_strided_slice %101 {offsets = [135, 0], sizes = [8, 128], strides = [1, 1]} : vector<144x128xf32> to vector<8x128xf32>
    %153 = arith.maximumf %151, %152 : vector<8x128xf32>
    %154 = arith.truncf %153 : vector<8x128xf32> to vector<8x128xbf16>
    %c0_107 = arith.constant 0 : index
    %c56 = arith.constant 56 : index
    %c0_108 = arith.constant 0 : index
    %155 = vector.load %arg5[%c0_107, %c56, %c0_108] : memref<1x64x128xbf16, #tpu.memory_space<vmem>>, vector<1x8x128xbf16>
    %156 = vector.shape_cast %155 : vector<1x8x128xbf16> to vector<8x128xbf16>
    %157 = vector.shape_cast %154 : vector<8x128xbf16> to vector<1x8x128xbf16>
    tpu.vector_store %arg5[%c0_107, %c56, %c0_108], %157 {strides = array<i32>} : memref<1x64x128xbf16, #tpu.memory_space<vmem>>, vector<1x8x128xbf16>,
    return
  }
  func.func @transform_0(%arg0: i32) -> (i32, i32, i32) {
    %c0_i32 = arith.constant 0 : i32
    %c0_i32_0 = arith.constant 0 : i32
    %c0_i32_1 = arith.constant 0 : i32
    return %arg0, %c0_i32, %c0_i32_0 : i32, i32, i32
  }
  func.func @transform_1(%arg0: i32) -> (i32, i32, i32) {
    %c0_i32 = arith.constant 0 : i32
    %c0_i32_0 = arith.constant 0 : i32
    %c0_i32_1 = arith.constant 0 : i32
    return %arg0, %c0_i32, %c0_i32_0 : i32, i32, i32
  }
  func.func @transform_2(%arg0: i32) -> (i32, i32, i32) {
    %c0_i32 = arith.constant 0 : i32
    %c0_i32_0 = arith.constant 0 : i32
    %c0_i32_1 = arith.constant 0 : i32
    %c0_i32_2 = arith.constant 0 : i32
    return %c0_i32, %c0_i32_0, %c0_i32_1 : i32, i32, i32
  }
  func.func @transform_3(%arg0: i32) -> (i32, i32) {
    %c0_i32 = arith.constant 0 : i32
    %c0_i32_0 = arith.constant 0 : i32
    %c0_i32_1 = arith.constant 0 : i32
    return %c0_i32, %c0_i32_0 : i32, i32
  }
  func.func @transform_4(%arg0: i32) -> (i32, i32, i32) {
    %c0_i32 = arith.constant 0 : i32
    %c0_i32_0 = arith.constant 0 : i32
    %c0_i32_1 = arith.constant 0 : i32
    return %arg0, %c0_i32, %c0_i32_0 : i32, i32, i32
  }
}

module attributes {stable_mosaic.version = 11 : i64} {
  func.func @_conv_relu_pool_kernel(%arg0: i32, %arg1: memref<1x55x128xbf16, #tpu.memory_space<vmem>>, %arg2: memref<1x55x128xbf16, #tpu.memory_space<vmem>>, %arg3: memref<9x128x128xbf16, #tpu.memory_space<vmem>>, %arg4: memref<1x128xf32, #tpu.memory_space<vmem>>, %arg5: memref<1x16x128xbf16, #tpu.memory_space<vmem>>) attributes {dimension_semantics = [#tpu.dimension_semantics<parallel>], iteration_bounds = array<i64: 2>, scalar_prefetch = 0 : i64, scratch_operands = 0 : i64, tpu.core_type = #tpu.core_type<tc>, window_params = [{transform_indices = @transform_0, window_bounds = array<i64: 1, 55, 128>}, {transform_indices = @transform_1, window_bounds = array<i64: 1, 55, 128>}, {pipeline_mode = #tpu.pipeline_mode<synchronous>, transform_indices = @transform_2, window_bounds = array<i64: 9, 128, 128>}, {pipeline_mode = #tpu.pipeline_mode<synchronous>, transform_indices = @transform_3, window_bounds = array<i64: 1, 128>}, {transform_indices = @transform_4, window_bounds = array<i64: 1, 16, 128>}]} {
    %cst = arith.constant 0.000000e+00 : f32
    %0 = vector.broadcast %cst : f32 to vector<40x128xf32>
    %cst_0 = arith.constant 0.000000e+00 : f32
    %1 = vector.broadcast %cst_0 : f32 to vector<40x128xf32>
    %c0 = arith.constant 0 : index
    %c0_1 = arith.constant 0 : index
    %c0_2 = arith.constant 0 : index
    %2 = vector.load %arg3[%c0, %c0_1, %c0_2] : memref<9x128x128xbf16, #tpu.memory_space<vmem>>, vector<1x128x128xbf16>
    %3 = vector.shape_cast %2 : vector<1x128x128xbf16> to vector<128x128xbf16>
    %c0_3 = arith.constant 0 : index
    %c0_4 = arith.constant 0 : index
    %c0_5 = arith.constant 0 : index
    %4 = vector.load %arg1[%c0_3, %c0_4, %c0_5] : memref<1x55x128xbf16, #tpu.memory_space<vmem>>, vector<1x40x128xbf16>
    %5 = vector.shape_cast %4 : vector<1x40x128xbf16> to vector<40x128xbf16>
    %cst_6 = arith.constant dense<0.000000e+00> : vector<40x128xf32>
    %6 = tpu.matmul %5, %3, %cst_6 {dimension_numbers = #tpu.dot_dimension_numbers<[1], [0], [0], [1], [0, 0, 1, 1], [], []>} : vector<40x128xbf16>, vector<128x128xbf16>, vector<40x128xf32> -> vector<40x128xf32>
    %7 = arith.addf %0, %6 : vector<40x128xf32>
    %c0_7 = arith.constant 0 : index
    %c0_8 = arith.constant 0 : index
    %c0_9 = arith.constant 0 : index
    %8 = vector.load %arg2[%c0_7, %c0_8, %c0_9] : memref<1x55x128xbf16, #tpu.memory_space<vmem>>, vector<1x40x128xbf16>
    %9 = vector.shape_cast %8 : vector<1x40x128xbf16> to vector<40x128xbf16>
    %cst_10 = arith.constant dense<0.000000e+00> : vector<40x128xf32>
    %10 = tpu.matmul %9, %3, %cst_10 {dimension_numbers = #tpu.dot_dimension_numbers<[1], [0], [0], [1], [0, 0, 1, 1], [], []>} : vector<40x128xbf16>, vector<128x128xbf16>, vector<40x128xf32> -> vector<40x128xf32>
    %11 = arith.addf %1, %10 : vector<40x128xf32>
    %c1 = arith.constant 1 : index
    %c0_11 = arith.constant 0 : index
    %c0_12 = arith.constant 0 : index
    %12 = vector.load %arg3[%c1, %c0_11, %c0_12] : memref<9x128x128xbf16, #tpu.memory_space<vmem>>, vector<1x128x128xbf16>
    %13 = vector.shape_cast %12 : vector<1x128x128xbf16> to vector<128x128xbf16>
    %c0_13 = arith.constant 0 : index
    %c0_14 = arith.constant 0 : index
    %c0_15 = arith.constant 0 : index
    %14 = vector.load %arg2[%c0_13, %c0_14, %c0_15] : memref<1x55x128xbf16, #tpu.memory_space<vmem>>, vector<1x40x128xbf16>
    %15 = vector.shape_cast %14 : vector<1x40x128xbf16> to vector<40x128xbf16>
    %cst_16 = arith.constant dense<0.000000e+00> : vector<40x128xf32>
    %16 = tpu.matmul %15, %13, %cst_16 {dimension_numbers = #tpu.dot_dimension_numbers<[1], [0], [0], [1], [0, 0, 1, 1], [], []>} : vector<40x128xbf16>, vector<128x128xbf16>, vector<40x128xf32> -> vector<40x128xf32>
    %17 = arith.addf %7, %16 : vector<40x128xf32>
    %c0_17 = arith.constant 0 : index
    %c1_18 = arith.constant 1 : index
    %c0_19 = arith.constant 0 : index
    %18 = vector.load %arg1[%c0_17, %c1_18, %c0_19] : memref<1x55x128xbf16, #tpu.memory_space<vmem>>, vector<1x40x128xbf16>
    %19 = vector.shape_cast %18 : vector<1x40x128xbf16> to vector<40x128xbf16>
    %cst_20 = arith.constant dense<0.000000e+00> : vector<40x128xf32>
    %20 = tpu.matmul %19, %13, %cst_20 {dimension_numbers = #tpu.dot_dimension_numbers<[1], [0], [0], [1], [0, 0, 1, 1], [], []>} : vector<40x128xbf16>, vector<128x128xbf16>, vector<40x128xf32> -> vector<40x128xf32>
    %21 = arith.addf %11, %20 : vector<40x128xf32>
    %c2 = arith.constant 2 : index
    %c0_21 = arith.constant 0 : index
    %c0_22 = arith.constant 0 : index
    %22 = vector.load %arg3[%c2, %c0_21, %c0_22] : memref<9x128x128xbf16, #tpu.memory_space<vmem>>, vector<1x128x128xbf16>
    %23 = vector.shape_cast %22 : vector<1x128x128xbf16> to vector<128x128xbf16>
    %c0_23 = arith.constant 0 : index
    %c1_24 = arith.constant 1 : index
    %c0_25 = arith.constant 0 : index
    %24 = vector.load %arg1[%c0_23, %c1_24, %c0_25] : memref<1x55x128xbf16, #tpu.memory_space<vmem>>, vector<1x40x128xbf16>
    %25 = vector.shape_cast %24 : vector<1x40x128xbf16> to vector<40x128xbf16>
    %cst_26 = arith.constant dense<0.000000e+00> : vector<40x128xf32>
    %26 = tpu.matmul %25, %23, %cst_26 {dimension_numbers = #tpu.dot_dimension_numbers<[1], [0], [0], [1], [0, 0, 1, 1], [], []>} : vector<40x128xbf16>, vector<128x128xbf16>, vector<40x128xf32> -> vector<40x128xf32>
    %27 = arith.addf %17, %26 : vector<40x128xf32>
    %c0_27 = arith.constant 0 : index
    %c1_28 = arith.constant 1 : index
    %c0_29 = arith.constant 0 : index
    %28 = vector.load %arg2[%c0_27, %c1_28, %c0_29] : memref<1x55x128xbf16, #tpu.memory_space<vmem>>, vector<1x40x128xbf16>
    %29 = vector.shape_cast %28 : vector<1x40x128xbf16> to vector<40x128xbf16>
    %cst_30 = arith.constant dense<0.000000e+00> : vector<40x128xf32>
    %30 = tpu.matmul %29, %23, %cst_30 {dimension_numbers = #tpu.dot_dimension_numbers<[1], [0], [0], [1], [0, 0, 1, 1], [], []>} : vector<40x128xbf16>, vector<128x128xbf16>, vector<40x128xf32> -> vector<40x128xf32>
    %31 = arith.addf %21, %30 : vector<40x128xf32>
    %c3 = arith.constant 3 : index
    %c0_31 = arith.constant 0 : index
    %c0_32 = arith.constant 0 : index
    %32 = vector.load %arg3[%c3, %c0_31, %c0_32] : memref<9x128x128xbf16, #tpu.memory_space<vmem>>, vector<1x128x128xbf16>
    %33 = vector.shape_cast %32 : vector<1x128x128xbf16> to vector<128x128xbf16>
    %c0_33 = arith.constant 0 : index
    %c5 = arith.constant 5 : index
    %c0_34 = arith.constant 0 : index
    %34 = vector.load %arg1[%c0_33, %c5, %c0_34] : memref<1x55x128xbf16, #tpu.memory_space<vmem>>, vector<1x40x128xbf16>
    %35 = vector.shape_cast %34 : vector<1x40x128xbf16> to vector<40x128xbf16>
    %cst_35 = arith.constant dense<0.000000e+00> : vector<40x128xf32>
    %36 = tpu.matmul %35, %33, %cst_35 {dimension_numbers = #tpu.dot_dimension_numbers<[1], [0], [0], [1], [0, 0, 1, 1], [], []>} : vector<40x128xbf16>, vector<128x128xbf16>, vector<40x128xf32> -> vector<40x128xf32>
    %37 = arith.addf %27, %36 : vector<40x128xf32>
    %c0_36 = arith.constant 0 : index
    %c5_37 = arith.constant 5 : index
    %c0_38 = arith.constant 0 : index
    %38 = vector.load %arg2[%c0_36, %c5_37, %c0_38] : memref<1x55x128xbf16, #tpu.memory_space<vmem>>, vector<1x40x128xbf16>
    %39 = vector.shape_cast %38 : vector<1x40x128xbf16> to vector<40x128xbf16>
    %cst_39 = arith.constant dense<0.000000e+00> : vector<40x128xf32>
    %40 = tpu.matmul %39, %33, %cst_39 {dimension_numbers = #tpu.dot_dimension_numbers<[1], [0], [0], [1], [0, 0, 1, 1], [], []>} : vector<40x128xbf16>, vector<128x128xbf16>, vector<40x128xf32> -> vector<40x128xf32>
    %41 = arith.addf %31, %40 : vector<40x128xf32>
    %c4 = arith.constant 4 : index
    %c0_40 = arith.constant 0 : index
    %c0_41 = arith.constant 0 : index
    %42 = vector.load %arg3[%c4, %c0_40, %c0_41] : memref<9x128x128xbf16, #tpu.memory_space<vmem>>, vector<1x128x128xbf16>
    %43 = vector.shape_cast %42 : vector<1x128x128xbf16> to vector<128x128xbf16>
    %c0_42 = arith.constant 0 : index
    %c5_43 = arith.constant 5 : index
    %c0_44 = arith.constant 0 : index
    %44 = vector.load %arg2[%c0_42, %c5_43, %c0_44] : memref<1x55x128xbf16, #tpu.memory_space<vmem>>, vector<1x40x128xbf16>
    %45 = vector.shape_cast %44 : vector<1x40x128xbf16> to vector<40x128xbf16>
    %cst_45 = arith.constant dense<0.000000e+00> : vector<40x128xf32>
    %46 = tpu.matmul %45, %43, %cst_45 {dimension_numbers = #tpu.dot_dimension_numbers<[1], [0], [0], [1], [0, 0, 1, 1], [], []>} : vector<40x128xbf16>, vector<128x128xbf16>, vector<40x128xf32> -> vector<40x128xf32>
    %47 = arith.addf %37, %46 : vector<40x128xf32>
    %c0_46 = arith.constant 0 : index
    %c6 = arith.constant 6 : index
    %c0_47 = arith.constant 0 : index
    %48 = vector.load %arg1[%c0_46, %c6, %c0_47] : memref<1x55x128xbf16, #tpu.memory_space<vmem>>, vector<1x40x128xbf16>
    %49 = vector.shape_cast %48 : vector<1x40x128xbf16> to vector<40x128xbf16>
    %cst_48 = arith.constant dense<0.000000e+00> : vector<40x128xf32>
    %50 = tpu.matmul %49, %43, %cst_48 {dimension_numbers = #tpu.dot_dimension_numbers<[1], [0], [0], [1], [0, 0, 1, 1], [], []>} : vector<40x128xbf16>, vector<128x128xbf16>, vector<40x128xf32> -> vector<40x128xf32>
    %51 = arith.addf %41, %50 : vector<40x128xf32>
    %c5_49 = arith.constant 5 : index
    %c0_50 = arith.constant 0 : index
    %c0_51 = arith.constant 0 : index
    %52 = vector.load %arg3[%c5_49, %c0_50, %c0_51] : memref<9x128x128xbf16, #tpu.memory_space<vmem>>, vector<1x128x128xbf16>
    %53 = vector.shape_cast %52 : vector<1x128x128xbf16> to vector<128x128xbf16>
    %c0_52 = arith.constant 0 : index
    %c6_53 = arith.constant 6 : index
    %c0_54 = arith.constant 0 : index
    %54 = vector.load %arg1[%c0_52, %c6_53, %c0_54] : memref<1x55x128xbf16, #tpu.memory_space<vmem>>, vector<1x40x128xbf16>
    %55 = vector.shape_cast %54 : vector<1x40x128xbf16> to vector<40x128xbf16>
    %cst_55 = arith.constant dense<0.000000e+00> : vector<40x128xf32>
    %56 = tpu.matmul %55, %53, %cst_55 {dimension_numbers = #tpu.dot_dimension_numbers<[1], [0], [0], [1], [0, 0, 1, 1], [], []>} : vector<40x128xbf16>, vector<128x128xbf16>, vector<40x128xf32> -> vector<40x128xf32>
    %57 = arith.addf %47, %56 : vector<40x128xf32>
    %c0_56 = arith.constant 0 : index
    %c6_57 = arith.constant 6 : index
    %c0_58 = arith.constant 0 : index
    %58 = vector.load %arg2[%c0_56, %c6_57, %c0_58] : memref<1x55x128xbf16, #tpu.memory_space<vmem>>, vector<1x40x128xbf16>
    %59 = vector.shape_cast %58 : vector<1x40x128xbf16> to vector<40x128xbf16>
    %cst_59 = arith.constant dense<0.000000e+00> : vector<40x128xf32>
    %60 = tpu.matmul %59, %53, %cst_59 {dimension_numbers = #tpu.dot_dimension_numbers<[1], [0], [0], [1], [0, 0, 1, 1], [], []>} : vector<40x128xbf16>, vector<128x128xbf16>, vector<40x128xf32> -> vector<40x128xf32>
    %61 = arith.addf %51, %60 : vector<40x128xf32>
    %c6_60 = arith.constant 6 : index
    %c0_61 = arith.constant 0 : index
    %c0_62 = arith.constant 0 : index
    %62 = vector.load %arg3[%c6_60, %c0_61, %c0_62] : memref<9x128x128xbf16, #tpu.memory_space<vmem>>, vector<1x128x128xbf16>
    %63 = vector.shape_cast %62 : vector<1x128x128xbf16> to vector<128x128xbf16>
    %c0_63 = arith.constant 0 : index
    %c10 = arith.constant 10 : index
    %c0_64 = arith.constant 0 : index
    %64 = vector.load %arg1[%c0_63, %c10, %c0_64] : memref<1x55x128xbf16, #tpu.memory_space<vmem>>, vector<1x40x128xbf16>
    %65 = vector.shape_cast %64 : vector<1x40x128xbf16> to vector<40x128xbf16>
    %cst_65 = arith.constant dense<0.000000e+00> : vector<40x128xf32>
    %66 = tpu.matmul %65, %63, %cst_65 {dimension_numbers = #tpu.dot_dimension_numbers<[1], [0], [0], [1], [0, 0, 1, 1], [], []>} : vector<40x128xbf16>, vector<128x128xbf16>, vector<40x128xf32> -> vector<40x128xf32>
    %67 = arith.addf %57, %66 : vector<40x128xf32>
    %c0_66 = arith.constant 0 : index
    %c10_67 = arith.constant 10 : index
    %c0_68 = arith.constant 0 : index
    %68 = vector.load %arg2[%c0_66, %c10_67, %c0_68] : memref<1x55x128xbf16, #tpu.memory_space<vmem>>, vector<1x40x128xbf16>
    %69 = vector.shape_cast %68 : vector<1x40x128xbf16> to vector<40x128xbf16>
    %cst_69 = arith.constant dense<0.000000e+00> : vector<40x128xf32>
    %70 = tpu.matmul %69, %63, %cst_69 {dimension_numbers = #tpu.dot_dimension_numbers<[1], [0], [0], [1], [0, 0, 1, 1], [], []>} : vector<40x128xbf16>, vector<128x128xbf16>, vector<40x128xf32> -> vector<40x128xf32>
    %71 = arith.addf %61, %70 : vector<40x128xf32>
    %c7 = arith.constant 7 : index
    %c0_70 = arith.constant 0 : index
    %c0_71 = arith.constant 0 : index
    %72 = vector.load %arg3[%c7, %c0_70, %c0_71] : memref<9x128x128xbf16, #tpu.memory_space<vmem>>, vector<1x128x128xbf16>
    %73 = vector.shape_cast %72 : vector<1x128x128xbf16> to vector<128x128xbf16>
    %c0_72 = arith.constant 0 : index
    %c10_73 = arith.constant 10 : index
    %c0_74 = arith.constant 0 : index
    %74 = vector.load %arg2[%c0_72, %c10_73, %c0_74] : memref<1x55x128xbf16, #tpu.memory_space<vmem>>, vector<1x40x128xbf16>
    %75 = vector.shape_cast %74 : vector<1x40x128xbf16> to vector<40x128xbf16>
    %cst_75 = arith.constant dense<0.000000e+00> : vector<40x128xf32>
    %76 = tpu.matmul %75, %73, %cst_75 {dimension_numbers = #tpu.dot_dimension_numbers<[1], [0], [0], [1], [0, 0, 1, 1], [], []>} : vector<40x128xbf16>, vector<128x128xbf16>, vector<40x128xf32> -> vector<40x128xf32>
    %77 = arith.addf %67, %76 : vector<40x128xf32>
    %c0_76 = arith.constant 0 : index
    %c11 = arith.constant 11 : index
    %c0_77 = arith.constant 0 : index
    %78 = vector.load %arg1[%c0_76, %c11, %c0_77] : memref<1x55x128xbf16, #tpu.memory_space<vmem>>, vector<1x40x128xbf16>
    %79 = vector.shape_cast %78 : vector<1x40x128xbf16> to vector<40x128xbf16>
    %cst_78 = arith.constant dense<0.000000e+00> : vector<40x128xf32>
    %80 = tpu.matmul %79, %73, %cst_78 {dimension_numbers = #tpu.dot_dimension_numbers<[1], [0], [0], [1], [0, 0, 1, 1], [], []>} : vector<40x128xbf16>, vector<128x128xbf16>, vector<40x128xf32> -> vector<40x128xf32>
    %81 = arith.addf %71, %80 : vector<40x128xf32>
    %c8 = arith.constant 8 : index
    %c0_79 = arith.constant 0 : index
    %c0_80 = arith.constant 0 : index
    %82 = vector.load %arg3[%c8, %c0_79, %c0_80] : memref<9x128x128xbf16, #tpu.memory_space<vmem>>, vector<1x128x128xbf16>
    %83 = vector.shape_cast %82 : vector<1x128x128xbf16> to vector<128x128xbf16>
    %c0_81 = arith.constant 0 : index
    %c11_82 = arith.constant 11 : index
    %c0_83 = arith.constant 0 : index
    %84 = vector.load %arg1[%c0_81, %c11_82, %c0_83] : memref<1x55x128xbf16, #tpu.memory_space<vmem>>, vector<1x40x128xbf16>
    %85 = vector.shape_cast %84 : vector<1x40x128xbf16> to vector<40x128xbf16>
    %cst_84 = arith.constant dense<0.000000e+00> : vector<40x128xf32>
    %86 = tpu.matmul %85, %83, %cst_84 {dimension_numbers = #tpu.dot_dimension_numbers<[1], [0], [0], [1], [0, 0, 1, 1], [], []>} : vector<40x128xbf16>, vector<128x128xbf16>, vector<40x128xf32> -> vector<40x128xf32>
    %87 = arith.addf %77, %86 : vector<40x128xf32>
    %c0_85 = arith.constant 0 : index
    %c11_86 = arith.constant 11 : index
    %c0_87 = arith.constant 0 : index
    %88 = vector.load %arg2[%c0_85, %c11_86, %c0_87] : memref<1x55x128xbf16, #tpu.memory_space<vmem>>, vector<1x40x128xbf16>
    %89 = vector.shape_cast %88 : vector<1x40x128xbf16> to vector<40x128xbf16>
    %cst_88 = arith.constant dense<0.000000e+00> : vector<40x128xf32>
    %90 = tpu.matmul %89, %83, %cst_88 {dimension_numbers = #tpu.dot_dimension_numbers<[1], [0], [0], [1], [0, 0, 1, 1], [], []>} : vector<40x128xbf16>, vector<128x128xbf16>, vector<40x128xf32> -> vector<40x128xf32>
    %91 = arith.addf %81, %90 : vector<40x128xf32>
    %c0_89 = arith.constant 0 : index
    %c0_90 = arith.constant 0 : index
    %92 = vector.load %arg4[%c0_89, %c0_90] : memref<1x128xf32, #tpu.memory_space<vmem>>, vector<1x128xf32>
    %93 = vector.broadcast %92 : vector<1x128xf32> to vector<40x128xf32>
    %94 = arith.addf %87, %93 : vector<40x128xf32>
    %cst_91 = arith.constant 0.000000e+00 : f32
    %95 = vector.broadcast %cst_91 : f32 to vector<40x128xf32>
    %96 = arith.maximumf %94, %95 : vector<40x128xf32>
    %97 = vector.broadcast %92 : vector<1x128xf32> to vector<40x128xf32>
    %98 = arith.addf %91, %97 : vector<40x128xf32>
    %cst_92 = arith.constant 0.000000e+00 : f32
    %99 = vector.broadcast %cst_92 : f32 to vector<40x128xf32>
    %100 = arith.maximumf %98, %99 : vector<40x128xf32>
    %101 = arith.maximumf %96, %100 : vector<40x128xf32>
    %102 = vector.extract_strided_slice %101 {offsets = [0, 0], sizes = [4, 128], strides = [1, 1]} : vector<40x128xf32> to vector<4x128xf32>
    %103 = vector.extract_strided_slice %101 {offsets = [5, 0], sizes = [4, 128], strides = [1, 1]} : vector<40x128xf32> to vector<4x128xf32>
    %104 = arith.maximumf %102, %103 : vector<4x128xf32>
    %105 = arith.truncf %104 : vector<4x128xf32> to vector<4x128xbf16>
    %c0_93 = arith.constant 0 : index
    %c0_94 = arith.constant 0 : index
    %c0_95 = arith.constant 0 : index
    %106 = vector.load %arg5[%c0_93, %c0_94, %c0_95] : memref<1x16x128xbf16, #tpu.memory_space<vmem>>, vector<1x4x128xbf16>
    %107 = vector.shape_cast %106 : vector<1x4x128xbf16> to vector<4x128xbf16>
    %108 = vector.shape_cast %105 : vector<4x128xbf16> to vector<1x4x128xbf16>
    tpu.vector_store %arg5[%c0_93, %c0_94, %c0_95], %108 {strides = array<i32>} : memref<1x16x128xbf16, #tpu.memory_space<vmem>>, vector<1x4x128xbf16>,
    %109 = vector.extract_strided_slice %101 {offsets = [10, 0], sizes = [4, 128], strides = [1, 1]} : vector<40x128xf32> to vector<4x128xf32>
    %110 = vector.extract_strided_slice %101 {offsets = [15, 0], sizes = [4, 128], strides = [1, 1]} : vector<40x128xf32> to vector<4x128xf32>
    %111 = arith.maximumf %109, %110 : vector<4x128xf32>
    %112 = arith.truncf %111 : vector<4x128xf32> to vector<4x128xbf16>
    %c0_96 = arith.constant 0 : index
    %c4_97 = arith.constant 4 : index
    %c0_98 = arith.constant 0 : index
    %113 = vector.load %arg5[%c0_96, %c4_97, %c0_98] : memref<1x16x128xbf16, #tpu.memory_space<vmem>>, vector<1x4x128xbf16>
    %114 = vector.shape_cast %113 : vector<1x4x128xbf16> to vector<4x128xbf16>
    %115 = vector.shape_cast %112 : vector<4x128xbf16> to vector<1x4x128xbf16>
    tpu.vector_store %arg5[%c0_96, %c4_97, %c0_98], %115 {strides = array<i32>} : memref<1x16x128xbf16, #tpu.memory_space<vmem>>, vector<1x4x128xbf16>,
    %116 = vector.extract_strided_slice %101 {offsets = [20, 0], sizes = [4, 128], strides = [1, 1]} : vector<40x128xf32> to vector<4x128xf32>
    %117 = vector.extract_strided_slice %101 {offsets = [25, 0], sizes = [4, 128], strides = [1, 1]} : vector<40x128xf32> to vector<4x128xf32>
    %118 = arith.maximumf %116, %117 : vector<4x128xf32>
    %119 = arith.truncf %118 : vector<4x128xf32> to vector<4x128xbf16>
    %c0_99 = arith.constant 0 : index
    %c8_100 = arith.constant 8 : index
    %c0_101 = arith.constant 0 : index
    %120 = vector.load %arg5[%c0_99, %c8_100, %c0_101] : memref<1x16x128xbf16, #tpu.memory_space<vmem>>, vector<1x4x128xbf16>
    %121 = vector.shape_cast %120 : vector<1x4x128xbf16> to vector<4x128xbf16>
    %122 = vector.shape_cast %119 : vector<4x128xbf16> to vector<1x4x128xbf16>
    tpu.vector_store %arg5[%c0_99, %c8_100, %c0_101], %122 {strides = array<i32>} : memref<1x16x128xbf16, #tpu.memory_space<vmem>>, vector<1x4x128xbf16>,
    %123 = vector.extract_strided_slice %101 {offsets = [30, 0], sizes = [4, 128], strides = [1, 1]} : vector<40x128xf32> to vector<4x128xf32>
    %124 = vector.extract_strided_slice %101 {offsets = [35, 0], sizes = [4, 128], strides = [1, 1]} : vector<40x128xf32> to vector<4x128xf32>
    %125 = arith.maximumf %123, %124 : vector<4x128xf32>
    %126 = arith.truncf %125 : vector<4x128xf32> to vector<4x128xbf16>
    %c0_102 = arith.constant 0 : index
    %c12 = arith.constant 12 : index
    %c0_103 = arith.constant 0 : index
    %127 = vector.load %arg5[%c0_102, %c12, %c0_103] : memref<1x16x128xbf16, #tpu.memory_space<vmem>>, vector<1x4x128xbf16>
    %128 = vector.shape_cast %127 : vector<1x4x128xbf16> to vector<4x128xbf16>
    %129 = vector.shape_cast %126 : vector<4x128xbf16> to vector<1x4x128xbf16>
    tpu.vector_store %arg5[%c0_102, %c12, %c0_103], %129 {strides = array<i32>} : memref<1x16x128xbf16, #tpu.memory_space<vmem>>, vector<1x4x128xbf16>,
    return
  }
  func.func @transform_0(%arg0: i32) -> (i32, i32, i32) {
    %c0_i32 = arith.constant 0 : i32
    %c0_i32_0 = arith.constant 0 : i32
    %c0_i32_1 = arith.constant 0 : i32
    return %arg0, %c0_i32, %c0_i32_0 : i32, i32, i32
  }
  func.func @transform_1(%arg0: i32) -> (i32, i32, i32) {
    %c0_i32 = arith.constant 0 : i32
    %c0_i32_0 = arith.constant 0 : i32
    %c0_i32_1 = arith.constant 0 : i32
    return %arg0, %c0_i32, %c0_i32_0 : i32, i32, i32
  }
  func.func @transform_2(%arg0: i32) -> (i32, i32, i32) {
    %c0_i32 = arith.constant 0 : i32
    %c0_i32_0 = arith.constant 0 : i32
    %c0_i32_1 = arith.constant 0 : i32
    %c0_i32_2 = arith.constant 0 : i32
    return %c0_i32, %c0_i32_0, %c0_i32_1 : i32, i32, i32
  }
  func.func @transform_3(%arg0: i32) -> (i32, i32) {
    %c0_i32 = arith.constant 0 : i32
    %c0_i32_0 = arith.constant 0 : i32
    %c0_i32_1 = arith.constant 0 : i32
    return %c0_i32, %c0_i32_0 : i32, i32
  }
  func.func @transform_4(%arg0: i32) -> (i32, i32, i32) {
    %c0_i32 = arith.constant 0 : i32
    %c0_i32_0 = arith.constant 0 : i32
    %c0_i32_1 = arith.constant 0 : i32
    return %arg0, %c0_i32, %c0_i32_0 : i32, i32, i32
  }
}

module attributes {stable_mosaic.version = 11 : i64} {
  func.func @_fc_head_kernel(%arg0: i32, %arg1: memref<2x256xbf16, #tpu.memory_space<vmem>>, %arg2: memref<256x128xbf16, #tpu.memory_space<vmem>>, %arg3: memref<1x128xf32, #tpu.memory_space<vmem>>, %arg4: memref<1x128xf32, #tpu.memory_space<vmem>>, %arg5: memref<1x1xf32, #tpu.memory_space<vmem>>, %arg6: memref<2x1xf32, #tpu.memory_space<vmem>>, %arg7: memref<2x128xf32, #tpu.memory_space<vmem>>) attributes {dimension_semantics = [#tpu.dimension_semantics<arbitrary>], iteration_bounds = array<i64: 8>, scalar_prefetch = 0 : i64, scratch_operands = 1 : i64, tpu.core_type = #tpu.core_type<tc>, window_params = [{transform_indices = @transform_0, window_bounds = array<i64: 2, 256>}, {transform_indices = @transform_1, window_bounds = array<i64: 256, 128>}, {pipeline_mode = #tpu.pipeline_mode<synchronous>, transform_indices = @transform_2, window_bounds = array<i64: 1, 128>}, {pipeline_mode = #tpu.pipeline_mode<synchronous>, transform_indices = @transform_3, window_bounds = array<i64: 1, 128>}, {pipeline_mode = #tpu.pipeline_mode<synchronous>, transform_indices = @transform_4, window_bounds = array<i64: 1, 1>}, {pipeline_mode = #tpu.pipeline_mode<synchronous>, transform_indices = @transform_5, window_bounds = array<i64: 2, 1>}]} {
    %c0_i32 = arith.constant 0 : i32
    %0 = arith.cmpi eq, %arg0, %c0_i32 : i32
    %1 = arith.extui %0 : i1 to i32
    %c0_i32_0 = arith.constant 0 : i32
    %2 = arith.cmpi ne, %1, %c0_i32_0 : i32
    scf.if %2 {
      %cst_9 = arith.constant 0.000000e+00 : f32
      %12 = vector.broadcast %cst_9 : f32 to vector<2x128xf32>
      %c0_10 = arith.constant 0 : index
      %c0_11 = arith.constant 0 : index
      %13 = vector.load %arg7[%c0_10, %c0_11] : memref<2x128xf32, #tpu.memory_space<vmem>>, vector<2x128xf32>
      tpu.vector_store %arg7[%c0_10, %c0_11], %12 {strides = array<i32>} : memref<2x128xf32, #tpu.memory_space<vmem>>, vector<2x128xf32>,
    } else {
    }
    %c0 = arith.constant 0 : index
    %c0_1 = arith.constant 0 : index
    %3 = vector.load %arg7[%c0, %c0_1] : memref<2x128xf32, #tpu.memory_space<vmem>>, vector<2x128xf32>
    %c0_2 = arith.constant 0 : index
    %c0_3 = arith.constant 0 : index
    %4 = vector.load %arg1[%c0_2, %c0_3] : memref<2x256xbf16, #tpu.memory_space<vmem>>, vector<2x256xbf16>
    %c0_4 = arith.constant 0 : index
    %c0_5 = arith.constant 0 : index
    %5 = vector.load %arg2[%c0_4, %c0_5] : memref<256x128xbf16, #tpu.memory_space<vmem>>, vector<256x128xbf16>
    %cst = arith.constant dense<0.000000e+00> : vector<2x128xf32>
    %6 = tpu.matmul %4, %5, %cst {dimension_numbers = #tpu.dot_dimension_numbers<[1], [0], [0], [1], [0, 0, 1, 1], [], []>} : vector<2x256xbf16>, vector<256x128xbf16>, vector<2x128xf32> -> vector<2x128xf32>
    %7 = arith.addf %3, %6 : vector<2x128xf32>
    %c0_6 = arith.constant 0 : index
    %c0_7 = arith.constant 0 : index
    %8 = vector.load %arg7[%c0_6, %c0_7] : memref<2x128xf32, #tpu.memory_space<vmem>>, vector<2x128xf32>
    tpu.vector_store %arg7[%c0_6, %c0_7], %7 {strides = array<i32>} : memref<2x128xf32, #tpu.memory_space<vmem>>, vector<2x128xf32>,
    %c7_i32 = arith.constant 7 : i32
    %9 = arith.cmpi eq, %arg0, %c7_i32 : i32
    %10 = arith.extui %9 : i1 to i32
    %c0_i32_8 = arith.constant 0 : i32
    %11 = arith.cmpi ne, %10, %c0_i32_8 : i32
    scf.if %11 {
      %c0_9 = arith.constant 0 : index
      %c0_10 = arith.constant 0 : index
      %12 = vector.load %arg7[%c0_9, %c0_10] : memref<2x128xf32, #tpu.memory_space<vmem>>, vector<2x128xf32>
      %c0_11 = arith.constant 0 : index
      %c0_12 = arith.constant 0 : index
      %13 = vector.load %arg3[%c0_11, %c0_12] : memref<1x128xf32, #tpu.memory_space<vmem>>, vector<1x128xf32>
      %14 = vector.broadcast %13 : vector<1x128xf32> to vector<2x128xf32>
      %15 = arith.addf %12, %14 : vector<2x128xf32>
      %cst_13 = arith.constant 0.000000e+00 : f32
      %16 = vector.broadcast %cst_13 : f32 to vector<2x128xf32>
      %17 = arith.maximumf %15, %16 : vector<2x128xf32>
      %c0_14 = arith.constant 0 : index
      %c0_15 = arith.constant 0 : index
      %18 = vector.load %arg4[%c0_14, %c0_15] : memref<1x128xf32, #tpu.memory_space<vmem>>, vector<1x128xf32>
      %19 = vector.broadcast %18 : vector<1x128xf32> to vector<2x128xf32>
      %20 = arith.mulf %17, %19 : vector<2x128xf32>
      %cst_16 = arith.constant dense<0.000000e+00> : vector<2xf32>
      %21 = vector.multi_reduction <add>, %20, %cst_16 [1] : vector<2x128xf32> to vector<2xf32>
      %22 = vector.shape_cast %21 : vector<2xf32> to vector<2x1xf32>
      %c0_17 = arith.constant 0 : index
      %c0_18 = arith.constant 0 : index
      %23 = vector.load %arg5[%c0_17, %c0_18] : memref<1x1xf32, #tpu.memory_space<vmem>>, vector<1x1xf32>
      %24 = vector.broadcast %23 : vector<1x1xf32> to vector<2x1xf32>
      %25 = arith.addf %22, %24 : vector<2x1xf32>
      %26 = arith.negf %25 : vector<2x1xf32>
      %27 = math.exp %26 : vector<2x1xf32>
      %cst_19 = arith.constant 1.000000e+00 : f32
      %28 = vector.broadcast %cst_19 : f32 to vector<2x1xf32>
      %29 = arith.addf %28, %27 : vector<2x1xf32>
      %30 = arith.divf %28, %29 : vector<2x1xf32>
      %c0_20 = arith.constant 0 : index
      %c0_21 = arith.constant 0 : index
      %31 = vector.load %arg6[%c0_20, %c0_21] : memref<2x1xf32, #tpu.memory_space<vmem>>, vector<2x1xf32>
      tpu.vector_store %arg6[%c0_20, %c0_21], %30 {strides = array<i32>} : memref<2x1xf32, #tpu.memory_space<vmem>>, vector<2x1xf32>,
    } else {
    }
    return
  }
  func.func @transform_0(%arg0: i32) -> (i32, i32) {
    %c0_i32 = arith.constant 0 : i32
    %c0_i32_0 = arith.constant 0 : i32
    return %c0_i32, %arg0 : i32, i32
  }
  func.func @transform_1(%arg0: i32) -> (i32, i32) {
    %c0_i32 = arith.constant 0 : i32
    %c0_i32_0 = arith.constant 0 : i32
    return %arg0, %c0_i32 : i32, i32
  }
  func.func @transform_2(%arg0: i32) -> (i32, i32) {
    %c0_i32 = arith.constant 0 : i32
    %c0_i32_0 = arith.constant 0 : i32
    %c0_i32_1 = arith.constant 0 : i32
    return %c0_i32, %c0_i32_0 : i32, i32
  }
  func.func @transform_3(%arg0: i32) -> (i32, i32) {
    %c0_i32 = arith.constant 0 : i32
    %c0_i32_0 = arith.constant 0 : i32
    %c0_i32_1 = arith.constant 0 : i32
    return %c0_i32, %c0_i32_0 : i32, i32
  }
  func.func @transform_4(%arg0: i32) -> (i32, i32) {
    %c0_i32 = arith.constant 0 : i32
    %c0_i32_0 = arith.constant 0 : i32
    %c0_i32_1 = arith.constant 0 : i32
    return %c0_i32, %c0_i32_0 : i32, i32
  }
  func.func @transform_5(%arg0: i32) -> (i32, i32) {
    %c0_i32 = arith.constant 0 : i32
    %c0_i32_0 = arith.constant 0 : i32
    %c0_i32_1 = arith.constant 0 : i32
    return %c0_i32, %c0_i32_0 : i32, i32
  }
}

</mosaic_0001>

<bundles_post_ra>
// kernel: cnn_forward.5
= control target key start
LH: loop header
LB: loop body
LE: loop exit
PB: predicated region body
PF: predicated region fallthrough
CT: control target
= control target key end

     0   :  { %s642_s20 = smov 0   ;;  %s695_s0 = inlined_call_operand.vmem [shape: bf16[2,2048], index: 0, kind: input, shape index: {}]   ;;  %s696_s1 = inlined_call_operand.vmem [shape: bf16[2048,128], index: 1, kind: input, shape index: {}]   ;;  %s697_s2 = inlined_call_operand.vmem [shape: f32[1,128], index: 2, kind: input, shape index: {}]   ;;  %s698_s3 = inlined_call_operand.vmem [shape: f32[1,128], index: 3, kind: input, shape index: {}]   ;;  %s699_s4 = inlined_call_operand.<no memory space> [shape: f32[1,1], index: 4, kind: input, shape index: {}]   ;;  %s700_s5 = inlined_call_operand.vmem [shape: f32[2,1], index: 5, kind: output, shape index: {}]  }
   0x1   :  { %v10_v0 = vstv %s699_s4 }
   0x2   :  { %11 = vst [vmem:[#allocation3] sm:$0x1] %v10_v0 }
   0x3 LB: > { %s648_s21 = sadd.s32 4294967295, %s605_s20   ;;  %p518_p0 = scmp.ge.s32.totalorder %s605_s20, 1  ;;  %s605_s20 = sphi %s642_s20, %s17_s20  }
   0x4   : > { %p195_p1 = scmp.lt.s32.totalorder %s605_s20, 9 }
   0x6   : > { %p196_p2 = pnand %p518_p0, %p195_p1 }
   0x7   : > { %s519_s4 = sshll.u32 (!%p196_p2), %s648_s21, 1  ;;  %s520_s22 = sshll.u32 (!%p196_p2), %s648_s21, 5 }
   0x8   : > { %199 = sbr.rel (%p196_p2) target bundleno = 460 (0x1cc), region = 40  ;;  %p223_p3 = scmp.lt.s32.totalorder (!%p196_p2), %s519_s4, 15 }
   0x9   : > { %p228_p4 = scmp.lt.s32.totalorder (!%p196_p2), %s520_s22, 255  ;;  %p522_p5 = scmp.ne.s32.totalorder (!%p196_p2), %s648_s21, 0 }
   0xf   : > { %s702_s4 = smov (!%p223_p3, %s519_s4), 15  ;;  %s704_s22 = smov (!%p228_p4, %s520_s22), 255 }
  0x10   : > { %s225_s25 = scalar_lea.vmem %s695_s0, %s702_s4  ;;  %s521_s26 = sshll.u32 %s704_s22, 2  ;;  %v607_v1 = vmov (!%p522_p5), 0.0  }
  0x11   : > { %s663_s29 = scalar_lea.vmem %s696_s1, %s521_s26  ;;  %237 = sbr.rel (%p522_p5) target bundleno = 24 (0x18), region = 44  ;;  %238 = vst [vmem:[#allocation2] sm:$0x3] (!%p522_p5), %v607_v1 }
  0x18 PF: > { %v579_v2 = vld [vmem:[%s663_s29 + $0x40] sm:$0xff]   ;;  %v581_v4 = vld [vmem:[%s663_s29 + $0x48] sm:$0xff]   ;;  %v583_v6 = vld [vmem:[%s663_s29 + $0x50] sm:$0xff]   ;;  %v285_v11 = vlaneseq  ;;  %v608_v15 = vmov 1966171168   ;;  %p540_p6 = scmp.ne.s32.totalorder %s648_s21, 7 }
  0x19   : > { %v580_v3 = vld [vmem:[%s663_s29] sm:$0xff]   ;;  %547 = vmatprep.subr.bf16.mxu0 %v579_v2  ;;  %v582_v5 = vld [vmem:[%s663_s29 + $0x8] sm:$0xff]   ;;  %v584_v7 = vld [vmem:[%s663_s29 + $0x10] sm:$0xff]   ;;  %v283_v16 = vunpack.c.l.s4 %v608_v15  ;;  %vm458_vm0 = vcmask (!%p540_p6), 1041408   ;;  %vm476_vm1 = vcmask (!%p540_p6), 1024  }
  0x1a   : > { %548 = vmatpush3.bf16.msra.mxu0 %v580_v3  ;;  %v585_v8 = vld [vmem:[%s663_s29 + $0x58] sm:$0xff]   ;;  %v587_v10 = vld [vmem:[%s663_s29 + $0x60] sm:$0xff]   ;;  %v589_v13 = vld [vmem:[%s663_s29 + $0x68] sm:$0xff]   ;;  %v286_v17 = vshrl.u32 %v285_v11, 7 }
  0x1b   : > { %549 = vmatprep.subr.bf16.mxu0 %v581_v4  ;;  %v586_v9 = vld [vmem:[%s663_s29 + $0x18] sm:$0xff]   ;;  %v588_v12 = vld [vmem:[%s663_s29 + $0x20] sm:$0xff]   ;;  %v590_v18 = vld [vmem:[%s663_s29 + $0x28] sm:$0xff]   ;;  %v284_v20 = vunpack.c.0.s8 %v283_v16 }
  0x1c   : > { %v523_v14 = vld.sshfl [vmem:[%s225_s25] sm:$0x11 pattern:$0x75316420]  ;;  %v591_v21 = vld [vmem:[%s663_s29 + $0x70] sm:$0xff]   ;;  %v593_v25 = vld [vmem:[%s663_s29 + $0x78] sm:$0xff]  }
  0x1d   : > { %v281_v19 = vcombine.high %v523_v14, %v523_v14  ;;  %v287_v22 = vsub.s32 %v284_v20, %v286_v17  ;;  %v592_v23 = vld [vmem:[%s663_s29 + $0x30] sm:$0xff]   ;;  %v594_v26 = vld [vmem:[%s663_s29 + $0x38] sm:$0xff]   ;;  %v239_v29 = vld [vmem:[#allocation2] sm:$0x3] }
  0x1e   : > { %550 = vmatpush3.bf16.msra.mxu0 %v582_v5  ;;  %v541_v36 = vld [vmem:[%s697_s2] ss:$0 sm:$0xff] (!%p540_p6)  ;;  %v543_v42 = vld [vmem:[#allocation3] ss:$0 sm:$0xff] (!%p540_p6) }
  0x1f   : > { %551 = vmatprep.subr.bf16.mxu0 %v583_v6  ;;  %v295_v24 = vrot.slane %v281_v19, %v287_v22  ;;  %v288_v27 = vrot.slane %v523_v14, %v287_v22  ;;  %v542_v38 = vld [vmem:[%s698_s3] ss:$0 sm:$0xff] (!%p540_p6) }
  0x21   : > { %426 = vmatprep.mubr.bf16.mxu0 %v295_v24 }
  0x22   : > { %552 = vmatpush3.bf16.msra.mxu0 %v584_v7 }
  0x23   : > { %553 = vmatprep.subr.bf16.mxu0 %v585_v8 }
  0x26   : > { %554 = vmatpush3.bf16.msra.mxu0 %v586_v9 }
  0x27   : > { %555 = vmatprep.subr.bf16.mxu0 %v587_v10 }
  0x2a   : > { %556 = vmatpush3.bf16.msra.mxu0 %v588_v12 }
  0x2b   : > { %557 = vmatprep.subr.bf16.mxu0 %v589_v13 }
  0x2e   : > { %558 = vmatpush3.bf16.msra.mxu0 %v590_v18 }
  0x2f   : > { %559 = vmatprep.subr.bf16.mxu0 %v591_v21 }
  0x32   : > { %560 = vmatpush3.bf16.msra.mxu0 %v592_v23 }
  0x33   : > { %561 = vmatprep.subr.bf16.mxu0 %v593_v25 }
  0x36   : > { %562 = vmatpush3.bf16.msra.mxu0 %v594_v26 }
  0x39   : > { %427 = vmatmul.mubr.bf16.vlgmr.msra.gmra.mrb[0].mxu0 %v288_v27 }
 0x10c   : > { %v563_v28 = vpop.f32.mrb[0].mxu0  ;;  %439 = sbr.rel (%p540_p6) target bundleno = 460 (0x1cc), region = 48 }
 0x10d   : > { %v564_v30 = vpop.f32.mrb[1].mxu0 }
 0x10e   : > { %v565_v31 = vadd.f32 %v564_v30, %v563_v28  ;;  %v566_v32 = vpop.f32.mrb[2].mxu0 }
 0x10f   : > { %v567_v33 = vpop.f32.mrb[3].mxu0 }
 0x110   : > { %v434_v34 = vadd.f32 %v565_v31, %v239_v29 }
 0x112   : > { %435 = vst [vmem:[#allocation2] sm:$0x3] %v434_v34 }
 0x119   : > { %v440_v35 = vld [vmem:[#allocation2] sm:$0x3] }
 0x11a   : > { %v448_v37 = vadd.f32 %v541_v36, %v440_v35 }
 0x11c   : > { %v449_v39 = vmax.f32 %v448_v37, 0.0 }
 0x11e   : > { %v457_v40 = vmul.f32 %v542_v38, %v449_v39 }
 0x120   : > { %v459_v41 = vsel %vm458_vm0, %v457_v40, 0.0 }
 0x121   : > { %460 = vadd.xlane.f32.xlu0 %v459_v41 }
 0x1ae   : > { %v461_v43 = vpop.xlane.xlu0 %460 }
 0x1af   : > { %v469_v44 = vadd.f32 %v543_v42, %v461_v43 }
 0x1b1   : > { %v544_v45 = vmul.f32 -1.442695, %v469_v44 }
 0x1b3   : > { %595 = vpow2.f32 %v544_v45 }
 0x1bd   : > { %v596_v46 = vpop.eup %595 }
 0x1be   : > { %v473_v47 = vadd.f32 1.0, %v596_v46 }
 0x1c0   : > { %597 = vrcp.f32 %v473_v47 }
 0x1ca   : > { %v598_v48 = vpop.eup %597 }
 0x1cb   : > { %477 = vst.msk [vmem:[%s700_s5] sm:$0x3] %vm476_vm1, %v598_v48 }
 0x1cc PF: > { %s17_s20 = sadd.s32 1, %s605_s20  }
 0x1cd   : > { %p14_p7 = scmp.ge.s32.totalorder %s17_s20, 10  }
 0x1cf   :  { %16 = sbr.rel (!%p14_p7) target bundleno = 3 (0x3), region = 77 }

// kernel: cnn_forward.4
= control target key start
LH: loop header
LB: loop body
LE: loop exit
PB: predicated region body
PF: predicated region fallthrough
CT: control target
= control target key end

     0   :  { %s3482_s15 = smov 0   ;;  %s4267_s0 = inlined_call_operand.vmem [shape: bf16[2,55,128], index: 0, kind: input, shape index: {}]   ;;  %s4268_s1 = inlined_call_operand.vmem [shape: bf16[2,55,128], index: 1, kind: input, shape index: {}]   ;;  %s4269_s2 = inlined_call_operand.vmem [shape: bf16[9,128,128], index: 2, kind: input, shape index: {}]   ;;  %s4270_s3 = inlined_call_operand.vmem [shape: f32[1,128], index: 3, kind: input, shape index: {}]   ;;  %s4271_s4 = inlined_call_operand.vmem [shape: bf16[2,16,128], index: 4, kind: output, shape index: {}]  }
   0x1 LB: > { %s2387_s16 = sadd.s32 4294967295, %s3453_s15   ;;  %p2391_p0 = scmp.ge.s32.totalorder %s3453_s15, 1  ;;  %s3453_s15 = sphi %s3482_s15, %s14_s15  }
   0x2   : > { %p172_p1 = scmp.lt.s32.totalorder %s3453_s15, 3 }
   0x4   : > { %p173_p2 = pnand %p2391_p0, %p172_p1 }
   0x5   : > { %v3349_v0 = vld [vmem:[%s4269_s2 + $0x40] sm:$0xff] (!%p173_p2)   ;;  %v3455_v1 = vmov (!%p173_p2), 0.0   ;;  %v3501_v3 = vld [vmem:[%s4269_s2 + $0x48] sm:$0xff] (!%p173_p2)   ;;  %vm3456_vm0 = vmmov (!%p173_p2), 0   ;;  %p203_p3 = scmp.lt.s32.totalorder (!%p173_p2), %s2387_s16, 1  ;;  %v3353_v5 = vld [vmem:[%s4269_s2 + $0x50] sm:$0xff] (!%p173_p2)  }
   0x6   : > { %176 = sbr.rel (%p173_p2) target bundleno = 541 (0x21d), region = 36  ;;  %2834 = vmatprep.subr.bf16.mxu0 (!%p173_p2), %v3455_v1  ;;  %2862 = vmatprep.subr.bf16.mxu1 (!%p173_p2), %v3455_v1  ;;  %v3350_v2 = vld [vmem:[%s4269_s2] sm:$0xff] (!%p173_p2)   ;;  %v3352_v4 = vld [vmem:[%s4269_s2 + $0x8] sm:$0xff] (!%p173_p2)   ;;  %v3354_v6 = vld [vmem:[%s4269_s2 + $0x10] sm:$0xff] (!%p173_p2)   ;;  %vm1278_vm1 = vcmask (!%p173_p2), 1044480   ;;  %vm1585_vm4 = vcmask (!%p173_p2), 1046528  }
   0x7   : > { %2835 = vmatpush3.bf16.msra.mxu0 (!%p173_p2), %v3349_v0  ;;  %2850 = vmatprep.mubr.msk.bf16.mxu0 (!%p173_p2), %vm3456_vm0, %v3455_v1  ;;  %v3526_v7 = vld [vmem:[%s4269_s2 + $0x58] sm:$0xff] (!%p173_p2)   ;;  %v3538_v9 = vld [vmem:[%s4269_s2 + $0x60] sm:$0xff] (!%p173_p2)   ;;  %v3561_v11 = vld [vmem:[%s4269_s2 + $0x68] sm:$0xff] (!%p173_p2)   ;;  %vm523_vm2 = vsmask.f32 (!%p173_p2), 7424  ;;  %vm2268_vm6 = vcmask (!%p173_p2), 1042432  }
   0x8   : > { %2863 = vmatpush3.bf16.msra.mxu1 (!%p173_p2), %v3350_v2  ;;  %2836 = vmatprep.subr.bf16.mxu0 (!%p173_p2), %v3455_v1  ;;  %v3356_v8 = vld [vmem:[%s4269_s2 + $0x18] sm:$0xff] (!%p173_p2)   ;;  %v3544_v10 = vld [vmem:[%s4269_s2 + $0x20] sm:$0xff] (!%p173_p2)   ;;  %v3568_v12 = vld [vmem:[%s4269_s2 + $0x28] sm:$0xff] (!%p173_p2)   ;;  %vm921_vm3 = vsmask.f32 (!%p173_p2), 5376  ;;  %vm2312_vm7 = vcmask (!%p173_p2), 1046532  }
   0x9   : > { %2864 = vmatprep.subr.bf16.mxu1 (!%p173_p2), %v3455_v1  ;;  %2878 = vmatprep.mubr.msk.bf16.mxu1 (!%p173_p2), %vm3456_vm0, %v3455_v1  ;;  %v3575_v13 = vld [vmem:[%s4269_s2 + $0x70] sm:$0xff] (!%p173_p2)   ;;  %v3589_v15 = vld [vmem:[%s4269_s2 + $0x78] sm:$0xff] (!%p173_p2)   ;;  %v3373_v41 = vld [vmem:[%s4269_s2 + $0x80] sm:$0xff] (!%p173_p2)   ;;  %vm1923_vm5 = vsmask.f32 (!%p173_p2), 6400 }
   0xa   : > { %v3582_v14 = vld [vmem:[%s4269_s2 + $0x30] sm:$0xff] (!%p173_p2)   ;;  %v3596_v16 = vld [vmem:[%s4269_s2 + $0x38] sm:$0xff] (!%p173_p2)   ;;  %v3374_v49 = vld [vmem:[%s4269_s2 + $0x88] sm:$0xff] (!%p173_p2)  }
   0xb   : > { %2837 = vmatpush3.bf16.msra.mxu0 (!%p173_p2), %v3501_v3  ;;  %v3375_v55 = vld [vmem:[%s4269_s2 + $0x90] sm:$0xff] (!%p173_p2)   ;;  %v3376_v62 = vld [vmem:[%s4269_s2 + $0x98] sm:$0xff] (!%p173_p2)   ;;  %vm2313_vm8 = vmor (!%p173_p2), %vm2268_vm6, %vm2312_vm7 }
   0xc   : > { %2865 = vmatpush3.bf16.msra.mxu1 (!%p173_p2), %v3352_v4  ;;  %2838 = vmatprep.subr.bf16.mxu0 (!%p173_p2), %v3455_v1 }
   0xd   : > { %s4273_s16 = smov (!%p203_p3, %s2387_s16), 1  ;;  %2866 = vmatprep.subr.bf16.mxu1 %v3455_v1 }
   0xe   : > { %s3338_s7 = smul.u32 28, %s4273_s16  ;;  %s2631_s8 = sshll.u32 %s4273_s16, 3 }
   0xf   : > { %2839 = vmatpush3.bf16.msra.mxu0 %v3353_v5  ;;  %s4253_s10 = scalar_lea.vmem %s4271_s4, %s2631_s8 }
  0x10   : > { %2867 = vmatpush3.bf16.msra.mxu1 %v3354_v6  ;;  %2840 = vmatprep.subr.bf16.mxu0 %v3455_v1  ;;  %s3549_s14 = scalar_lea.vmem %s4268_s1, %s3338_s7  ;;  %s3555_s19 = scalar_lea.vmem %s4267_s0, %s3338_s7 }
  0x11   : > { %2868 = vmatprep.subr.bf16.mxu1 %v3455_v1  ;;  %v3600_v17 = vld [vmem:[%s3549_s14] sm:$0xff]   ;;  %v3615_v19 = vld [vmem:[%s3549_s14 + $0x8] sm:$0xff]   ;;  %v3634_v24 = vld [vmem:[%s3549_s14 + $0x10] ss:$0 sps:$4 sm:$0xff]  }
  0x12   : > { %v3366_v18 = vld [vmem:[%s3555_s19] sm:$0xff]   ;;  %v3368_v20 = vld [vmem:[%s3555_s19 + $0x8] sm:$0xff]   ;;  %v3370_v25 = vld [vmem:[%s3555_s19 + $0x10] ss:$0 sps:$4 sm:$0xff]  }
  0x13   : > { %2841 = vmatpush3.bf16.msra.mxu0 %v3526_v7  ;;  %v502_v21 = vld [vmem:[%s3555_s19] sm:$0xf]  ;;  %v3624_v22 = vld [vmem:[%s3555_s19 + $0x4] sm:$0xf]  ;;  %v3641_v26 = vld [vmem:[%s3555_s19 + $0x8] sm:$0xff]  }
  0x14   : > { %2869 = vmatpush3.bf16.msra.mxu1 %v3356_v8  ;;  %2842 = vmatprep.subr.bf16.mxu0 %v3455_v1  ;;  %v2434_v23 = vcombine.low %v502_v21, %v3624_v22  ;;  %v532_v30 = vshll.u32 %v3641_v26, 16  ;;  %v3654_v31 = vld [vmem:[%s3555_s19 + $0x10] sm:$0xf]  ;;  %v507_v32 = vld [vmem:[%s3555_s19 + $0x14] sm:$0x1]  ;;  %v1280_v35 = vrot.slane %v3641_v26, 3 }
  0x15   : > { %2870 = vmatprep.subr.bf16.mxu1 %v3455_v1  ;;  %v1274_v33 = vld [vmem:[%s3555_s19] sm:$0x8]  ;;  %v2436_v36 = vcombine.low %v3654_v31, %v507_v32  ;;  %v536_v42 = vshrl.u32 %v3641_v26, 16  ;;  %v3681_v44 = vld [vmem:[%s3549_s14 + $0x8] sm:$0xff]   ;;  %v3688_v46 = vld [vmem:[%s3549_s14 + $0x4] sm:$0xf] }
  0x16   : > { %v527_v27 = vshll.u32 %v2434_v23, 16  ;;  %v525_v28 = vshrl.u32 %v2434_v23, 16  ;;  %v2516_v34 = vcombine.low %v1274_v33, %v3624_v22  ;;  %v534_v39 = vrot.slane %v532_v30, 1  ;;  %v1474_v47 = vld [vmem:[%s3549_s14] sm:$0x8] }
  0x17   : > { %2843 = vmatpush3.bf16.msra.mxu0 %v3538_v9  ;;  %v540_v43 = vshll.u32 %v2436_v36, 16  ;;  %v1479_v48 = vrot.slane %v3681_v44, 3  ;;  %v2541_v50 = vcombine.low %v1474_v47, %v3688_v46  ;;  %v1056_v51 = vld [vmem:[%s3549_s14 + $0x14] sm:$0x7]  ;;  %v792_v56 = vld [vmem:[%s3549_s14 + $0x10] sm:$0xf] }
  0x18   : > { %2871 = vmatpush3.bf16.msra.mxu1 %v3544_v10  ;;  %2844 = vmatprep.subr.bf16.mxu0 %v3455_v1  ;;  %v529_v29 = vrot.slane %v527_v27, 1  ;;  %v1279_v37 = vrot.slane %v2516_v34, 3  ;;  %v538_v52 = vor.u32 %v536_v42, %v534_v39  ;;  %v3717_v58 = vcombine.low %v792_v56, %v1056_v51  ;;  %v788_v63 = vld [vmem:[%s3549_s14] sm:$0xf]  ;;  %v3390_v27 = vld [vmem:[%s4269_s2 + $0xd8] sm:$0xff]  }
  0x19   : > { %2872 = vmatprep.subr.bf16.mxu1 %v3455_v1  ;;  %v542_v53 = vrot.slane %v540_v43, 1  ;;  %v1478_v54 = vrot.slane %v2541_v50, 3  ;;  %v544_v60 = vshrl.u32 %v2436_v36, 16  ;;  %v1055_v32 = vld [vmem:[%s3549_s14] sm:$0xc]  ;;  %v930_v47 = vrot.slane %v536_v42, 2 }
  0x1a   : > { %v530_v38 = vor.u32 %v529_v29, %v525_v28  ;;  %v3673_v40 = vsel %vm1278_vm1, %v1279_v37, %v1280_v35  ;;  %v1481_v61 = vrot.slane %v3717_v58, 3  ;;  %v913_v29 = vld [vmem:[%s3555_s19] sm:$0xc]  ;;  %v2490_v37 = vcombine.low %v1055_v32, %v3688_v46  ;;  %v3393_v50 = vld [vmem:[%s4269_s2 + $0xf0] sm:$0xff]  }
  0x1b   : > { %2845 = vmatpush3.bf16.msra.mxu0 %v3561_v11  ;;  %v3713_v57 = vsel %vm1278_vm1, %v1478_v54, %v1479_v48  ;;  %v3720_v59 = vsel %vm523_vm2, %v538_v52, %v542_v53  ;;  %v3391_v34 = vld [vmem:[%s4269_s2 + $0xe0] sm:$0xff]   ;;  %v2480_v36 = vcombine.low %v913_v29, %v3624_v22  ;;  %v3413_v29 = vld [vmem:[%s4269_s2 + $0x178] sm:$0xff]  }
  0x1c   : > { %2873 = vmatpush3.bf16.msra.mxu1 %v3568_v12  ;;  %2846 = vmatprep.subr.bf16.mxu0 %v3455_v1  ;;  %v3685_v45 = vsel %vm523_vm2, %v530_v38, %v534_v39  ;;  %v914_v38 = vld [vmem:[%s3555_s19 + $0x14] sm:$0x7]  ;;  %v3392_v39 = vld [vmem:[%s4269_s2 + $0xe8] sm:$0xff]   ;;  %v1064_v22 = vshrl.u32 %v2490_v37, 16  ;;  %v3410_v26 = vld [vmem:[%s4269_s2 + $0x160] sm:$0xff]  }
  0x1d   : > { %2874 = vmatprep.subr.bf16.mxu1 %v3455_v1  ;;  %v926_v43 = vshll.u32 %v2480_v36, 16  ;;  %v3415_v32 = vld [vmem:[%s4269_s2 + $0x180] sm:$0xff]  }
  0x1e   : > { %v1066_v42 = vrot.slane %v1064_v22, 2 }
  0x1f   : > { %2847 = vmatpush3.bf16.msra.mxu0 %v3575_v13  ;;  %v928_v52 = vrot.slane %v926_v43, 3 }
  0x20   : > { %2875 = vmatpush3.bf16.msra.mxu1 %v3582_v14  ;;  %2848 = vmatprep.subr.bf16.mxu0 %v3455_v1 }
  0x21   : > { %2876 = vmatprep.subr.bf16.mxu1 %v3455_v1 }
  0x23   : > { %2849 = vmatpush3.bf16.msra.mxu0 %v3589_v15 }
  0x24   : > { %2877 = vmatpush3.bf16.msra.mxu1 %v3596_v16  ;;  %2890 = vmatprep.subr.bf16.mxu0 %v3455_v1 }
  0x25   : > { %2918 = vmatprep.subr.bf16.mxu1 %v3455_v1 }
  0x26   : > { %2851 = vmatmul.mubr.bf16.vlgmr.msra.gmra.mrb[0].mxu0 %v3600_v17 }
  0x27   : > { %2879 = vmatmul.mubr.bf16.vlgmr.msra.gmra.mrb[0].mxu1 %v3366_v18  ;;  %2891 = vmatpush3.bf16.msra.mxu0 %v3349_v0  ;;  %v3733_v0 = vsel %vm1278_vm1, %v1479_v48, %v1481_v61  ;;  %v821_v18 = vshrl.u32 %v3681_v44, 16  ;;  %v931_v48 = vrot.slane %v532_v30, 3  ;;  %v3394_v30 = vld [vmem:[%s4269_s2 + $0xf8] sm:$0xff]  }
  0x28   : > { %2919 = vmatpush3.bf16.msra.mxu1 %v3350_v2  ;;  %2892 = vmatprep.subr.bf16.mxu0 %v3455_v1  ;;  %v3379_v2 = vld [vmem:[%s4269_s2 + $0xa0] sm:$0xff]  }
  0x29   : > { %2920 = vmatprep.subr.bf16.mxu1 %v3455_v1  ;;  %2854 = vmatprep.mubr.msk.bf16.mxu0 %vm3456_vm0, %v3455_v1  ;;  %v932_v54 = vor.u32 %v931_v48, %v930_v47  ;;  %v1569_v47 = vld [vmem:[%s3555_s19 + $0x18] sm:$0x1]  ;;  %v4052_v48 = vld [vmem:[%s3549_s14 + $0x14] sm:$0xf] }
  0x2a   : > { %2882 = vmatprep.mubr.msk.bf16.mxu1 %vm3456_vm0, %v3455_v1 }
  0x2b   : > { %2893 = vmatpush3.bf16.msra.mxu0 %v3501_v3  ;;  %v3745_v3 = vor.u32 %v544_v60, %v542_v53 }
  0x2c   : > { %2921 = vmatpush3.bf16.msra.mxu1 %v3352_v4  ;;  %2894 = vmatprep.subr.bf16.mxu0 %v3455_v1  ;;  %v2461_v4 = vcombine.low %v788_v63, %v3688_v46  ;;  %v3827_v46 = vcombine.low %v3654_v31, %v914_v38  ;;  %v1079_v63 = vshll.u32 %v3717_v58, 16  ;;  %v4035_v38 = vld [vmem:[%s3549_s14 + $0xc] sm:$0xff]  }
  0x2d   : > { %2922 = vmatprep.subr.bf16.mxu1 %v3455_v1 }
  0x2e   : > { %2855 = vmatmul.mubr.bf16.gmra.mrb[4].mxu0 %v3615_v19 }
  0x2f   : > { %2895 = vmatpush3.bf16.msra.mxu0 %v3353_v5  ;;  %2883 = vmatmul.mubr.bf16.gmra.mrb[4].mxu1 %v3368_v20  ;;  %v3380_v5 = vld [vmem:[%s4269_s2 + $0xa8] sm:$0xff]  }
  0x30   : > { %2923 = vmatpush3.bf16.msra.mxu1 %v3354_v6  ;;  %2896 = vmatprep.subr.bf16.mxu0 %v3455_v1  ;;  %v812_v6 = vshll.u32 %v2461_v4, 16  ;;  %v3386_v20 = vld [vmem:[%s4269_s2 + $0xc8] sm:$0xff]  }
  0x31   : > { %2924 = vmatprep.subr.bf16.mxu1 %v3455_v1  ;;  %2858 = vmatprep.mubr.msk.bf16.mxu0 %vm3456_vm0, %v3455_v1 }
  0x32   : > { %2886 = vmatprep.mubr.msk.bf16.mxu1 %vm3456_vm0, %v3455_v1 }
  0x33   : > { %2897 = vmatpush3.bf16.msra.mxu0 %v3526_v7  ;;  %v3381_v7 = vld [vmem:[%s4269_s2 + $0xb0] sm:$0xff]  }
  0x34   : > { %2925 = vmatpush3.bf16.msra.mxu1 %v3356_v8  ;;  %2898 = vmatprep.subr.bf16.mxu0 %v3455_v1  ;;  %v810_v8 = vshrl.u32 %v2461_v4, 16 }
  0x35   : > { %2926 = vmatprep.subr.bf16.mxu1 %v3455_v1 }
  0x36   : > { %2859 = vmatmul.mubr.bf16.gmra.mrb[8].mxu0 %v3634_v24 }
  0x37   : > { %2899 = vmatpush3.bf16.msra.mxu0 %v3538_v9  ;;  %2887 = vmatmul.mubr.bf16.gmra.mrb[8].mxu1 %v3370_v25  ;;  %v814_v9 = vrot.slane %v812_v6, 1 }
  0x38   : > { %2927 = vmatpush3.bf16.msra.mxu1 %v3544_v10  ;;  %2900 = vmatprep.subr.bf16.mxu0 %v3455_v1  ;;  %v817_v10 = vshll.u32 %v3681_v44, 16  ;;  %v938_v44 = vshll.u32 %v3827_v46, 16 }
  0x39   : > { %2928 = vmatprep.subr.bf16.mxu1 %v3455_v1  ;;  %2906 = vmatprep.mubr.msk.bf16.mxu0 %vm3456_vm0, %v3455_v1 }
  0x3a   : > { %2934 = vmatprep.mubr.msk.bf16.mxu1 %vm3456_vm0, %v3455_v1  ;;  %v1072_v31 = vrot.slane %v817_v10, 3 }
  0x3b   : > { %2901 = vmatpush3.bf16.msra.mxu0 %v3561_v11  ;;  %v793_v11 = vld [vmem:[%s3549_s14 + $0x14] sm:$0x1] }
  0x3c   : > { %2929 = vmatpush3.bf16.msra.mxu1 %v3568_v12  ;;  %2902 = vmatprep.subr.bf16.mxu0 %v3455_v1  ;;  %v3382_v12 = vld [vmem:[%s4269_s2 + $0xb8] sm:$0xff]  }
  0x3d   : > { %2930 = vmatprep.subr.bf16.mxu1 %v3455_v1 }
  0x3f   : > { %2903 = vmatpush3.bf16.msra.mxu0 %v3575_v13  ;;  %v815_v13 = vor.u32 %v814_v9, %v810_v8  ;;  %v1081_v8 = vrot.slane %v1079_v63, 3  ;;  %v3398_v9 = vld [vmem:[%s4269_s2 + $0x108] sm:$0xff]   ;;  %v1919_v63 = vld [vmem:[%s3555_s19 + $0x18] sm:$0x3] }
  0x40   : > { %2931 = vmatpush3.bf16.msra.mxu1 %v3582_v14  ;;  %2904 = vmatprep.subr.bf16.mxu0 %v3455_v1  ;;  %v819_v14 = vrot.slane %v817_v10, 1 }
  0x41   : > { %2932 = vmatprep.subr.bf16.mxu1 %v3455_v1 }
  0x42   : > { %v823_v21 = vor.u32 %v821_v18, %v819_v14 }
  0x43   : > { %2905 = vmatpush3.bf16.msra.mxu0 %v3589_v15  ;;  %v2463_v15 = vcombine.low %v792_v56, %v793_v11 }
  0x44   : > { %2933 = vmatpush3.bf16.msra.mxu1 %v3596_v16  ;;  %2946 = vmatprep.subr.bf16.mxu0 %v3455_v1  ;;  %v3385_v16 = vld [vmem:[%s4269_s2 + $0xc0] sm:$0xff]  }
  0x45   : > { %2974 = vmatprep.subr.bf16.mxu1 %v3455_v1  ;;  %v829_v28 = vshrl.u32 %v2463_v15, 16 }
  0x46   : > { %2907 = vmatmul.mubr.bf16.vlgmr.msra.gmra.mrb[12].mxu0 %v3685_v45 }
  0x47   : > { %2935 = vmatmul.mubr.bf16.vlgmr.msra.gmra.mrb[12].mxu1 %v3600_v17  ;;  %2947 = vmatpush3.bf16.msra.mxu0 %v3373_v41  ;;  %v820_v17 = vsel %vm523_vm2, %v815_v13, %v819_v14  ;;  %v3399_v13 = vld [vmem:[%s4269_s2 + $0x110] sm:$0xff]  }
  0x48   : > { %2975 = vmatpush3.bf16.msra.mxu1 %v3373_v41  ;;  %2948 = vmatprep.subr.bf16.mxu0 %v3455_v1  ;;  %v923_v41 = vshrl.u32 %v2480_v36, 16  ;;  %v4028_v36 = vld [vmem:[%s3555_s19 + $0xc] sm:$0xff]  }
  0x49   : > { %2976 = vmatprep.subr.bf16.mxu1 %v3455_v1  ;;  %2910 = vmatprep.mubr.msk.bf16.mxu0 %vm3456_vm0, %v3455_v1  ;;  %v1587_v43 = vrot.slane %v4028_v36, 1 }
  0x4a   : > { %2938 = vmatprep.mubr.msk.bf16.mxu1 %vm3456_vm0, %v3455_v1  ;;  %v925_v51 = vrot.slane %v923_v41, 2 }
  0x4b   : > { %2949 = vmatpush3.bf16.msra.mxu0 %v3374_v49 }
  0x4c   : > { %2977 = vmatpush3.bf16.msra.mxu1 %v3374_v49  ;;  %2950 = vmatprep.subr.bf16.mxu0 %v3455_v1  ;;  %v1071_v49 = vrot.slane %v821_v18, 2  ;;  %v3403_v18 = vld [vmem:[%s4269_s2 + $0x130] sm:$0xff]  }
  0x4d   : > { %2978 = vmatprep.subr.bf16.mxu1 %v3455_v1 }
  0x4e   : > { %2911 = vmatmul.mubr.bf16.gmra.mrb[16].mxu0 %v3720_v59  ;;  %v1073_v56 = vor.u32 %v1072_v31, %v1071_v49  ;;  %v1708_v49 = vld [vmem:[%s3549_s14 + $0x18] sm:$0x1] }
  0x4f   : > { %2951 = vmatpush3.bf16.msra.mxu0 %v3375_v55  ;;  %2939 = vmatmul.mubr.bf16.gmra.mrb[16].mxu1 %v3615_v19  ;;  %v825_v19 = vshll.u32 %v2463_v15, 16  ;;  %v3400_v15 = vld [vmem:[%s4269_s2 + $0x118] sm:$0xff]  }
  0x50   : > { %2979 = vmatpush3.bf16.msra.mxu1 %v3375_v55  ;;  %2952 = vmatprep.subr.bf16.mxu0 %v3455_v1  ;;  %v929_v55 = vor.u32 %v928_v52, %v925_v51  ;;  %v3427_v51 = vld [vmem:[%s4269_s2 + $0x1c0] sm:$0xff]  }
  0x51   : > { %2980 = vmatprep.subr.bf16.mxu1 %v3455_v1  ;;  %2914 = vmatprep.mubr.msk.bf16.mxu0 %vm3456_vm0, %v3455_v1  ;;  %v827_v23 = vrot.slane %v825_v19, 1  ;;  %v3404_v19 = vld [vmem:[%s4269_s2 + $0x138] sm:$0xff]  }
  0x52   : > { %2942 = vmatprep.mubr.msk.bf16.mxu1 %vm3456_vm0, %v3455_v1 }
  0x53   : > { %2953 = vmatpush3.bf16.msra.mxu0 %v3376_v62  ;;  %v828_v25 = vsel %vm523_vm2, %v823_v21, %v827_v23  ;;  %v831_v33 = vor.u32 %v829_v28, %v827_v23  ;;  %v3407_v21 = vld [vmem:[%s4269_s2 + $0x148] sm:$0xff]   ;;  %v3922_v23 = vrot.slane %v3827_v46, 3  ;;  %v3412_v28 = vld [vmem:[%s4269_s2 + $0x170] sm:$0xff]  }
  0x54   : > { %2981 = vmatpush3.bf16.msra.mxu1 %v3376_v62  ;;  %2954 = vmatprep.subr.bf16.mxu0 %v3455_v1  ;;  %v1076_v62 = vshrl.u32 %v3717_v58, 16  ;;  %v3421_v58 = vld [vmem:[%s4269_s2 + $0x1b0] sm:$0xff]  }
  0x55   : > { %2982 = vmatprep.subr.bf16.mxu1 %v3455_v1 }
  0x56   : > { %2915 = vmatmul.mubr.bf16.gmra.mrb[20].mxu0 %v3745_v3 }
  0x57   : > { %2955 = vmatpush3.bf16.msra.mxu0 %v3379_v2  ;;  %2943 = vmatmul.mubr.bf16.gmra.mrb[20].mxu1 %v3634_v24  ;;  %v3389_v24 = vld [vmem:[%s4269_s2 + $0xd0] sm:$0xff]  }
  0x58   : > { %2983 = vmatpush3.bf16.msra.mxu1 %v3379_v2  ;;  %2956 = vmatprep.subr.bf16.mxu0 %v3455_v1  ;;  %v933_v2 = vsel %vm921_vm3, %v929_v55, %v932_v54 }
  0x59   : > { %2984 = vmatprep.subr.bf16.mxu1 %v3455_v1  ;;  %2962 = vmatprep.mubr.msk.bf16.mxu0 %vm3456_vm0, %v3455_v1 }
  0x5a   : > { %2990 = vmatprep.mubr.msk.bf16.mxu1 %vm3456_vm0, %v3455_v1 }
  0x5b   : > { %2957 = vmatpush3.bf16.msra.mxu0 %v3380_v5 }
  0x5c   : > { %2985 = vmatpush3.bf16.msra.mxu1 %v3380_v5  ;;  %2958 = vmatprep.subr.bf16.mxu0 %v3455_v1  ;;  %v940_v5 = vrot.slane %v938_v44, 3  ;;  %v3434_v44 = vld [vmem:[%s4269_s2 + $0x1d8] sm:$0xff]  }
  0x5d   : > { %2986 = vmatprep.subr.bf16.mxu1 %v3455_v1 }
  0x5f   : > { %2959 = vmatpush3.bf16.msra.mxu0 %v3381_v7 }
  0x60   : > { %2987 = vmatpush3.bf16.msra.mxu1 %v3381_v7  ;;  %2960 = vmatprep.subr.bf16.mxu0 %v3455_v1  ;;  %v1078_v7 = vrot.slane %v1076_v62, 2  ;;  %v3436_v62 = vld [vmem:[%s4269_s2 + $0x1e8] sm:$0xff]  }
  0x61   : > { %2988 = vmatprep.subr.bf16.mxu1 %v3455_v1 }
  0x62   : > { %v3862_v11 = vor.u32 %v1081_v8, %v1078_v7 }
  0x63   : > { %2961 = vmatpush3.bf16.msra.mxu0 %v3382_v12 }
  0x64   : > { %2989 = vmatpush3.bf16.msra.mxu1 %v3382_v12  ;;  %3002 = vmatprep.subr.bf16.mxu0 %v3455_v1  ;;  %v1083_v14 = vsel %vm921_vm3, %v1073_v56, %v3862_v11 }
  0x65   : > { %3030 = vmatprep.subr.bf16.mxu1 %v3455_v1 }
  0x66   : > { %2963 = vmatmul.mubr.bf16.vlgmr.msra.gmra.mrb[24].mxu0 %v3685_v45  ;;  %v1067_v45 = vshll.u32 %v2490_v37, 16  ;;  %v4032_v37 = vld [vmem:[%s3549_s14 + $0x4] sm:$0xfe]  }
  0x67   : > { %2991 = vmatmul.mubr.bf16.vlgmr.msra.gmra.mrb[24].mxu1 %v820_v17  ;;  %3003 = vmatpush3.bf16.msra.mxu0 %v3385_v16  ;;  %v3402_v17 = vld [vmem:[%s4269_s2 + $0x128] sm:$0xff]   ;;  %v1724_v22 = vrot.slane %v4032_v37, 1 }
  0x68   : > { %3031 = vmatpush3.bf16.msra.mxu1 %v3385_v16  ;;  %3004 = vmatprep.subr.bf16.mxu0 %v3455_v1  ;;  %v1069_v53 = vrot.slane %v1067_v45, 3  ;;  %v3401_v16 = vld [vmem:[%s4269_s2 + $0x120] sm:$0xff]   ;;  %v1725_v45 = vrot.slane %v4035_v38, 1 }
  0x69   : > { %3032 = vmatprep.subr.bf16.mxu1 %v3455_v1  ;;  %2966 = vmatprep.mubr.msk.bf16.mxu0 %vm3456_vm0, %v3455_v1 }
  0x6a   : > { %2994 = vmatprep.mubr.msk.bf16.mxu1 %vm3456_vm0, %v3455_v1  ;;  %v1070_v60 = vor.u32 %v1069_v53, %v1066_v42  ;;  %v4061_v31 = vsel %vm1585_vm4, %v1724_v22, %v1725_v45  ;;  %v2571_v42 = vcombine.low %v4052_v48, %v1708_v49  ;;  %v3428_v53 = vld [vmem:[%s4269_s2 + $0x1c8] sm:$0xff]  }
  0x6b   : > { %3005 = vmatpush3.bf16.msra.mxu0 %v3386_v20 }
  0x6c   : > { %3033 = vmatpush3.bf16.msra.mxu1 %v3386_v20  ;;  %3006 = vmatprep.subr.bf16.mxu0 %v3455_v1  ;;  %v1074_v6 = vsel %vm921_vm3, %v1070_v60, %v1073_v56  ;;  %v3406_v20 = vld [vmem:[%s4269_s2 + $0x140] sm:$0xff]   ;;  %v3433_v56 = vld [vmem:[%s4269_s2 + $0x1d0] sm:$0xff]  }
  0x6d   : > { %3034 = vmatprep.subr.bf16.mxu1 %v3455_v1  ;;  %v3435_v60 = vld [vmem:[%s4269_s2 + $0x1e0] sm:$0xff]  }
  0x6e   : > { %2967 = vmatmul.mubr.bf16.gmra.mrb[28].mxu0 %v3720_v59  ;;  %v935_v59 = vshrl.u32 %v3827_v46, 16  ;;  %v4047_v46 = vld [vmem:[%s3555_s19 + $0x14] sm:$0xf] }
  0x6f   : > { %2995 = vmatmul.mubr.bf16.gmra.mrb[28].mxu1 %v828_v25  ;;  %3007 = vmatpush3.bf16.msra.mxu0 %v3389_v24  ;;  %v1283_v25 = vsel %vm1278_vm1, %v1280_v35, %v3922_v23  ;;  %v3411_v35 = vld [vmem:[%s4269_s2 + $0x168] sm:$0xff]   ;;  %v2560_v52 = vcombine.low %v4047_v46, %v1569_v47 }
  0x70   : > { %3035 = vmatpush3.bf16.msra.mxu1 %v3389_v24  ;;  %3008 = vmatprep.subr.bf16.mxu0 %v3455_v1  ;;  %v937_v4 = vrot.slane %v935_v59, 2  ;;  %v3408_v24 = vld [vmem:[%s4269_s2 + $0x150] sm:$0xff]  }
  0x71   : > { %3036 = vmatprep.subr.bf16.mxu1 %v3455_v1  ;;  %2970 = vmatprep.mubr.msk.bf16.mxu0 %vm3456_vm0, %v3455_v1 }
  0x72   : > { %2998 = vmatprep.mubr.msk.bf16.mxu1 %vm3456_vm0, %v3455_v1  ;;  %v941_v10 = vor.u32 %v940_v5, %v937_v4  ;;  %v1933_v4 = vshrl.u32 %v4028_v36, 16  ;;  %v1936_v5 = vshll.u32 %v4028_v36, 16 }
  0x73   : > { %3009 = vmatpush3.bf16.msra.mxu0 %v3390_v27 }
  0x74   : > { %3037 = vmatpush3.bf16.msra.mxu1 %v3390_v27  ;;  %3010 = vmatprep.subr.bf16.mxu0 %v3455_v1  ;;  %v942_v12 = vsel %vm921_vm3, %v932_v54, %v941_v10  ;;  %v3409_v27 = vld [vmem:[%s4269_s2 + $0x158] sm:$0xff]   ;;  %v1589_v54 = vrot.slane %v2560_v52, 1 }
  0x75   : > { %3038 = vmatprep.subr.bf16.mxu1 %v3455_v1 }
  0x76   : > { %2971 = vmatmul.mubr.bf16.gmra.mrb[32].mxu0 %v3745_v3  ;;  %v3397_v3 = vld [vmem:[%s4269_s2 + $0x100] sm:$0xff]   ;;  %v1590_v55 = vsel %vm1585_vm4, %v1587_v43, %v1589_v54 }
  0x77   : > { %2999 = vmatmul.mubr.bf16.gmra.mrb[32].mxu1 %v831_v33  ;;  %3011 = vmatpush3.bf16.msra.mxu0 %v3391_v34  ;;  %v3416_v33 = vld [vmem:[%s4269_s2 + $0x188] sm:$0xff]  }
  0x78   : > { %3039 = vmatpush3.bf16.msra.mxu1 %v3391_v34  ;;  %3012 = vmatprep.subr.bf16.mxu0 %v3455_v1  ;;  %v3420_v34 = vld [vmem:[%s4269_s2 + $0x1a8] sm:$0xff]  }
  0x79   : > { %3040 = vmatprep.subr.bf16.mxu1 %v3455_v1  ;;  %3018 = vmatprep.mubr.msk.bf16.mxu0 %vm3456_vm0, %v3455_v1 }
  0x7a   : > { %3046 = vmatprep.mubr.msk.bf16.mxu1 %vm3456_vm0, %v3455_v1 }
  0x7b   : > { %3013 = vmatpush3.bf16.msra.mxu0 %v3392_v39 }
  0x7c   : > { %3041 = vmatpush3.bf16.msra.mxu1 %v3392_v39  ;;  %3014 = vmatprep.subr.bf16.mxu0 %v3455_v1  ;;  %v3422_v39 = vld [vmem:[%s4269_s2 + $0x1b8] sm:$0xff]  }
  0x7d   : > { %3042 = vmatprep.subr.bf16.mxu1 %v3455_v1 }
  0x7f   : > { %3015 = vmatpush3.bf16.msra.mxu0 %v3393_v50 }
  0x80   : > { %3043 = vmatpush3.bf16.msra.mxu1 %v3393_v50  ;;  %3016 = vmatprep.subr.bf16.mxu0 %v3455_v1 }
  0x81   : > { %3044 = vmatprep.subr.bf16.mxu1 %v3455_v1 }
  0x83   : > { %3017 = vmatpush3.bf16.msra.mxu0 %v3394_v30 }
  0x84   : > { %3045 = vmatpush3.bf16.msra.mxu1 %v3394_v30  ;;  %3058 = vmatprep.subr.bf16.mxu0 %v3455_v1  ;;  %v4071_v30 = vrot.slane %v2571_v42, 1 }
  0x85   : > { %3086 = vmatprep.subr.bf16.mxu1 %v3455_v1 }
  0x86   : > { %3019 = vmatmul.mubr.bf16.vlgmr.msra.gmra.mrb[36].mxu0 %v933_v2  ;;  %v4084_v59 = vsel %vm1585_vm4, %v1725_v45, %v4071_v30 }
  0x87   : > { %3047 = vmatmul.mubr.bf16.vlgmr.msra.gmra.mrb[36].mxu1 %v1074_v6  ;;  %3059 = vmatpush3.bf16.msra.mxu0 %v3397_v3 }
  0x88   : > { %3087 = vmatpush3.bf16.msra.mxu1 %v3397_v3  ;;  %3060 = vmatprep.subr.bf16.mxu0 %v3455_v1 }
  0x89   : > { %3088 = vmatprep.subr.bf16.mxu1 %v3455_v1  ;;  %3022 = vmatprep.mubr.msk.bf16.mxu0 %vm3456_vm0, %v3455_v1 }
  0x8a   : > { %3050 = vmatprep.mubr.msk.bf16.mxu1 %vm3456_vm0, %v3455_v1 }
  0x8b   : > { %3061 = vmatpush3.bf16.msra.mxu0 %v3398_v9 }
  0x8c   : > { %3089 = vmatpush3.bf16.msra.mxu1 %v3398_v9  ;;  %3062 = vmatprep.subr.bf16.mxu0 %v3455_v1  ;;  %v2596_v9 = vcombine.low %v4047_v46, %v1919_v63  ;;  %v2153_v63 = vshrl.u32 %v4035_v38, 16 }
  0x8d   : > { %3090 = vmatprep.subr.bf16.mxu1 %v3455_v1 }
  0x8e   : > { %3023 = vmatmul.mubr.bf16.gmra.mrb[40].mxu0 %v942_v12 }
  0x8f   : > { %3051 = vmatmul.mubr.bf16.gmra.mrb[40].mxu1 %v1083_v14  ;;  %3063 = vmatpush3.bf16.msra.mxu0 %v3399_v13 }
  0x90   : > { %3091 = vmatpush3.bf16.msra.mxu1 %v3399_v13  ;;  %3064 = vmatprep.subr.bf16.mxu0 %v3455_v1  ;;  %v3437_v13 = vld [vmem:[%s4269_s2 + $0x1f0] sm:$0xff]  }
  0x91   : > { %3092 = vmatprep.subr.bf16.mxu1 %v3455_v1  ;;  %3026 = vmatprep.mubr.msk.bf16.mxu0 %vm3456_vm0, %v3455_v1 }
  0x92   : > { %3054 = vmatprep.mubr.msk.bf16.mxu1 %vm3456_vm0, %v3455_v1 }
  0x93   : > { %3065 = vmatpush3.bf16.msra.mxu0 %v3400_v15 }
  0x94   : > { %3093 = vmatpush3.bf16.msra.mxu1 %v3400_v15  ;;  %3066 = vmatprep.subr.bf16.mxu0 %v3455_v1 }
  0x95   : > { %3094 = vmatprep.subr.bf16.mxu1 %v3455_v1 }
  0x96   : > { %3027 = vmatmul.mubr.bf16.gmra.mrb[44].mxu0 %v941_v10 }
  0x97   : > { %3055 = vmatmul.mubr.bf16.gmra.mrb[44].mxu1 %v3862_v11  ;;  %3067 = vmatpush3.bf16.msra.mxu0 %v3401_v16 }
  0x98   : > { %3095 = vmatpush3.bf16.msra.mxu1 %v3401_v16  ;;  %3068 = vmatprep.subr.bf16.mxu0 %v3455_v1 }
  0x99   : > { %3096 = vmatprep.subr.bf16.mxu1 %v3455_v1  ;;  %3074 = vmatprep.mubr.msk.bf16.mxu0 %vm3456_vm0, %v3455_v1 }
  0x9a   : > { %3102 = vmatprep.mubr.msk.bf16.mxu1 %vm3456_vm0, %v3455_v1 }
  0x9b   : > { %3069 = vmatpush3.bf16.msra.mxu0 %v3402_v17 }
  0x9c   : > { %3097 = vmatpush3.bf16.msra.mxu1 %v3402_v17  ;;  %3070 = vmatprep.subr.bf16.mxu0 %v3455_v1 }
  0x9d   : > { %3098 = vmatprep.subr.bf16.mxu1 %v3455_v1 }
  0x9f   : > { %3071 = vmatpush3.bf16.msra.mxu0 %v3403_v18 }
  0xa0   : > { %3099 = vmatpush3.bf16.msra.mxu1 %v3403_v18  ;;  %3072 = vmatprep.subr.bf16.mxu0 %v3455_v1  ;;  %v1935_v18 = vrot.slane %v1933_v4, 1 }
  0xa1   : > { %3100 = vmatprep.subr.bf16.mxu1 %v3455_v1 }
  0xa3   : > { %3073 = vmatpush3.bf16.msra.mxu0 %v3404_v19 }
  0xa4   : > { %3101 = vmatpush3.bf16.msra.mxu1 %v3404_v19  ;;  %3114 = vmatprep.subr.bf16.mxu0 %v3455_v1  ;;  %v1938_v19 = vrot.slane %v1936_v5, 2 }
  0xa5   : > { %3142 = vmatprep.subr.bf16.mxu1 %v3455_v1 }
  0xa6   : > { %3075 = vmatmul.mubr.bf16.vlgmr.msra.gmra.mrb[48].mxu0 %v1074_v6 }
  0xa7   : > { %3103 = vmatmul.mubr.bf16.vlgmr.msra.gmra.mrb[48].mxu1 %v3673_v40  ;;  %3115 = vmatpush3.bf16.msra.mxu0 %v3406_v20 }
  0xa8   : > { %3143 = vmatpush3.bf16.msra.mxu1 %v3406_v20  ;;  %3116 = vmatprep.subr.bf16.mxu0 %v3455_v1 }
  0xa9   : > { %3144 = vmatprep.subr.bf16.mxu1 %v3455_v1  ;;  %3078 = vmatprep.mubr.msk.bf16.mxu0 %vm3456_vm0, %v3455_v1 }
  0xaa   : > { %3106 = vmatprep.mubr.msk.bf16.mxu1 %vm3456_vm0, %v3455_v1 }
  0xab   : > { %3117 = vmatpush3.bf16.msra.mxu0 %v3407_v21 }
  0xac   : > { %3145 = vmatpush3.bf16.msra.mxu1 %v3407_v21  ;;  %3118 = vmatprep.subr.bf16.mxu0 %v3455_v1 }
  0xad   : > { %3146 = vmatprep.subr.bf16.mxu1 %v3455_v1 }
  0xae   : > { %3079 = vmatmul.mubr.bf16.gmra.mrb[52].mxu0 %v1083_v14 }
  0xaf   : > { %3107 = vmatmul.mubr.bf16.gmra.mrb[52].mxu1 %v1283_v25  ;;  %3119 = vmatpush3.bf16.msra.mxu0 %v3408_v24 }
  0xb0   : > { %3147 = vmatpush3.bf16.msra.mxu1 %v3408_v24  ;;  %3120 = vmatprep.subr.bf16.mxu0 %v3455_v1 }
  0xb1   : > { %3148 = vmatprep.subr.bf16.mxu1 %v3455_v1  ;;  %3082 = vmatprep.mubr.msk.bf16.mxu0 %vm3456_vm0, %v3455_v1 }
  0xb2   : > { %3110 = vmatprep.mubr.msk.bf16.mxu1 %vm3456_vm0, %v3455_v1 }
  0xb3   : > { %3121 = vmatpush3.bf16.msra.mxu0 %v3409_v27 }
  0xb4   : > { %3149 = vmatpush3.bf16.msra.mxu1 %v3409_v27  ;;  %3122 = vmatprep.subr.bf16.mxu0 %v3455_v1  ;;  %v1942_v27 = vshrl.u32 %v2596_v9, 16 }
  0xb5   : > { %3150 = vmatprep.subr.bf16.mxu1 %v3455_v1 }
  0xb6   : > { %3083 = vmatmul.mubr.bf16.gmra.mrb[56].mxu0 %v3862_v11 }
  0xb7   : > { %3111 = vmatmul.mubr.bf16.gmra.mrb[56].mxu1 %v3922_v23  ;;  %3123 = vmatpush3.bf16.msra.mxu0 %v3410_v26 }
  0xb8   : > { %3151 = vmatpush3.bf16.msra.mxu1 %v3410_v26  ;;  %3124 = vmatprep.subr.bf16.mxu0 %v3455_v1  ;;  %v1945_v26 = vshll.u32 %v2596_v9, 16 }
  0xb9   : > { %3152 = vmatprep.subr.bf16.mxu1 %v3455_v1  ;;  %3130 = vmatprep.mubr.msk.bf16.mxu0 %vm3456_vm0, %v3455_v1 }
  0xba   : > { %3158 = vmatprep.mubr.msk.bf16.mxu1 %vm3456_vm0, %v3455_v1  ;;  %v1947_v36 = vrot.slane %v1945_v26, 2 }
  0xbb   : > { %3125 = vmatpush3.bf16.msra.mxu0 %v3411_v35 }
  0xbc   : > { %3153 = vmatpush3.bf16.msra.mxu1 %v3411_v35  ;;  %3126 = vmatprep.subr.bf16.mxu0 %v3455_v1 }
  0xbd   : > { %3154 = vmatprep.subr.bf16.mxu1 %v3455_v1 }
  0xbf   : > { %3127 = vmatpush3.bf16.msra.mxu0 %v3412_v28 }
  0xc0   : > { %3155 = vmatpush3.bf16.msra.mxu1 %v3412_v28  ;;  %3128 = vmatprep.subr.bf16.mxu0 %v3455_v1 }
  0xc1   : > { %3156 = vmatprep.subr.bf16.mxu1 %v3455_v1 }
  0xc3   : > { %3129 = vmatpush3.bf16.msra.mxu0 %v3413_v29 }
  0xc4   : > { %3157 = vmatpush3.bf16.msra.mxu1 %v3413_v29  ;;  %3170 = vmatprep.subr.bf16.mxu0 %v3455_v1 }
  0xc5   : > { %3198 = vmatprep.subr.bf16.mxu1 %v3455_v1 }
  0xc6   : > { %3131 = vmatmul.mubr.bf16.vlgmr.msra.gmra.mrb[60].mxu0 %v3673_v40  ;;  %v3417_v40 = vld [vmem:[%s4269_s2 + $0x190] sm:$0xff]  }
  0xc7   : > { %3159 = vmatmul.mubr.bf16.vlgmr.msra.gmra.mrb[60].mxu1 %v3713_v57  ;;  %3171 = vmatpush3.bf16.msra.mxu0 %v3415_v32  ;;  %v3418_v57 = vld [vmem:[%s4269_s2 + $0x198] sm:$0xff]  }
  0xc8   : > { %3199 = vmatpush3.bf16.msra.mxu1 %v3415_v32  ;;  %3172 = vmatprep.subr.bf16.mxu0 %v3455_v1 }
  0xc9   : > { %3200 = vmatprep.subr.bf16.mxu1 %v3455_v1  ;;  %3134 = vmatprep.mubr.msk.bf16.mxu0 %vm3456_vm0, %v3455_v1 }
  0xca   : > { %3162 = vmatprep.mubr.msk.bf16.mxu1 %vm3456_vm0, %v3455_v1 }
  0xcb   : > { %3173 = vmatpush3.bf16.msra.mxu0 %v3416_v33 }
  0xcc   : > { %3201 = vmatpush3.bf16.msra.mxu1 %v3416_v33  ;;  %3174 = vmatprep.subr.bf16.mxu0 %v3455_v1  ;;  %v3439_v33 = vld [vmem:[%s4269_s2 + $0x200] sm:$0xff]  }
  0xcd   : > { %3202 = vmatprep.subr.bf16.mxu1 %v3455_v1 }
  0xce   : > { %3135 = vmatmul.mubr.bf16.gmra.mrb[64].mxu0 %v1283_v25  ;;  %v1939_v25 = vor.u32 %v1938_v19, %v1935_v18 }
  0xcf   : > { %3163 = vmatmul.mubr.bf16.gmra.mrb[64].mxu1 %v3733_v0  ;;  %3175 = vmatpush3.bf16.msra.mxu0 %v3417_v40  ;;  %v3419_v0 = vld [vmem:[%s4269_s2 + $0x1a0] sm:$0xff]  }
  0xd0   : > { %3203 = vmatpush3.bf16.msra.mxu1 %v3417_v40  ;;  %3176 = vmatprep.subr.bf16.mxu0 %v3455_v1 }
  0xd1   : > { %3204 = vmatprep.subr.bf16.mxu1 %v3455_v1  ;;  %3138 = vmatprep.mubr.msk.bf16.mxu0 %vm3456_vm0, %v3455_v1 }
  0xd2   : > { %3166 = vmatprep.mubr.msk.bf16.mxu1 %vm3456_vm0, %v3455_v1 }
  0xd3   : > { %3177 = vmatpush3.bf16.msra.mxu0 %v3418_v57 }
  0xd4   : > { %3205 = vmatpush3.bf16.msra.mxu1 %v3418_v57  ;;  %3178 = vmatprep.subr.bf16.mxu0 %v3455_v1 }
  0xd5   : > { %3206 = vmatprep.subr.bf16.mxu1 %v3455_v1 }
  0xd6   : > { %3139 = vmatmul.mubr.bf16.gmra.mrb[68].mxu0 %v3922_v23  ;;  %v3438_v23 = vld [vmem:[%s4269_s2 + $0x1f8] sm:$0xff]  }
  0xd7   : > { %3167 = vmatmul.mubr.bf16.gmra.mrb[68].mxu1 %v1481_v61  ;;  %3179 = vmatpush3.bf16.msra.mxu0 %v3419_v0  ;;  %v4025_v61 = vld [vmem:[%s3555_s19 + $0x4] sm:$0xfe]  }
  0xd8   : > { %3207 = vmatpush3.bf16.msra.mxu1 %v3419_v0  ;;  %3180 = vmatprep.subr.bf16.mxu0 %v3455_v1  ;;  %v1586_v41 = vrot.slane %v4025_v61, 1  ;;  %v1925_v2 = vshrl.u32 %v4025_v61, 16  ;;  %v1928_v3 = vshll.u32 %v4025_v61, 16  ;;  %v1944_v61 = vrot.slane %v1942_v27, 1 }
  0xd9   : > { %3208 = vmatprep.subr.bf16.mxu1 %v3455_v1  ;;  %3186 = vmatprep.mubr.msk.bf16.mxu0 %vm3456_vm0, %v3455_v1 }
  0xda   : > { %3214 = vmatprep.mubr.msk.bf16.mxu1 %vm3456_vm0, %v3455_v1  ;;  %v1588_v50 = vsel %vm1585_vm4, %v1586_v41, %v1587_v43  ;;  %v1927_v16 = vrot.slane %v1925_v2, 1  ;;  %v1930_v17 = vrot.slane %v1928_v3, 2  ;;  %v3440_v43 = vld [vmem:[%s4269_s2 + $0x208] sm:$0xff]   ;;  %v4151_v22 = vor.u32 %v1947_v36, %v1944_v61 }
  0xdb   : > { %3181 = vmatpush3.bf16.msra.mxu0 %v3420_v34  ;;  %v2156_v2 = vshll.u32 %v4035_v38, 16  ;;  %v3445_v38 = vld [vmem:[%s4269_s2 + $0x230] sm:$0xff]  }
  0xdc   : > { %3209 = vmatpush3.bf16.msra.mxu1 %v3420_v34  ;;  %3182 = vmatprep.subr.bf16.mxu0 %v3455_v1  ;;  %v1931_v24 = vor.u32 %v1930_v17, %v1927_v16  ;;  %v3446_v16 = vld [vmem:[%s4269_s2 + $0x238] sm:$0xff]  }
  0xdd   : > { %3210 = vmatprep.subr.bf16.mxu1 %v3455_v1 }
  0xde   : > { %v4139_v0 = vsel %vm1923_vm5, %v1931_v24, %v1939_v25 }
  0xdf   : > { %3183 = vmatpush3.bf16.msra.mxu0 %v3421_v58 }
  0xe0   : > { %3211 = vmatpush3.bf16.msra.mxu1 %v3421_v58  ;;  %3184 = vmatprep.subr.bf16.mxu0 %v3455_v1 }
  0xe1   : > { %3212 = vmatprep.subr.bf16.mxu1 %v3455_v1 }
  0xe3   : > { %3185 = vmatpush3.bf16.msra.mxu0 %v3422_v39 }
  0xe4   : > { %3213 = vmatpush3.bf16.msra.mxu1 %v3422_v39  ;;  %3226 = vmatprep.subr.bf16.mxu0 %v3455_v1 }
  0xe5   : > { %3254 = vmatprep.subr.bf16.mxu1 %v3455_v1 }
  0xe6   : > { %3187 = vmatmul.mubr.bf16.vlgmr.msra.gmra.mrb[72].mxu0 %v1588_v50  ;;  %v3441_v50 = vld [vmem:[%s4269_s2 + $0x210] sm:$0xff]  }
  0xe7   : > { %3215 = vmatmul.mubr.bf16.vlgmr.msra.gmra.mrb[72].mxu1 %v4061_v31  ;;  %3227 = vmatpush3.bf16.msra.mxu0 %v3427_v51 }
  0xe8   : > { %3255 = vmatpush3.bf16.msra.mxu1 %v3427_v51  ;;  %3228 = vmatprep.subr.bf16.mxu0 %v3455_v1 }
  0xe9   : > { %3256 = vmatprep.subr.bf16.mxu1 %v3455_v1  ;;  %3190 = vmatprep.mubr.msk.bf16.mxu0 %vm3456_vm0, %v3455_v1 }
  0xea   : > { %3218 = vmatprep.mubr.msk.bf16.mxu1 %vm3456_vm0, %v3455_v1 }
  0xeb   : > { %3229 = vmatpush3.bf16.msra.mxu0 %v3428_v53 }
  0xec   : > { %3257 = vmatpush3.bf16.msra.mxu1 %v3428_v53  ;;  %3230 = vmatprep.subr.bf16.mxu0 %v3455_v1 }
  0xed   : > { %3258 = vmatprep.subr.bf16.mxu1 %v3455_v1 }
  0xee   : > { %3191 = vmatmul.mubr.bf16.gmra.mrb[76].mxu0 %v1590_v55  ;;  %v3442_v55 = vld [vmem:[%s4269_s2 + $0x218] sm:$0xff]  }
  0xef   : > { %3219 = vmatmul.mubr.bf16.gmra.mrb[76].mxu1 %v4084_v59  ;;  %3231 = vmatpush3.bf16.msra.mxu0 %v3433_v56 }
  0xf0   : > { %3259 = vmatpush3.bf16.msra.mxu1 %v3433_v56  ;;  %3232 = vmatprep.subr.bf16.mxu0 %v3455_v1  ;;  %v3443_v56 = vld [vmem:[%s4269_s2 + $0x220] sm:$0xff]  }
  0xf1   : > { %3260 = vmatprep.subr.bf16.mxu1 %v3455_v1  ;;  %3194 = vmatprep.mubr.msk.bf16.mxu0 %vm3456_vm0, %v3455_v1 }
  0xf2   : > { %3222 = vmatprep.mubr.msk.bf16.mxu1 %vm3456_vm0, %v3455_v1 }
  0xf3   : > { %3233 = vmatpush3.bf16.msra.mxu0 %v3434_v44 }
  0xf4   : > { %3261 = vmatpush3.bf16.msra.mxu1 %v3434_v44  ;;  %3234 = vmatprep.subr.bf16.mxu0 %v3455_v1  ;;  %v2140_v44 = vld [vmem:[%s3549_s14 + $0x18] sm:$0x3] }
  0xf5   : > { %3262 = vmatprep.subr.bf16.mxu1 %v3455_v1  ;;  %v2621_v5 = vcombine.low %v4052_v48, %v2140_v44 }
  0xf6   : > { %3195 = vmatmul.mubr.bf16.gmra.mrb[80].mxu0 %v1589_v54 }
  0xf7   : > { %3223 = vmatmul.mubr.bf16.gmra.mrb[80].mxu1 %v4071_v30  ;;  %3235 = vmatpush3.bf16.msra.mxu0 %v3435_v60  ;;  %v2162_v19 = vshrl.u32 %v2621_v5, 16 }
  0xf8   : > { %3263 = vmatpush3.bf16.msra.mxu1 %v3435_v60  ;;  %3236 = vmatprep.subr.bf16.mxu0 %v3455_v1  ;;  %v2145_v60 = vshrl.u32 %v4032_v37, 16 }
  0xf9   : > { %v360_v6 = vpop.f32.mrb[0].mxu0  ;;  %3264 = vmatprep.subr.bf16.mxu1 %v3455_v1  ;;  %3242 = vmatprep.mubr.msk.bf16.mxu0 %vm3456_vm0, %v3455_v1 }
  0xfa   : > { %v480_v7 = vpop.f32.mrb[0].mxu1  ;;  %v2852_v8 = vpop.f32.mrb[1].mxu0  ;;  %3270 = vmatprep.mubr.msk.bf16.mxu1 %vm3456_vm0, %v3455_v1 }
  0xfb   : > { %v4119_v10 = vadd.f32 %v480_v7, %v360_v6  ;;  %v2880_v11 = vpop.f32.mrb[1].mxu1  ;;  %v363_v12 = vpop.f32.mrb[2].mxu0  ;;  %3237 = vmatpush3.bf16.msra.mxu0 %v3436_v62 }
  0xfc   : > { %v483_v14 = vpop.f32.mrb[2].mxu1  ;;  %3265 = vmatpush3.bf16.msra.mxu1 %v3436_v62  ;;  %v2853_v15 = vpop.f32.mrb[3].mxu0  ;;  %3238 = vmatprep.subr.bf16.mxu0 %v3455_v1  ;;  %v2148_v62 = vshll.u32 %v4032_v37, 16  ;;  %v2147_v11 = vrot.slane %v2145_v60, 1 }
  0xfd   : > { %v4125_v20 = vadd.f32 %v483_v14, %v363_v12  ;;  %v2881_v21 = vpop.f32.mrb[3].mxu1  ;;  %3266 = vmatprep.subr.bf16.mxu1 %v3455_v1  ;;  %v2158_v14 = vrot.slane %v2156_v2, 2 }
  0xfe   : > { %v2150_v12 = vrot.slane %v2148_v62, 2  ;;  %v2165_v21 = vshll.u32 %v2621_v5, 16 }
  0xff   : > { %3239 = vmatpush3.bf16.msra.mxu0 %v3437_v13 }
 0x100   : > { %3267 = vmatpush3.bf16.msra.mxu1 %v3437_v13  ;;  %3240 = vmatprep.subr.bf16.mxu0 %v3455_v1  ;;  %v2155_v13 = vrot.slane %v2153_v63, 1  ;;  %v2151_v17 = vor.u32 %v2150_v12, %v2147_v11 }
 0x101   : > { %3268 = vmatprep.subr.bf16.mxu1 %v3455_v1  ;;  %v368_v35 = vpop.f32.mrb[4].mxu0 }
 0x102   : > { %v488_v28 = vpop.f32.mrb[4].mxu1  ;;  %v2856_v29 = vpop.f32.mrb[5].mxu0  ;;  %v2159_v18 = vor.u32 %v2158_v14, %v2155_v13 }
 0x103   : > { %3241 = vmatpush3.bf16.msra.mxu0 %v3438_v23  ;;  %v4133_v32 = vadd.f32 %v488_v28, %v368_v35  ;;  %v2884_v40 = vpop.f32.mrb[5].mxu1  ;;  %v371_v57 = vpop.f32.mrb[6].mxu0 }
 0x104   : > { %3269 = vmatpush3.bf16.msra.mxu1 %v3438_v23  ;;  %3282 = vmatprep.subr.bf16.mxu0 %v3455_v1  ;;  %v491_v34 = vpop.f32.mrb[6].mxu1  ;;  %v2857_v58 = vpop.f32.mrb[7].mxu0  ;;  %v2160_v28 = vsel %vm1923_vm5, %v2151_v17, %v2159_v18  ;;  %v2164_v40 = vrot.slane %v2162_v19, 1 }
 0x105   : > { %3310 = vmatprep.subr.bf16.mxu1 %v3455_v1  ;;  %v4143_v39 = vadd.f32 %v491_v34, %v371_v57  ;;  %v2885_v41 = vpop.f32.mrb[7].mxu1  ;;  %v2167_v57 = vrot.slane %v2165_v21, 2 }
 0x106   : > { %3243 = vmatmul.mubr.bf16.vlgmr.msra.gmra.mrb[84].mxu0 %v4061_v31  ;;  %v4165_v31 = vsel %vm1923_vm5, %v1939_v25, %v4151_v22 }
 0x107   : > { %3271 = vmatmul.mubr.bf16.vlgmr.msra.gmra.mrb[84].mxu1 %v4139_v0  ;;  %3283 = vmatpush3.bf16.msra.mxu0 %v3439_v33  ;;  %v2168_v61 = vor.u32 %v2167_v57, %v2164_v40 }
 0x108   : > { %3311 = vmatpush3.bf16.msra.mxu1 %v3439_v33  ;;  %3284 = vmatprep.subr.bf16.mxu0 %v3455_v1 }
 0x109   : > { %3312 = vmatprep.subr.bf16.mxu1 %v3455_v1  ;;  %3246 = vmatprep.mubr.msk.bf16.mxu0 %vm3456_vm0, %v3455_v1  ;;  %v376_v45 = vpop.f32.mrb[8].mxu0 }
 0x10a   : > { %3274 = vmatprep.mubr.msk.bf16.mxu1 %vm3456_vm0, %v3455_v1  ;;  %v496_v46 = vpop.f32.mrb[8].mxu1  ;;  %v2860_v47 = vpop.f32.mrb[9].mxu0 }
 0x10b   : > { %3285 = vmatpush3.bf16.msra.mxu0 %v3440_v43  ;;  %v4158_v49 = vadd.f32 %v496_v46, %v376_v45  ;;  %v2888_v51 = vpop.f32.mrb[9].mxu1  ;;  %v379_v52 = vpop.f32.mrb[10].mxu0 }
 0x10c   : > { %3313 = vmatpush3.bf16.msra.mxu1 %v3440_v43  ;;  %3286 = vmatprep.subr.bf16.mxu0 %v3455_v1  ;;  %v499_v42 = vpop.f32.mrb[10].mxu1  ;;  %v2861_v53 = vpop.f32.mrb[11].mxu0 }
 0x10d   : > { %3314 = vmatprep.subr.bf16.mxu1 %v3455_v1  ;;  %v2889_v54 = vpop.f32.mrb[11].mxu1 }
 0x10e   : > { %3247 = vmatmul.mubr.bf16.gmra.mrb[88].mxu0 %v4084_v59  ;;  %v3444_v59 = vld [vmem:[%s4269_s2 + $0x228] sm:$0xff]  }
 0x10f   : > { %3275 = vmatmul.mubr.bf16.gmra.mrb[88].mxu1 %v4165_v31  ;;  %3287 = vmatpush3.bf16.msra.mxu0 %v3441_v50 }
 0x110   : > { %3315 = vmatpush3.bf16.msra.mxu1 %v3441_v50  ;;  %3288 = vmatprep.subr.bf16.mxu0 %v3455_v1  ;;  %v2169_v50 = vsel %vm1923_vm5, %v2159_v18, %v2168_v61 }
 0x111   : > { %3316 = vmatprep.subr.bf16.mxu1 %v3455_v1  ;;  %3250 = vmatprep.mubr.msk.bf16.mxu0 %vm3456_vm0, %v3455_v1 }
 0x112   : > { %3278 = vmatprep.mubr.msk.bf16.mxu1 %vm3456_vm0, %v3455_v1 }
 0x113   : > { %3289 = vmatpush3.bf16.msra.mxu0 %v3442_v55 }
 0x114   : > { %3317 = vmatpush3.bf16.msra.mxu1 %v3442_v55  ;;  %3290 = vmatprep.subr.bf16.mxu0 %v3455_v1 }
 0x115   : > { %3318 = vmatprep.subr.bf16.mxu1 %v3455_v1 }
 0x116   : > { %3251 = vmatmul.mubr.bf16.gmra.mrb[92].mxu0 %v4071_v30 }
 0x117   : > { %3279 = vmatmul.mubr.bf16.gmra.mrb[92].mxu1 %v4151_v22  ;;  %3291 = vmatpush3.bf16.msra.mxu0 %v3443_v56 }
 0x118   : > { %3319 = vmatpush3.bf16.msra.mxu1 %v3443_v56  ;;  %3292 = vmatprep.subr.bf16.mxu0 %v3455_v1 }
 0x119   : > { %v584_v30 = vpop.f32.mrb[12].mxu0  ;;  %3320 = vmatprep.subr.bf16.mxu1 %v3455_v1  ;;  %3298 = vmatprep.mubr.msk.bf16.mxu0 %vm3456_vm0, %v3455_v1 }
 0x11a   : > { %v640_v3 = vpop.f32.mrb[12].mxu1  ;;  %v2908_v4 = vpop.f32.mrb[13].mxu0  ;;  %3326 = vmatprep.mubr.msk.bf16.mxu1 %vm3456_vm0, %v3455_v1 }
 0x11b   : > { %v4202_v6 = vadd.f32 %v640_v3, %v584_v30  ;;  %v2936_v37 = vpop.f32.mrb[13].mxu1  ;;  %v587_v7 = vpop.f32.mrb[14].mxu0  ;;  %3293 = vmatpush3.bf16.msra.mxu0 %v3444_v59 }
 0x11c   : > { %v643_v8 = vpop.f32.mrb[14].mxu1  ;;  %3321 = vmatpush3.bf16.msra.mxu1 %v3444_v59  ;;  %v2909_v9 = vpop.f32.mrb[15].mxu0  ;;  %3294 = vmatprep.subr.bf16.mxu0 %v3455_v1 }
 0x11d   : > { %v644_v15 = vadd.f32 %v643_v8, %v587_v7  ;;  %v2937_v48 = vpop.f32.mrb[15].mxu1  ;;  %3322 = vmatprep.subr.bf16.mxu1 %v3455_v1 }
 0x11f   : > { %3295 = vmatpush3.bf16.msra.mxu0 %v3445_v38 }
 0x120   : > { %3323 = vmatpush3.bf16.msra.mxu1 %v3445_v38  ;;  %3296 = vmatprep.subr.bf16.mxu0 %v3455_v1 }
 0x121   : > { %3324 = vmatprep.subr.bf16.mxu1 %v3455_v1  ;;  %v592_v23 = vpop.f32.mrb[16].mxu0 }
 0x122   : > { %v648_v24 = vpop.f32.mrb[16].mxu1  ;;  %v2912_v25 = vpop.f32.mrb[17].mxu0 }
 0x123   : > { %3297 = vmatpush3.bf16.msra.mxu0 %v3446_v16  ;;  %v649_v27 = vadd.f32 %v648_v24, %v592_v23  ;;  %v2940_v26 = vpop.f32.mrb[17].mxu1  ;;  %v595_v35 = vpop.f32.mrb[18].mxu0 }
 0x124   : > { %3325 = vmatpush3.bf16.msra.mxu1 %v3446_v16  ;;  %v651_v29 = vpop.f32.mrb[18].mxu1  ;;  %v2913_v33 = vpop.f32.mrb[19].mxu0 }
 0x125   : > { %v652_v34 = vadd.f32 %v651_v29, %v595_v35  ;;  %v2941_v58 = vpop.f32.mrb[19].mxu1 }
 0x126   : > { %3299 = vmatmul.mubr.bf16.vlgmr.msra.gmra.mrb[96].mxu0 %v4139_v0 }
 0x127   : > { %3327 = vmatmul.mubr.bf16.vlgmr.msra.gmra.mrb[96].mxu1 %v2160_v28  ;;  %3302 = vmatprep.mubr.msk.bf16.mxu0 %vm3456_vm0, %v3455_v1 }
 0x128   : > { %3330 = vmatprep.mubr.msk.bf16.mxu1 %vm3456_vm0, %v3455_v1 }
 0x129   : > { %v600_v36 = vpop.f32.mrb[20].mxu0 }
 0x12a   : > { %v656_v41 = vpop.f32.mrb[20].mxu1  ;;  %v2916_v43 = vpop.f32.mrb[21].mxu0 }
 0x12b   : > { %v657_v45 = vadd.f32 %v656_v41, %v600_v36  ;;  %v2944_v46 = vpop.f32.mrb[21].mxu1  ;;  %v603_v47 = vpop.f32.mrb[22].mxu0 }
 0x12c   : > { %v659_v51 = vpop.f32.mrb[22].mxu1  ;;  %v2917_v52 = vpop.f32.mrb[23].mxu0 }
 0x12d   : > { %v2945_v42 = vpop.f32.mrb[23].mxu1 }
 0x12e   : > { %3303 = vmatmul.mubr.bf16.gmra.mrb[100].mxu0 %v4165_v31 }
 0x12f   : > { %3331 = vmatmul.mubr.bf16.gmra.mrb[100].mxu1 %v2169_v50  ;;  %3306 = vmatprep.mubr.msk.bf16.mxu0 %vm3456_vm0, %v3455_v1 }
 0x130   : > { %3334 = vmatprep.mubr.msk.bf16.mxu1 %vm3456_vm0, %v3455_v1 }
 0x136   : > { %3307 = vmatmul.mubr.bf16.gmra.mrb[104].mxu0 %v4151_v22 }
 0x137   : > { %3335 = vmatmul.mubr.bf16.gmra.mrb[104].mxu1 %v2168_v61 }
 0x139   : > { %v761_v0 = vpop.f32.mrb[24].mxu0 }
 0x13a   : > { %v783_v53 = vadd.f32 %v761_v0, %v4119_v10  ;;  %v869_v54 = vpop.f32.mrb[24].mxu1  ;;  %v2964_v55 = vpop.f32.mrb[25].mxu0 }
 0x13b   : > { %v891_v56 = vadd.f32 %v869_v54, %v4202_v6  ;;  %v2992_v59 = vpop.f32.mrb[25].mxu1  ;;  %v764_v44 = vpop.f32.mrb[26].mxu0 }
 0x13c   : > { %v784_v31 = vadd.f32 %v764_v44, %v4125_v20  ;;  %v872_v60 = vpop.f32.mrb[26].mxu1  ;;  %v2965_v62 = vpop.f32.mrb[27].mxu0 }
 0x13d   : > { %v892_v63 = vadd.f32 %v872_v60, %v644_v15  ;;  %v2993_v2 = vpop.f32.mrb[27].mxu1 }
 0x141   : > { %v769_v30 = vpop.f32.mrb[28].mxu0 }
 0x142   : > { %v785_v1 = vadd.f32 %v769_v30, %v4133_v32  ;;  %v877_v22 = vpop.f32.mrb[28].mxu1  ;;  %v2968_v3 = vpop.f32.mrb[29].mxu0 }
 0x143   : > { %v893_v4 = vadd.f32 %v877_v22, %v649_v27  ;;  %v2996_v5 = vpop.f32.mrb[29].mxu1  ;;  %v772_v10 = vpop.f32.mrb[30].mxu0 }
 0x144   : > { %v786_v37 = vadd.f32 %v772_v10, %v4143_v39  ;;  %v880_v7 = vpop.f32.mrb[30].mxu1  ;;  %v2969_v6 = vpop.f32.mrb[31].mxu0 }
 0x145   : > { %v894_v38 = vadd.f32 %v880_v7, %v652_v34  ;;  %v2997_v8 = vpop.f32.mrb[31].mxu1 }
 0x149   : > { %v777_v9 = vpop.f32.mrb[32].mxu0 }
 0x14a   : > { %v787_v20 = vadd.f32 %v777_v9, %v4158_v49  ;;  %v885_v11 = vpop.f32.mrb[32].mxu1  ;;  %v2972_v12 = vpop.f32.mrb[33].mxu0 }
 0x14b   : > { %v895_v13 = vadd.f32 %v885_v11, %v657_v45  ;;  %v3000_v14 = vpop.f32.mrb[33].mxu1  ;;  %v780_v15 = vpop.f32.mrb[34].mxu0 }
 0x14c   : > { %v888_v32 = vpop.f32.mrb[34].mxu1  ;;  %v2973_v48 = vpop.f32.mrb[35].mxu0 }
 0x14d   : > { %v3001_v16 = vpop.f32.mrb[35].mxu1 }
 0x159   : > { %v1028_v17 = vpop.f32.mrb[36].mxu0 }
 0x15a   : > { %v1050_v18 = vadd.f32 %v1028_v17, %v783_v53  ;;  %v1121_v19 = vpop.f32.mrb[36].mxu1  ;;  %v3020_v21 = vpop.f32.mrb[37].mxu0 }
 0x15b   : > { %v1143_v39 = vadd.f32 %v1121_v19, %v891_v56  ;;  %v3048_v23 = vpop.f32.mrb[37].mxu1  ;;  %v1031_v24 = vpop.f32.mrb[38].mxu0 }
 0x15c   : > { %v1051_v25 = vadd.f32 %v1031_v24, %v784_v31  ;;  %v1124_v27 = vpop.f32.mrb[38].mxu1  ;;  %v3021_v26 = vpop.f32.mrb[39].mxu0 }
 0x15d   : > { %v1144_v35 = vadd.f32 %v1124_v27, %v892_v63  ;;  %v3049_v49 = vpop.f32.mrb[39].mxu1 }
 0x161   : > { %v1036_v28 = vpop.f32.mrb[40].mxu0 }
 0x162   : > { %v1052_v29 = vadd.f32 %v1036_v28, %v785_v1  ;;  %v1129_v33 = vpop.f32.mrb[40].mxu1  ;;  %v3024_v40 = vpop.f32.mrb[41].mxu0 }
 0x163   : > { %v1145_v57 = vadd.f32 %v1129_v33, %v893_v4  ;;  %v3052_v34 = vpop.f32.mrb[41].mxu1  ;;  %v1039_v58 = vpop.f32.mrb[42].mxu0 }
 0x164   : > { %v1053_v61 = vadd.f32 %v1039_v58, %v786_v37  ;;  %v1132_v36 = vpop.f32.mrb[42].mxu1  ;;  %v3025_v41 = vpop.f32.mrb[43].mxu0 }
 0x165   : > { %v1146_v43 = vadd.f32 %v1132_v36, %v894_v38  ;;  %v3053_v45 = vpop.f32.mrb[43].mxu1 }
 0x169   : > { %v1044_v46 = vpop.f32.mrb[44].mxu0 }
 0x16a   : > { %v1054_v47 = vadd.f32 %v1044_v46, %v787_v20  ;;  %v1137_v50 = vpop.f32.mrb[44].mxu1  ;;  %v3028_v51 = vpop.f32.mrb[45].mxu0 }
 0x16b   : > { %v1147_v52 = vadd.f32 %v1137_v50, %v895_v13  ;;  %v3056_v42 = vpop.f32.mrb[45].mxu1  ;;  %v1047_v0 = vpop.f32.mrb[46].mxu0 }
 0x16c   : > { %v1140_v53 = vpop.f32.mrb[46].mxu1  ;;  %v3029_v54 = vpop.f32.mrb[47].mxu0 }
 0x16d   : > { %v3057_v55 = vpop.f32.mrb[47].mxu1 }
 0x179   : > { %v1247_v56 = vpop.f32.mrb[48].mxu0 }
 0x17a   : > { %v1269_v59 = vadd.f32 %v1247_v56, %v1050_v18  ;;  %v1321_v44 = vpop.f32.mrb[48].mxu1  ;;  %v3076_v31 = vpop.f32.mrb[49].mxu0 }
 0x17b   : > { %v1343_v60 = vadd.f32 %v1321_v44, %v1143_v39  ;;  %v3104_v62 = vpop.f32.mrb[49].mxu1  ;;  %v1250_v63 = vpop.f32.mrb[50].mxu0 }
 0x17c   : > { %v1270_v2 = vadd.f32 %v1250_v63, %v1051_v25  ;;  %v1324_v30 = vpop.f32.mrb[50].mxu1  ;;  %v3077_v1 = vpop.f32.mrb[51].mxu0 }
 0x17d   : > { %v1344_v22 = vadd.f32 %v1324_v30, %v1144_v35  ;;  %v3105_v3 = vpop.f32.mrb[51].mxu1 }
 0x181   : > { %v1255_v4 = vpop.f32.mrb[52].mxu0 }
 0x182   : > { %v1271_v5 = vadd.f32 %v1255_v4, %v1052_v29  ;;  %v1329_v10 = vpop.f32.mrb[52].mxu1  ;;  %v3080_v37 = vpop.f32.mrb[53].mxu0 }
 0x183   : > { %v1345_v7 = vadd.f32 %v1329_v10, %v1145_v57  ;;  %v3108_v6 = vpop.f32.mrb[53].mxu1  ;;  %v1258_v38 = vpop.f32.mrb[54].mxu0 }
 0x184   : > { %v1272_v8 = vadd.f32 %v1258_v38, %v1053_v61  ;;  %v1332_v9 = vpop.f32.mrb[54].mxu1  ;;  %v3081_v20 = vpop.f32.mrb[55].mxu0 }
 0x185   : > { %v1346_v11 = vadd.f32 %v1332_v9, %v1146_v43  ;;  %v3109_v12 = vpop.f32.mrb[55].mxu1 }
 0x189   : > { %v1263_v13 = vpop.f32.mrb[56].mxu0 }
 0x18a   : > { %v1273_v14 = vadd.f32 %v1263_v13, %v1054_v47  ;;  %v1337_v15 = vpop.f32.mrb[56].mxu1  ;;  %v3084_v32 = vpop.f32.mrb[57].mxu0 }
 0x18b   : > { %v1347_v48 = vadd.f32 %v1337_v15, %v1147_v52  ;;  %v3112_v16 = vpop.f32.mrb[57].mxu1  ;;  %v1266_v17 = vpop.f32.mrb[58].mxu0 }
 0x18c   : > { %v1340_v18 = vpop.f32.mrb[58].mxu1  ;;  %v3085_v19 = vpop.f32.mrb[59].mxu0 }
 0x18d   : > { %v3113_v21 = vpop.f32.mrb[59].mxu1 }
 0x199   : > { %v1447_v39 = vpop.f32.mrb[60].mxu0 }
 0x19a   : > { %v1469_v23 = vadd.f32 %v1447_v39, %v1269_v59  ;;  %v1520_v24 = vpop.f32.mrb[60].mxu1  ;;  %v3132_v25 = vpop.f32.mrb[61].mxu0 }
 0x19b   : > { %v1542_v27 = vadd.f32 %v1520_v24, %v1343_v60  ;;  %v3160_v26 = vpop.f32.mrb[61].mxu1  ;;  %v1450_v35 = vpop.f32.mrb[62].mxu0 }
 0x19c   : > { %v1470_v49 = vadd.f32 %v1450_v35, %v1270_v2  ;;  %v1523_v28 = vpop.f32.mrb[62].mxu1  ;;  %v3133_v29 = vpop.f32.mrb[63].mxu0 }
 0x19d   : > { %v1543_v33 = vadd.f32 %v1523_v28, %v1344_v22  ;;  %v3161_v40 = vpop.f32.mrb[63].mxu1 }
 0x1a1   : > { %v1455_v57 = vpop.f32.mrb[64].mxu0 }
 0x1a2   : > { %v1471_v34 = vadd.f32 %v1455_v57, %v1271_v5  ;;  %v1528_v58 = vpop.f32.mrb[64].mxu1  ;;  %v3136_v61 = vpop.f32.mrb[65].mxu0 }
 0x1a3   : > { %v1544_v36 = vadd.f32 %v1528_v58, %v1345_v7  ;;  %v3164_v41 = vpop.f32.mrb[65].mxu1  ;;  %v1458_v43 = vpop.f32.mrb[66].mxu0 }
 0x1a4   : > { %v1472_v45 = vadd.f32 %v1458_v43, %v1272_v8  ;;  %v1531_v46 = vpop.f32.mrb[66].mxu1  ;;  %v3137_v47 = vpop.f32.mrb[67].mxu0 }
 0x1a5   : > { %v1545_v50 = vadd.f32 %v1531_v46, %v1346_v11  ;;  %v3165_v51 = vpop.f32.mrb[67].mxu1 }
 0x1a9   : > { %v1463_v52 = vpop.f32.mrb[68].mxu0 }
 0x1aa   : > { %v1473_v42 = vadd.f32 %v1463_v52, %v1273_v14  ;;  %v1536_v0 = vpop.f32.mrb[68].mxu1  ;;  %v3140_v53 = vpop.f32.mrb[69].mxu0 }
 0x1ab   : > { %v1546_v54 = vadd.f32 %v1536_v0, %v1347_v48  ;;  %v3168_v55 = vpop.f32.mrb[69].mxu1  ;;  %v1466_v56 = vpop.f32.mrb[70].mxu0 }
 0x1ac   : > { %v1539_v59 = vpop.f32.mrb[70].mxu1  ;;  %v3141_v44 = vpop.f32.mrb[71].mxu0 }
 0x1ad   : > { %v3169_v31 = vpop.f32.mrb[71].mxu1 }
 0x1b9   : > { %v1676_v60 = vpop.f32.mrb[72].mxu0 }
 0x1ba   : > { %v1698_v62 = vadd.f32 %v1676_v60, %v1469_v23  ;;  %v1766_v63 = vpop.f32.mrb[72].mxu1  ;;  %v3188_v2 = vpop.f32.mrb[73].mxu0 }
 0x1bb   : > { %v1788_v30 = vadd.f32 %v1766_v63, %v1542_v27  ;;  %v3216_v1 = vpop.f32.mrb[73].mxu1  ;;  %v1679_v22 = vpop.f32.mrb[74].mxu0 }
 0x1bc   : > { %v1699_v3 = vadd.f32 %v1679_v22, %v1470_v49  ;;  %v1769_v4 = vpop.f32.mrb[74].mxu1  ;;  %v3189_v5 = vpop.f32.mrb[75].mxu0  ;;  %v4238_v1 = vld [vmem:[%s4270_s3] ss:$0 sm:$0xff] }
 0x1bd   : > { %v1789_v10 = vadd.f32 %v1769_v4, %v1543_v33  ;;  %v3217_v37 = vpop.f32.mrb[75].mxu1 }
 0x1c1   : > { %v1684_v7 = vpop.f32.mrb[76].mxu0 }
 0x1c2   : > { %v1700_v6 = vadd.f32 %v1684_v7, %v1471_v34  ;;  %v1774_v38 = vpop.f32.mrb[76].mxu1  ;;  %v3192_v8 = vpop.f32.mrb[77].mxu0 }
 0x1c3   : > { %v1790_v9 = vadd.f32 %v1774_v38, %v1544_v36  ;;  %v3220_v20 = vpop.f32.mrb[77].mxu1  ;;  %v1687_v11 = vpop.f32.mrb[78].mxu0 }
 0x1c4   : > { %v1701_v12 = vadd.f32 %v1687_v11, %v1472_v45  ;;  %v1777_v13 = vpop.f32.mrb[78].mxu1  ;;  %v3193_v14 = vpop.f32.mrb[79].mxu0 }
 0x1c5   : > { %v1791_v15 = vadd.f32 %v1777_v13, %v1545_v50  ;;  %v3221_v32 = vpop.f32.mrb[79].mxu1 }
 0x1c9   : > { %v1692_v48 = vpop.f32.mrb[80].mxu0 }
 0x1ca   : > { %v1702_v16 = vadd.f32 %v1692_v48, %v1473_v42  ;;  %v1782_v17 = vpop.f32.mrb[80].mxu1  ;;  %v3196_v18 = vpop.f32.mrb[81].mxu0 }
 0x1cb   : > { %v1792_v19 = vadd.f32 %v1782_v17, %v1546_v54  ;;  %v3224_v21 = vpop.f32.mrb[81].mxu1  ;;  %v1695_v39 = vpop.f32.mrb[82].mxu0 }
 0x1cc   : > { %v1785_v23 = vpop.f32.mrb[82].mxu1  ;;  %v3197_v24 = vpop.f32.mrb[83].mxu0 }
 0x1cd   : > { %v3225_v25 = vpop.f32.mrb[83].mxu1 }
 0x1d9   : > { %v1892_v27 = vpop.f32.mrb[84].mxu0 }
 0x1da   : > { %v1914_v26 = vadd.f32 %v1892_v27, %v1698_v62  ;;  %v1987_v35 = vpop.f32.mrb[84].mxu1  ;;  %v3244_v49 = vpop.f32.mrb[85].mxu0 }
 0x1db   : > { %v2009_v28 = vadd.f32 %v1987_v35, %v1788_v30  ;;  %v3272_v29 = vpop.f32.mrb[85].mxu1  ;;  %v1895_v33 = vpop.f32.mrb[86].mxu0 }
 0x1dc   : > { %v1915_v40 = vadd.f32 %v1895_v33, %v1699_v3  ;;  %v1990_v57 = vpop.f32.mrb[86].mxu1  ;;  %v3245_v34 = vpop.f32.mrb[87].mxu0 }
 0x1dd   : > { %v2010_v58 = vadd.f32 %v1990_v57, %v1789_v10  ;;  %v3273_v61 = vpop.f32.mrb[87].mxu1 }
 0x1e1   : > { %v1900_v36 = vpop.f32.mrb[88].mxu0 }
 0x1e2   : > { %v1916_v41 = vadd.f32 %v1900_v36, %v1700_v6  ;;  %v1995_v43 = vpop.f32.mrb[88].mxu1  ;;  %v3248_v45 = vpop.f32.mrb[89].mxu0 }
 0x1e3   : > { %v2011_v46 = vadd.f32 %v1995_v43, %v1790_v9  ;;  %v3276_v47 = vpop.f32.mrb[89].mxu1  ;;  %v1903_v50 = vpop.f32.mrb[90].mxu0 }
 0x1e4   : > { %v1917_v51 = vadd.f32 %v1903_v50, %v1701_v12  ;;  %v1998_v52 = vpop.f32.mrb[90].mxu1  ;;  %v3249_v42 = vpop.f32.mrb[91].mxu0 }
 0x1e5   : > { %v2012_v0 = vadd.f32 %v1998_v52, %v1791_v15  ;;  %v3277_v53 = vpop.f32.mrb[91].mxu1 }
 0x1e9   : > { %v1908_v54 = vpop.f32.mrb[92].mxu0 }
 0x1ea   : > { %v1918_v55 = vadd.f32 %v1908_v54, %v1702_v16  ;;  %v2003_v56 = vpop.f32.mrb[92].mxu1  ;;  %v3252_v59 = vpop.f32.mrb[93].mxu0 }
 0x1eb   : > { %v4233_v44 = vadd.f32 %v2003_v56, %v1792_v19  ;;  %v3280_v31 = vpop.f32.mrb[93].mxu1  ;;  %v1911_v60 = vpop.f32.mrb[94].mxu0 }
 0x1ec   : > { %v2006_v62 = vpop.f32.mrb[94].mxu1  ;;  %v3253_v63 = vpop.f32.mrb[95].mxu0 }
 0x1ed   : > { %v3281_v2 = vpop.f32.mrb[95].mxu1 }
 0x1f9   : > { %v2113_v30 = vpop.f32.mrb[96].mxu0 }
 0x1fa   : > { %v2135_v22 = vadd.f32 %v2113_v30, %v1914_v26  ;;  %v2207_v3 = vpop.f32.mrb[96].mxu1  ;;  %v3300_v4 = vpop.f32.mrb[97].mxu0 }
 0x1fb   : > { %v2229_v5 = vadd.f32 %v2207_v3, %v2009_v28  ;;  %v3328_v10 = vpop.f32.mrb[97].mxu1  ;;  %v2116_v37 = vpop.f32.mrb[98].mxu0 }
 0x1fc   : > { %v2241_v7 = vadd.f32 %v4238_v1, %v2135_v22  ;;  %v2136_v6 = vadd.f32 %v2116_v37, %v1915_v40  ;;  %v2210_v38 = vpop.f32.mrb[98].mxu1  ;;  %v3301_v8 = vpop.f32.mrb[99].mxu0 }
 0x1fd   : > { %v2251_v9 = vadd.f32 %v4238_v1, %v2229_v5  ;;  %v2230_v20 = vadd.f32 %v2210_v38, %v2010_v58  ;;  %v3329_v11 = vpop.f32.mrb[99].mxu1 }
 0x1fe   : > { %v2246_v12 = vmax.f32 %v2241_v7, 0.0  ;;  %v2242_v13 = vadd.f32 %v4238_v1, %v2136_v6 }
 0x1ff   : > { %v2256_v14 = vmax.f32 %v2251_v9, 0.0  ;;  %v2252_v15 = vadd.f32 %v4238_v1, %v2230_v20 }
 0x200   : > { %v2247_v32 = vmax.f32 %v2242_v13, 0.0 }
 0x201   : > { %v2261_v48 = vmax.f32 %v2246_v12, %v2256_v14  ;;  %v2257_v16 = vmax.f32 %v2252_v15, 0.0  ;;  %v2121_v17 = vpop.f32.mrb[100].mxu0 }
 0x202   : > { %v2137_v18 = vadd.f32 %v2121_v17, %v1916_v41  ;;  %v2215_v19 = vpop.f32.mrb[100].mxu1  ;;  %v3304_v21 = vpop.f32.mrb[101].mxu0 }
 0x203   : > { %v2262_v39 = vmax.f32 %v2247_v32, %v2257_v16  ;;  %v2231_v23 = vadd.f32 %v2215_v19, %v2011_v46  ;;  %v3332_v24 = vpop.f32.mrb[101].mxu1  ;;  %v2124_v25 = vpop.f32.mrb[102].mxu0  ;;  %v2269_v28 = vrot.slane %v2261_v48, 5 }
 0x204   : > { %v2243_v27 = vadd.f32 %v4238_v1, %v2137_v18  ;;  %v2138_v26 = vadd.f32 %v2124_v25, %v1917_v51  ;;  %v2218_v35 = vpop.f32.mrb[102].mxu1  ;;  %v3305_v49 = vpop.f32.mrb[103].mxu0 }
 0x205   : > { %v2270_v29 = vrot.slane %v2262_v39, 5  ;;  %v2253_v33 = vadd.f32 %v4238_v1, %v2231_v23  ;;  %v2232_v40 = vadd.f32 %v2218_v35, %v2012_v0  ;;  %v3333_v57 = vpop.f32.mrb[103].mxu1 }
 0x206   : > { %v2248_v34 = vmax.f32 %v2243_v27, 0.0  ;;  %v2244_v58 = vadd.f32 %v4238_v1, %v2138_v26 }
 0x207   : > { %v2271_v61 = vsel %vm2268_vm6, %v2269_v28, %v2270_v29  ;;  %v2258_v36 = vmax.f32 %v2253_v33, 0.0  ;;  %v2254_v41 = vadd.f32 %v4238_v1, %v2232_v40 }
 0x208   : > { %v2273_v43 = vmax.f32 %v2261_v48, %v2271_v61  ;;  %v2249_v45 = vmax.f32 %v2244_v58, 0.0 }
 0x209   : > { %v2263_v46 = vmax.f32 %v2248_v34, %v2258_v36  ;;  %v2259_v47 = vmax.f32 %v2254_v41, 0.0  ;;  %v2129_v50 = vpop.f32.mrb[104].mxu0 }
 0x20a   : > { %v2274_v51 = vpack.c.bf16 %v2273_v43, %v2273_v43  ;;  %v2139_v52 = vadd.f32 %v2129_v50, %v1918_v55  ;;  %v2223_v42 = vpop.f32.mrb[104].mxu1  ;;  %v3308_v0 = vpop.f32.mrb[105].mxu0 }
 0x20b   : > { %v2277_v53 = vrot.slane %v2263_v46, 5  ;;  %v2264_v54 = vmax.f32 %v2249_v45, %v2259_v47  ;;  %v2233_v56 = vadd.f32 %v2223_v42, %v4233_v44  ;;  %v3336_v59 = vpop.f32.mrb[105].mxu1  ;;  %v2132_v31 = vpop.f32.mrb[106].mxu0 }
 0x20c   : > { %2275 = vst [vmem:[%s4253_s10] sm:$0x3] %v2274_v51  ;;  %v2245_v60 = vadd.f32 %v4238_v1, %v2139_v52  ;;  %v2226_v62 = vpop.f32.mrb[106].mxu1  ;;  %v3309_v63 = vpop.f32.mrb[107].mxu0 }
 0x20d   : > { %v2278_v2 = vsel %vm2268_vm6, %v2270_v29, %v2277_v53  ;;  %v2289_v30 = vrot.slane %v2264_v54, 5  ;;  %v2255_v55 = vadd.f32 %v4238_v1, %v2233_v56  ;;  %v3337_v22 = vpop.f32.mrb[107].mxu1 }
 0x20e   : > { %v2280_v3 = vmax.f32 %v2262_v39, %v2278_v2  ;;  %v2250_v4 = vmax.f32 %v2245_v60, 0.0 }
 0x20f   : > { %v2291_v5 = vmax.f32 %v2263_v46, %v2289_v30  ;;  %v2260_v10 = vmax.f32 %v2255_v55, 0.0 }
 0x210   : > { %v2632_v44 = vpack.c.bf16 %v2280_v3, %v2280_v3 }
 0x211   : > { %v2633_v37 = vpack.c.bf16 %v2291_v5, %v2291_v5  ;;  %v2265_v7 = vmax.f32 %v2250_v4, %v2260_v10 }
 0x212   : > { %v2285_v6 = vrot.slane %v2632_v44, 7 }
 0x213   : > { %v2625_v38 = vrot.slane %v2633_v37, 10  ;;  %v2301_v8 = vrot.slane %v2265_v7, 5 }
 0x214   : > { %2287 = vst [vmem:[%s4253_s10] sm:$0xc] %v2285_v6 }
 0x215   : > { %2299 = vst [vmem:[%s4253_s10 + $0x4] sm:$0x3] %v2625_v38  ;;  %v2303_v9 = vmax.f32 %v2264_v54, %v2301_v8  ;;  %v2304_v20 = vmax.f32 %v2265_v7, %v2301_v8 }
 0x217   : > { %v2634_v11 = vpack.c.bf16 %v2303_v9, %v2303_v9  ;;  %v2635_v12 = vpack.c.bf16 %v2304_v20, %v2304_v20 }
 0x219   : > { %v2628_v1 = vrot.slane %v2634_v11, 9  ;;  %v2316_v13 = vrot.slane %v2635_v12, 5 }
 0x21b   : > { %v2317_v14 = vsel %vm2313_vm8, %v2628_v1, %v2316_v13 }
 0x21c   : > { %2319 = vst [vmem:[%s4253_s10 + $0x4] sm:$0xc] %v2317_v14 }
 0x21d PF: > { %s14_s15 = sadd.s32 1, %s3453_s15  }
 0x21e   : > { %p11_p4 = scmp.ge.s32.totalorder %s14_s15, 4  }
 0x220   :  { %13 = sbr.rel (!%p11_p4) target bundleno = 1 (0x1), region = 77 }

// kernel: cnn_forward.3
= control target key start
LH: loop header
LB: loop body
LE: loop exit
PB: predicated region body
PF: predicated region fallthrough
CT: control target
= control target key end

     0   :  { %s5441_s15 = smov 0   ;;  %s7433_s0 = inlined_call_operand.vmem [shape: bf16[2,171,8], index: 0, kind: input, shape index: {}]   ;;  %s7434_s1 = inlined_call_operand.vmem [shape: bf16[2,171,8], index: 1, kind: input, shape index: {}]   ;;  %s7435_s2 = inlined_call_operand.vmem [shape: bf16[9,8,128], index: 2, kind: input, shape index: {}]   ;;  %s7436_s3 = inlined_call_operand.vmem [shape: f32[1,128], index: 3, kind: input, shape index: {}]   ;;  %s7437_s4 = inlined_call_operand.vmem [shape: bf16[2,64,128], index: 4, kind: output, shape index: {}]  }
   0x1 LB: > { %s4154_s16 = sadd.s32 4294967295, %s5412_s15   ;;  %p4158_p0 = scmp.ge.s32.totalorder %s5412_s15, 1  ;;  %s5412_s15 = sphi %s5441_s15, %s14_s15  }
   0x2   : > { %p172_p1 = scmp.lt.s32.totalorder %s5412_s15, 3 }
   0x4   : > { %p173_p2 = pnand %p4158_p0, %p172_p1 }
   0x6   : > { %176 = sbr.rel (%p173_p2) target bundleno = 895 (0x37f), region = 36 }
   0xd   : > { %v4163_v0 = vld [vmem:[%s7435_s2 + $0x4] sm:$0xf]  ;;  %vm331_vm0 = vcmask 1043456   ;;  %v219_v1 = vld [vmem:[%s7435_s2] sm:$0xf]  ;;  %v7440_v2 = vmov 0.0  }
   0xe   : > { %4629 = vmatprep.subr.bf16.mxu0 %v7440_v2  ;;  %4667 = vmatprep.subr.bf16.mxu1 %v7440_v2  ;;  %v333_v3 = vsel %vm331_vm0, %v4163_v0, 0  ;;  %v513_v4 = vsel %vm331_vm0, %v219_v1, 0  ;;  %p203_p3 = scmp.lt.s32.totalorder %s4154_s16, 1  ;;  %vm5415_vm1 = vmmov 0   ;;  %vm303_vm2 = vcmask 64512  }
   0xf   : > { %4630 = vmatpush3.bf16.msra.mxu0 %v333_v3  ;;  %4668 = vmatpush3.bf16.msra.mxu1 %v513_v4  ;;  %vm687_vm3 = vsmask.f32 7424  ;;  %v4228_v32 = vld [vmem:[%s7435_s2 + $0x8] sm:$0xf]  ;;  %vm2145_vm4 = vcmask 1046528   ;;  %vm3958_vm6 = vcmask 1042432  }
  0x10   : > { %4631 = vmatprep.mubr.msk.bf16.mxu0 %vm5415_vm1, %v7440_v2  ;;  %4669 = vmatprep.mubr.msk.bf16.mxu1 %vm5415_vm1, %v7440_v2  ;;  %s7527_s16 = smov (!%p203_p3, %s4154_s16), 1  ;;  %v1004_v36 = vsel %vm331_vm0, %v4228_v32, 0  ;;  %vm3225_vm5 = vsmask.f32 6400  ;;  %vm3959_vm7 = vcmask 1046532   ;;  %vm3982_vm9 = vcmask 1041408  }
  0x11   : > { %4705 = vmatprep.subr.bf16.mxu0 %v7440_v2  ;;  %4743 = vmatprep.subr.bf16.mxu1 %v7440_v2  ;;  %s5313_s21 = smul.u32 88, %s7527_s16  ;;  %s4436_s20 = sshll.u32 %s7527_s16, 5  ;;  %vm7351_vm8 = vmor %vm3958_vm6, %vm3959_vm7  ;;  %vm3983_vm10 = vcmask 1045508   ;;  %vm4006_vm12 = vcmask 1040384   ;;  %vm4007_vm13 = vcmask 1044484  }
  0x12   : > { %s7337_s16 = scalar_lea.vmem %s7437_s4, %s4436_s20  ;;  %vm7368_vm11 = vmor %vm3982_vm9, %vm3983_vm10 }
  0x13   : > { %s5471_s24 = scalar_lea.vmem %s7434_s1, %s5313_s21  ;;  %s5476_s27 = scalar_lea.vmem %s7433_s0, %s5313_s21  ;;  %vm7385_vm14 = vmor %vm4006_vm12, %vm4007_vm13 }
  0x14   : > { %v5479_v5 = vld [vmem:[%s5471_s24] sm:$0xff]   ;;  %v5491_v7 = vld [vmem:[%s5471_s24 + $0x8] sm:$0xff]   ;;  %v5503_v9 = vld [vmem:[%s5471_s24 + $0x10] sm:$0xff]  }
  0x15   : > { %v5325_v6 = vld [vmem:[%s5476_s27] sm:$0xff]   ;;  %4632 = vmatmul.mubr.msk.bf16.vlgmr.msra.gmra.mrb[0].mxu0 %vm303_vm2, %v5479_v5  ;;  %v5327_v8 = vld [vmem:[%s5476_s27 + $0x8] sm:$0xff]   ;;  %v5329_v10 = vld [vmem:[%s5476_s27 + $0x10] sm:$0xff]  }
  0x16   : > { %4670 = vmatmul.mubr.msk.bf16.vlgmr.msra.gmra.mrb[0].mxu1 %vm303_vm2, %v5325_v6  ;;  %4706 = vmatpush3.bf16.msra.mxu0 %v333_v3  ;;  %v5514_v11 = vld [vmem:[%s5471_s24 + $0x18] sm:$0xff]   ;;  %v5525_v13 = vld [vmem:[%s5471_s24 + $0x20] sm:$0xff]   ;;  %v5536_v15 = vld [vmem:[%s5471_s24 + $0x28] sm:$0xff]  }
  0x17   : > { %4744 = vmatpush3.bf16.msra.mxu1 %v513_v4  ;;  %4635 = vmatprep.mubr.msk.bf16.mxu0 %vm5415_vm1, %v7440_v2  ;;  %v5331_v12 = vld [vmem:[%s5476_s27 + $0x18] sm:$0xff]   ;;  %v5333_v14 = vld [vmem:[%s5476_s27 + $0x20] sm:$0xff]   ;;  %v5335_v16 = vld [vmem:[%s5476_s27 + $0x28] sm:$0xff]  }
  0x18   : > { %4673 = vmatprep.mubr.msk.bf16.mxu1 %vm5415_vm1, %v7440_v2  ;;  %4781 = vmatprep.subr.bf16.mxu0 %v7440_v2  ;;  %v5547_v17 = vld [vmem:[%s5471_s24 + $0x30] sm:$0xff]   ;;  %v5558_v19 = vld [vmem:[%s5471_s24 + $0x38] sm:$0xff]   ;;  %v5342_v20 = vld [vmem:[%s5476_s27] sm:$0xff]  }
  0x19   : > { %4819 = vmatprep.subr.bf16.mxu1 %v7440_v2  ;;  %v5337_v18 = vld [vmem:[%s5476_s27 + $0x30] sm:$0xff]   ;;  %v5339_v21 = vld [vmem:[%s5476_s27 + $0x38] sm:$0xff]   ;;  %v5343_v22 = vld [vmem:[%s5476_s27 + $0x8] sm:$0xff]   ;;  %v691_v23 = vshll.u32 %v5342_v20, 16  ;;  %v689_v27 = vshrl.u32 %v5342_v20, 16 }
  0x1a   : > { %v5571_v24 = vld [vmem:[%s5471_s24 + $0x40] sm:$0xff]   ;;  %v696_v25 = vshll.u32 %v5343_v22, 16  ;;  %v5344_v30 = vld [vmem:[%s5476_s27 + $0x10] sm:$0xff]   ;;  %v700_v34 = vshrl.u32 %v5343_v22, 16  ;;  %v5345_v39 = vld [vmem:[%s5476_s27 + $0x18] sm:$0xff]  }
  0x1b   : > { %v5341_v26 = vld [vmem:[%s5476_s27 + $0x40] sm:$0xff]   ;;  %v693_v28 = vrot.slane %v691_v23, 1  ;;  %v704_v35 = vshll.u32 %v5344_v30, 16  ;;  %v708_v41 = vshrl.u32 %v5344_v30, 16  ;;  %v712_v42 = vshll.u32 %v5345_v39, 16  ;;  %v5347_v51 = vld [vmem:[%s5476_s27 + $0x28] sm:$0xff]  }
  0x1c   : > { %v698_v29 = vrot.slane %v696_v25, 1  ;;  %v5346_v45 = vld [vmem:[%s5476_s27 + $0x20] sm:$0xff]   ;;  %v716_v47 = vshrl.u32 %v5345_v39, 16  ;;  %v728_v54 = vshll.u32 %v5347_v51, 16  ;;  %v5348_v57 = vld [vmem:[%s5476_s27 + $0x30] sm:$0xff]   ;;  %v732_v59 = vshrl.u32 %v5347_v51, 16 }
  0x1d   : > { %4636 = vmatmul.mubr.msk.bf16.gmra.mrb[4].mxu0 %vm303_vm2, %v5491_v7  ;;  %v694_v31 = vor.u32 %v693_v28, %v689_v27  ;;  %v706_v38 = vrot.slane %v704_v35, 1  ;;  %v714_v44 = vrot.slane %v712_v42, 1  ;;  %v720_v48 = vshll.u32 %v5346_v45, 16  ;;  %v5349_v63 = vld [vmem:[%s5476_s27 + $0x38] sm:$0xff]   ;;  %v5350_v6 = vld [vmem:[%s5476_s27 + $0x40] sm:$0xff]   ;;  %v5353_v20 = vld [vmem:[%s5471_s24 + $0x8] sm:$0xff]  }
  0x1e   : > { %4674 = vmatmul.mubr.msk.bf16.gmra.mrb[4].mxu1 %vm303_vm2, %v5327_v8  ;;  %4639 = vmatprep.mubr.msk.bf16.mxu0 %vm5415_vm1, %v7440_v2  ;;  %v702_v37 = vor.u32 %v700_v34, %v698_v29  ;;  %v724_v53 = vshrl.u32 %v5346_v45, 16  ;;  %v730_v56 = vrot.slane %v728_v54, 1  ;;  %v736_v60 = vshll.u32 %v5348_v57, 16  ;;  %v5354_v28 = vld [vmem:[%s5471_s24 + $0x10] sm:$0xff]   ;;  %v5356_v42 = vld [vmem:[%s5471_s24 + $0x20] sm:$0xff]  }
  0x1f   : > { %4677 = vmatprep.mubr.msk.bf16.mxu1 %vm5415_vm1, %v7440_v2  ;;  %v5586_v33 = vsel %vm687_vm3, %v694_v31, %v698_v29  ;;  %v710_v43 = vor.u32 %v708_v41, %v706_v38  ;;  %v718_v49 = vor.u32 %v716_v47, %v714_v44  ;;  %v722_v50 = vrot.slane %v720_v48, 1  ;;  %v4257_v29 = vld [vmem:[%s7435_s2 + $0xc] sm:$0xf]  ;;  %v5358_v54 = vld [vmem:[%s5471_s24 + $0x30] sm:$0xff]  }
  0x20   : > { %v5601_v40 = vsel %vm687_vm3, %v702_v37, %v706_v38  ;;  %v734_v61 = vor.u32 %v732_v59, %v730_v56  ;;  %v738_v62 = vrot.slane %v736_v60, 1  ;;  %v740_v1 = vshrl.u32 %v5348_v57, 16  ;;  %v5357_v48 = vld [vmem:[%s5471_s24 + $0x28] sm:$0xff]   ;;  %v5359_v60 = vld [vmem:[%s5471_s24 + $0x38] sm:$0xff]  }
  0x21   : > { %v5613_v46 = vsel %vm687_vm3, %v710_v43, %v714_v44  ;;  %v5625_v52 = vsel %vm687_vm3, %v718_v49, %v722_v50  ;;  %v726_v55 = vor.u32 %v724_v53, %v722_v50  ;;  %v744_v3 = vshll.u32 %v5349_v63, 16 }
  0x22   : > { %v5649_v0 = vsel %vm687_vm3, %v734_v61, %v738_v62  ;;  %v742_v4 = vor.u32 %v740_v1, %v738_v62  ;;  %v748_v8 = vshrl.u32 %v5349_v63, 16  ;;  %v1595_v31 = vsel %vm331_vm0, %v4257_v29, 0 }
  0x23   : > { %v5637_v58 = vsel %vm687_vm3, %v726_v55, %v730_v56  ;;  %v1208_v32 = vshrl.u32 %v5353_v20, 16  ;;  %v1216_v37 = vshrl.u32 %v5354_v28, 16  ;;  %v1228_v45 = vshll.u32 %v5356_v42, 16 }
  0x24   : > { %v1232_v50 = vshrl.u32 %v5356_v42, 16  ;;  %v1236_v51 = vshll.u32 %v5357_v48, 16  ;;  %v1240_v56 = vshrl.u32 %v5357_v48, 16  ;;  %v1244_v57 = vshll.u32 %v5358_v54, 16 }
  0x25   : > { %4640 = vmatmul.mubr.msk.bf16.gmra.mrb[8].mxu0 %vm303_vm2, %v5503_v9  ;;  %v1230_v47 = vrot.slane %v1228_v45, 1  ;;  %v1248_v62 = vshrl.u32 %v5358_v54, 16  ;;  %v1252_v63 = vshll.u32 %v5359_v60, 16 }
  0x26   : > { %4678 = vmatmul.mubr.msk.bf16.gmra.mrb[8].mxu1 %vm303_vm2, %v5329_v10  ;;  %4643 = vmatprep.mubr.msk.bf16.mxu0 %vm5415_vm1, %v7440_v2  ;;  %v1238_v53 = vrot.slane %v1236_v51, 1  ;;  %v1246_v59 = vrot.slane %v1244_v57, 1 }
  0x27   : > { %4681 = vmatprep.mubr.msk.bf16.mxu1 %vm5415_vm1, %v7440_v2  ;;  %v1254_v1 = vrot.slane %v1252_v63, 1 }
  0x2d   : > { %4644 = vmatmul.mubr.msk.bf16.gmra.mrb[12].mxu0 %vm303_vm2, %v5514_v11 }
  0x2e   : > { %4682 = vmatmul.mubr.msk.bf16.gmra.mrb[12].mxu1 %vm303_vm2, %v5331_v12  ;;  %4647 = vmatprep.mubr.msk.bf16.mxu0 %vm5415_vm1, %v7440_v2  ;;  %v5351_v12 = vld [vmem:[%s5476_s27 + $0x48] ss:$0 sps:$4 sm:$0x11]  }
  0x2f   : > { %4685 = vmatprep.mubr.msk.bf16.mxu1 %vm5415_vm1, %v7440_v2 }
  0x35   : > { %4648 = vmatmul.mubr.msk.bf16.gmra.mrb[16].mxu0 %vm303_vm2, %v5525_v13 }
  0x36   : > { %4686 = vmatmul.mubr.msk.bf16.gmra.mrb[16].mxu1 %vm303_vm2, %v5333_v14  ;;  %4651 = vmatprep.mubr.msk.bf16.mxu0 %vm5415_vm1, %v7440_v2  ;;  %v756_v14 = vshrl.u32 %v5350_v6, 16 }
  0x37   : > { %4689 = vmatprep.mubr.msk.bf16.mxu1 %vm5415_vm1, %v7440_v2 }
  0x3d   : > { %4652 = vmatmul.mubr.msk.bf16.gmra.mrb[20].mxu0 %vm303_vm2, %v5536_v15 }
  0x3e   : > { %4690 = vmatmul.mubr.msk.bf16.gmra.mrb[20].mxu1 %vm303_vm2, %v5335_v16  ;;  %4655 = vmatprep.mubr.msk.bf16.mxu0 %vm5415_vm1, %v7440_v2  ;;  %v5352_v16 = vld [vmem:[%s5471_s24] sm:$0xff]  }
  0x3f   : > { %4693 = vmatprep.mubr.msk.bf16.mxu1 %vm5415_vm1, %v7440_v2  ;;  %v1197_v23 = vshrl.u32 %v5352_v16, 16 }
  0x45   : > { %4656 = vmatmul.mubr.msk.bf16.gmra.mrb[24].mxu0 %vm303_vm2, %v5547_v17 }
  0x46   : > { %4694 = vmatmul.mubr.msk.bf16.gmra.mrb[24].mxu1 %vm303_vm2, %v5337_v18  ;;  %4659 = vmatprep.mubr.msk.bf16.mxu0 %vm5415_vm1, %v7440_v2 }
  0x47   : > { %4697 = vmatprep.mubr.msk.bf16.mxu1 %vm5415_vm1, %v7440_v2 }
  0x4d   : > { %4660 = vmatmul.mubr.msk.bf16.gmra.mrb[28].mxu0 %vm303_vm2, %v5558_v19 }
  0x4e   : > { %4698 = vmatmul.mubr.msk.bf16.gmra.mrb[28].mxu1 %vm303_vm2, %v5339_v21  ;;  %4663 = vmatprep.mubr.msk.bf16.mxu0 %vm5415_vm1, %v7440_v2  ;;  %v1199_v21 = vshll.u32 %v5352_v16, 16 }
  0x4f   : > { %4701 = vmatprep.mubr.msk.bf16.mxu1 %vm5415_vm1, %v7440_v2 }
  0x50   : > { %v1201_v25 = vrot.slane %v1199_v21, 1 }
  0x55   : > { %4664 = vmatmul.mubr.msk.bf16.gmra.mrb[32].mxu0 %vm303_vm2, %v5571_v24 }
  0x56   : > { %4702 = vmatmul.mubr.msk.bf16.gmra.mrb[32].mxu1 %vm303_vm2, %v5341_v26  ;;  %4707 = vmatprep.mubr.msk.bf16.mxu0 %vm5415_vm1, %v7440_v2  ;;  %v1204_v26 = vshll.u32 %v5353_v20, 16  ;;  %v5783_v20 = vld [vmem:[%s5476_s27 + $0xc] sm:$0xff]  }
  0x57   : > { %4745 = vmatprep.mubr.msk.bf16.mxu1 %vm5415_vm1, %v7440_v2  ;;  %v1503_v45 = vshrl.u32 %v5783_v20, 16 }
  0x58   : > { %v1206_v27 = vrot.slane %v1204_v26, 1  ;;  %v5788_v26 = vld [vmem:[%s5471_s24 + $0xc] sm:$0xff]  }
  0x5a   : > { %v1210_v34 = vor.u32 %v1208_v32, %v1206_v27  ;;  %v1795_v32 = vshll.u32 %v5788_v26, 16 }
  0x5d   : > { %4708 = vmatmul.mubr.msk.bf16.vlgmr.msra.gmra.mrb[36].mxu0 %vm303_vm2, %v5586_v33 }
  0x5e   : > { %4746 = vmatmul.mubr.msk.bf16.vlgmr.msra.gmra.mrb[36].mxu1 %vm303_vm2, %v5479_v5  ;;  %4782 = vmatpush3.bf16.msra.mxu0 %v1004_v36  ;;  %v746_v5 = vrot.slane %v744_v3, 1  ;;  %v5360_v3 = vld [vmem:[%s5471_s24 + $0x40] sm:$0xff]  }
  0x5f   : > { %4820 = vmatpush3.bf16.msra.mxu1 %v1004_v36  ;;  %4711 = vmatprep.mubr.msk.bf16.mxu0 %vm5415_vm1, %v7440_v2  ;;  %v5355_v36 = vld [vmem:[%s5471_s24 + $0x18] sm:$0xff]   ;;  %v1264_v16 = vshrl.u32 %v5360_v3, 16 }
  0x60   : > { %4749 = vmatprep.mubr.msk.bf16.mxu1 %vm5415_vm1, %v7440_v2  ;;  %4857 = vmatprep.subr.bf16.mxu0 %v7440_v2  ;;  %v750_v10 = vor.u32 %v748_v8, %v746_v5  ;;  %v1220_v38 = vshll.u32 %v5355_v36, 16  ;;  %v1224_v44 = vshrl.u32 %v5355_v36, 16 }
  0x61   : > { %4895 = vmatprep.subr.bf16.mxu1 %v7440_v2 }
  0x62   : > { %v1222_v41 = vrot.slane %v1220_v38, 1 }
  0x65   : > { %4712 = vmatmul.mubr.msk.bf16.gmra.mrb[40].mxu0 %vm303_vm2, %v5601_v40 }
  0x66   : > { %4750 = vmatmul.mubr.msk.bf16.gmra.mrb[40].mxu1 %vm303_vm2, %v5491_v7  ;;  %4715 = vmatprep.mubr.msk.bf16.mxu0 %vm5415_vm1, %v7440_v2  ;;  %v5661_v7 = vsel %vm687_vm3, %v742_v4, %v746_v5  ;;  %v1256_v5 = vshrl.u32 %v5359_v60, 16 }
  0x67   : > { %4753 = vmatprep.mubr.msk.bf16.mxu1 %vm5415_vm1, %v7440_v2 }
  0x68   : > { %v1258_v8 = vor.u32 %v1256_v5, %v1254_v1 }
  0x6d   : > { %4716 = vmatmul.mubr.msk.bf16.gmra.mrb[44].mxu0 %vm303_vm2, %v5613_v46 }
  0x6e   : > { %4754 = vmatmul.mubr.msk.bf16.gmra.mrb[44].mxu1 %vm303_vm2, %v5503_v9  ;;  %4719 = vmatprep.mubr.msk.bf16.mxu0 %vm5415_vm1, %v7440_v2  ;;  %v752_v9 = vshll.u32 %v5350_v6, 16  ;;  %v1260_v6 = vshll.u32 %v5360_v3, 16 }
  0x6f   : > { %4757 = vmatprep.mubr.msk.bf16.mxu1 %vm5415_vm1, %v7440_v2 }
  0x75   : > { %4720 = vmatmul.mubr.msk.bf16.gmra.mrb[48].mxu0 %vm303_vm2, %v5625_v52 }
  0x76   : > { %4758 = vmatmul.mubr.msk.bf16.gmra.mrb[48].mxu1 %vm303_vm2, %v5514_v11  ;;  %4723 = vmatprep.mubr.msk.bf16.mxu0 %vm5415_vm1, %v7440_v2  ;;  %v754_v11 = vrot.slane %v752_v9, 1  ;;  %v1262_v9 = vrot.slane %v1260_v6, 1 }
  0x77   : > { %4761 = vmatprep.mubr.msk.bf16.mxu1 %vm5415_vm1, %v7440_v2 }
  0x7d   : > { %4724 = vmatmul.mubr.msk.bf16.gmra.mrb[52].mxu0 %vm303_vm2, %v5637_v58 }
  0x7e   : > { %4762 = vmatmul.mubr.msk.bf16.gmra.mrb[52].mxu1 %vm303_vm2, %v5525_v13  ;;  %4727 = vmatprep.mubr.msk.bf16.mxu0 %vm5415_vm1, %v7440_v2  ;;  %v5673_v13 = vsel %vm687_vm3, %v750_v10, %v754_v11  ;;  %v1424_v10 = vld [vmem:[%s5476_s27 + $0x4] sm:$0xf] }
  0x7f   : > { %4765 = vmatprep.mubr.msk.bf16.mxu1 %vm5415_vm1, %v7440_v2 }
  0x85   : > { %4728 = vmatmul.mubr.msk.bf16.gmra.mrb[56].mxu0 %vm303_vm2, %v5649_v0 }
  0x86   : > { %4766 = vmatmul.mubr.msk.bf16.gmra.mrb[56].mxu1 %vm303_vm2, %v5536_v15  ;;  %4731 = vmatprep.mubr.msk.bf16.mxu0 %vm5415_vm1, %v7440_v2  ;;  %v760_v15 = vshll.u32 %v5351_v12, 16  ;;  %v1720_v12 = vld [vmem:[%s5471_s24 + $0x4] sm:$0xf] }
  0x87   : > { %4769 = vmatprep.mubr.msk.bf16.mxu1 %vm5415_vm1, %v7440_v2 }
  0x88   : > { %v762_v18 = vrot.slane %v760_v15, 1  ;;  %v1263_v15 = vsel %vm687_vm3, %v1258_v8, %v1262_v9 }
  0x8d   : > { %4732 = vmatmul.mubr.msk.bf16.gmra.mrb[60].mxu0 %vm303_vm2, %v5661_v7 }
  0x8e   : > { %4770 = vmatmul.mubr.msk.bf16.gmra.mrb[60].mxu1 %vm303_vm2, %v5547_v17  ;;  %4735 = vmatprep.mubr.msk.bf16.mxu0 %vm5415_vm1, %v7440_v2  ;;  %v758_v17 = vor.u32 %v756_v14, %v754_v11  ;;  %v5768_v11 = vld [vmem:[%s5476_s27 + $0x8] sm:$0xf] }
  0x8f   : > { %4773 = vmatprep.mubr.msk.bf16.mxu1 %vm5415_vm1, %v7440_v2  ;;  %v5772_v14 = vld [vmem:[%s5471_s24 + $0x8] sm:$0xf] }
  0x90   : > { %v5686_v22 = vsel %vm687_vm3, %v758_v17, %v762_v18  ;;  %v4277_v18 = vcombine.low %v1720_v12, %v5772_v14 }
  0x95   : > { %4736 = vmatmul.mubr.msk.bf16.gmra.mrb[64].mxu0 %vm303_vm2, %v5673_v13 }
  0x96   : > { %4774 = vmatmul.mubr.msk.bf16.gmra.mrb[64].mxu1 %vm303_vm2, %v5558_v19  ;;  %4739 = vmatprep.mubr.msk.bf16.mxu0 %vm5415_vm1, %v7440_v2  ;;  %v1202_v19 = vor.u32 %v1201_v25, %v1197_v23  ;;  %v1266_v23 = vor.u32 %v1264_v16, %v1262_v9 }
  0x97   : > { %4777 = vmatprep.mubr.msk.bf16.mxu1 %vm5415_vm1, %v7440_v2 }
  0x98   : > { %v1207_v30 = vsel %vm687_vm3, %v1202_v19, %v1206_v27  ;;  %v1790_v19 = vshll.u32 %v4277_v18, 16 }
  0x9d   : > { %4740 = vmatmul.mubr.msk.bf16.gmra.mrb[68].mxu0 %vm303_vm2, %v5686_v22 }
  0x9e   : > { %4778 = vmatmul.mubr.msk.bf16.gmra.mrb[68].mxu1 %vm303_vm2, %v5571_v24  ;;  %4783 = vmatprep.mubr.msk.bf16.mxu0 %vm5415_vm1, %v7440_v2  ;;  %v1212_v24 = vshll.u32 %v5354_v28, 16  ;;  %v1499_v28 = vshll.u32 %v5783_v20, 16 }
  0x9f   : > { %4821 = vmatprep.mubr.msk.bf16.mxu1 %vm5415_vm1, %v7440_v2 }
  0xa0   : > { %v1214_v35 = vrot.slane %v1212_v24, 1 }
  0xa2   : > { %v1218_v39 = vor.u32 %v1216_v37, %v1214_v35  ;;  %v5804_v37 = vld [vmem:[%s5471_s24 + $0x14] sm:$0xff]  }
  0xa3   : > { %v1807_v12 = vshrl.u32 %v5804_v37, 16 }
  0xa4   : > { %v1223_v43 = vsel %vm687_vm3, %v1218_v39, %v1222_v41 }
  0xa5   : > { %4784 = vmatmul.mubr.msk.bf16.vlgmr.msra.gmra.mrb[72].mxu0 %vm303_vm2, %v5586_v33  ;;  %v1215_v33 = vsel %vm687_vm3, %v1210_v34, %v1214_v35  ;;  %v1501_v34 = vrot.slane %v1499_v28, 1  ;;  %v5799_v35 = vld [vmem:[%s5476_s27 + $0x14] sm:$0xff]  }
  0xa6   : > { %4822 = vmatmul.mubr.msk.bf16.vlgmr.msra.gmra.mrb[72].mxu1 %vm303_vm2, %v1207_v30  ;;  %4858 = vmatpush3.bf16.msra.mxu0 %v1595_v31  ;;  %v1788_v30 = vshrl.u32 %v4277_v18, 16  ;;  %v1511_v5 = vshrl.u32 %v5799_v35, 16 }
  0xa7   : > { %4896 = vmatpush3.bf16.msra.mxu1 %v1595_v31  ;;  %4787 = vmatprep.mubr.msk.bf16.mxu0 %vm5415_vm1, %v7440_v2  ;;  %v1792_v31 = vrot.slane %v1790_v19, 1  ;;  %v5860_v19 = vld [vmem:[%s5471_s24 + $0x24] sm:$0xff]  }
  0xa8   : > { %4825 = vmatprep.mubr.msk.bf16.mxu1 %vm5415_vm1, %v7440_v2  ;;  %4933 = vmatprep.subr.bf16.mxu0 %v7440_v2 }
  0xa9   : > { %4971 = vmatprep.subr.bf16.mxu1 %v7440_v2  ;;  %v1793_v36 = vor.u32 %v1792_v31, %v1788_v30 }
  0xad   : > { %4788 = vmatmul.mubr.msk.bf16.gmra.mrb[76].mxu0 %vm303_vm2, %v5601_v40  ;;  %v1226_v40 = vor.u32 %v1224_v44, %v1222_v41 }
  0xae   : > { %4826 = vmatmul.mubr.msk.bf16.gmra.mrb[76].mxu1 %vm303_vm2, %v1215_v33  ;;  %4791 = vmatprep.mubr.msk.bf16.mxu0 %vm5415_vm1, %v7440_v2  ;;  %v1797_v33 = vrot.slane %v1795_v32, 1 }
  0xaf   : > { %4829 = vmatprep.mubr.msk.bf16.mxu1 %vm5415_vm1, %v7440_v2  ;;  %v1231_v49 = vsel %vm687_vm3, %v1226_v40, %v1230_v47  ;;  %v1507_v40 = vshll.u32 %v5799_v35, 16 }
  0xb1   : > { %v1509_v57 = vrot.slane %v1507_v40, 1 }
  0xb5   : > { %4792 = vmatmul.mubr.msk.bf16.gmra.mrb[80].mxu0 %vm303_vm2, %v5613_v46  ;;  %v1234_v46 = vor.u32 %v1232_v50, %v1230_v47  ;;  %v5815_v50 = vsel %vm687_vm3, %v1793_v36, %v1797_v33 }
  0xb6   : > { %4830 = vmatmul.mubr.msk.bf16.gmra.mrb[80].mxu1 %vm303_vm2, %v1223_v43  ;;  %4795 = vmatprep.mubr.msk.bf16.mxu0 %vm5415_vm1, %v7440_v2 }
  0xb7   : > { %4833 = vmatprep.mubr.msk.bf16.mxu1 %vm5415_vm1, %v7440_v2  ;;  %v1239_v55 = vsel %vm687_vm3, %v1234_v46, %v1238_v53  ;;  %v1799_v46 = vshrl.u32 %v5788_v26, 16 }
  0xbd   : > { %4796 = vmatmul.mubr.msk.bf16.gmra.mrb[84].mxu0 %vm303_vm2, %v5625_v52  ;;  %v1242_v52 = vor.u32 %v1240_v56, %v1238_v53  ;;  %v1803_v53 = vshll.u32 %v5804_v37, 16  ;;  %v1505_v56 = vor.u32 %v1503_v45, %v1501_v34  ;;  %v5880_v45 = vld [vmem:[%s5476_s27 + $0x2c] sm:$0xff]  }
  0xbe   : > { %4834 = vmatmul.mubr.msk.bf16.gmra.mrb[84].mxu1 %vm303_vm2, %v1231_v49  ;;  %4799 = vmatprep.mubr.msk.bf16.mxu0 %vm5415_vm1, %v7440_v2 }
  0xbf   : > { %4837 = vmatprep.mubr.msk.bf16.mxu1 %vm5415_vm1, %v7440_v2  ;;  %v1247_v61 = vsel %vm687_vm3, %v1242_v52, %v1246_v59  ;;  %v5826_v52 = vld [vmem:[%s5476_s27 + $0x1c] sm:$0xff]   ;;  %v1805_v60 = vrot.slane %v1803_v53, 1 }
  0xc0   : > { %v1515_v6 = vshll.u32 %v5826_v52, 16  ;;  %v1519_v32 = vshrl.u32 %v5826_v52, 16 }
  0xc2   : > { %v1517_v18 = vrot.slane %v1515_v6, 1 }
  0xc5   : > { %4800 = vmatmul.mubr.msk.bf16.gmra.mrb[88].mxu0 %vm303_vm2, %v5637_v58  ;;  %v1250_v58 = vor.u32 %v1248_v62, %v1246_v59  ;;  %v1801_v59 = vor.u32 %v1799_v46, %v1797_v33 }
  0xc6   : > { %4838 = vmatmul.mubr.msk.bf16.gmra.mrb[88].mxu1 %vm303_vm2, %v1239_v55  ;;  %4803 = vmatprep.mubr.msk.bf16.mxu0 %vm5415_vm1, %v7440_v2 }
  0xc7   : > { %4841 = vmatprep.mubr.msk.bf16.mxu1 %vm5415_vm1, %v7440_v2  ;;  %v1255_v4 = vsel %vm687_vm3, %v1250_v58, %v1254_v1 }
  0xcd   : > { %4804 = vmatmul.mubr.msk.bf16.gmra.mrb[92].mxu0 %vm303_vm2, %v5649_v0  ;;  %v5361_v0 = vld [vmem:[%s5471_s24 + $0x48] ss:$0 sps:$4 sm:$0x11]  }
  0xce   : > { %4842 = vmatmul.mubr.msk.bf16.gmra.mrb[92].mxu1 %vm303_vm2, %v1247_v61  ;;  %4807 = vmatprep.mubr.msk.bf16.mxu0 %vm5415_vm1, %v7440_v2  ;;  %v1268_v17 = vshll.u32 %v5361_v0, 16  ;;  %v5831_v61 = vld [vmem:[%s5471_s24 + $0x1c] sm:$0xff]  }
  0xcf   : > { %4845 = vmatprep.mubr.msk.bf16.mxu1 %vm5415_vm1, %v7440_v2 }
  0xd0   : > { %v1270_v25 = vrot.slane %v1268_v17, 1  ;;  %v1513_v17 = vor.u32 %v1511_v5, %v1509_v57 }
  0xd2   : > { %v1271_v29 = vsel %vm687_vm3, %v1266_v23, %v1270_v25  ;;  %v1809_v23 = vor.u32 %v1807_v12, %v1805_v60  ;;  %v1518_v31 = vsel %vm687_vm3, %v1513_v17, %v1517_v18  ;;  %v5905_v12 = vld [vmem:[%s5476_s27 + $0x34] sm:$0xff]  }
  0xd3   : > { %v5910_v17 = vld [vmem:[%s5471_s24 + $0x34] sm:$0xff]  }
  0xd5   : > { %4808 = vmatmul.mubr.msk.bf16.gmra.mrb[96].mxu0 %vm303_vm2, %v5661_v7  ;;  %v4258_v7 = vcombine.low %v1424_v10, %v5768_v11  ;;  %v5843_v10 = vsel %vm687_vm3, %v1801_v59, %v1805_v60  ;;  %v1531_v60 = vshll.u32 %v5880_v45, 16 }
  0xd6   : > { %4846 = vmatmul.mubr.msk.bf16.gmra.mrb[96].mxu1 %vm303_vm2, %v1255_v4  ;;  %4811 = vmatprep.mubr.msk.bf16.mxu0 %vm5415_vm1, %v7440_v2  ;;  %v1510_v4 = vsel %vm687_vm3, %v1505_v56, %v1509_v57 }
  0xd7   : > { %4849 = vmatprep.mubr.msk.bf16.mxu1 %vm5415_vm1, %v7440_v2  ;;  %v1494_v21 = vshll.u32 %v4258_v7, 16  ;;  %v1492_v27 = vshrl.u32 %v4258_v7, 16  ;;  %v1811_v7 = vshll.u32 %v5831_v61, 16 }
  0xd9   : > { %v1813_v25 = vrot.slane %v1811_v7, 1 }
  0xdd   : > { %4812 = vmatmul.mubr.msk.bf16.gmra.mrb[100].mxu0 %vm303_vm2, %v5673_v13  ;;  %v1496_v13 = vrot.slane %v1494_v21, 1  ;;  %v5855_v21 = vld [vmem:[%s5476_s27 + $0x24] sm:$0xff]  }
  0xde   : > { %4850 = vmatmul.mubr.msk.bf16.gmra.mrb[100].mxu1 %vm303_vm2, %v1263_v15  ;;  %4815 = vmatprep.mubr.msk.bf16.mxu0 %vm5415_vm1, %v7440_v2  ;;  %v1527_v59 = vshrl.u32 %v5855_v21, 16 }
  0xdf   : > { %4853 = vmatprep.mubr.msk.bf16.mxu1 %vm5415_vm1, %v7440_v2  ;;  %v1497_v24 = vor.u32 %v1496_v13, %v1492_v27 }
  0xe1   : > { %v1502_v44 = vsel %vm687_vm3, %v1497_v24, %v1501_v34  ;;  %v1523_v24 = vshll.u32 %v5855_v21, 16 }
  0xe5   : > { %4816 = vmatmul.mubr.msk.bf16.gmra.mrb[104].mxu0 %vm303_vm2, %v5686_v22  ;;  %v4296_v22 = vld [vmem:[%s7435_s2 + $0x10] sm:$0xf] }
  0xe6   : > { %4854 = vmatmul.mubr.msk.bf16.gmra.mrb[104].mxu1 %vm303_vm2, %v1271_v29  ;;  %4859 = vmatprep.mubr.msk.bf16.mxu0 %vm5415_vm1, %v7440_v2  ;;  %v2016_v51 = vsel %vm331_vm0, %v4296_v22, 0  ;;  %v1815_v22 = vshrl.u32 %v5831_v61, 16 }
  0xe7   : > { %4897 = vmatprep.mubr.msk.bf16.mxu1 %vm5415_vm1, %v7440_v2 }
  0xe8   : > { %v369_v38 = vpop.f32.mrb[0].mxu0  ;;  %v1817_v40 = vor.u32 %v1815_v22, %v1813_v25  ;;  %v1835_v22 = vshll.u32 %v5910_v17, 16 }
  0xe9   : > { %v549_v39 = vpop.f32.mrb[0].mxu1  ;;  %v4633_v41 = vpop.f32.mrb[1].mxu0 }
  0xea   : > { %v4671_v42 = vpop.f32.mrb[1].mxu1  ;;  %v372_v43 = vpop.f32.mrb[2].mxu0  ;;  %v5812_v47 = vadd.f32 %v549_v39, %v369_v38  ;;  %v5868_v38 = vsel %vm687_vm3, %v1809_v23, %v1813_v25  ;;  %v1819_v39 = vshll.u32 %v5860_v19, 16 }
  0xeb   : > { %v552_v48 = vpop.f32.mrb[2].mxu1  ;;  %v4634_v49 = vpop.f32.mrb[3].mxu0 }
  0xec   : > { %v4672_v54 = vpop.f32.mrb[3].mxu1  ;;  %v5820_v55 = vadd.f32 %v552_v48, %v372_v43  ;;  %v1521_v43 = vor.u32 %v1519_v32, %v1517_v18  ;;  %v1821_v48 = vrot.slane %v1819_v39, 1  ;;  %v5885_v49 = vld [vmem:[%s5471_s24 + $0x2c] sm:$0xff]  }
  0xed   : > { %4860 = vmatmul.mubr.msk.bf16.vlgmr.msra.gmra.mrb[108].mxu0 %vm303_vm2, %v1502_v44  ;;  %v1525_v44 = vrot.slane %v1523_v24, 1 }
  0xee   : > { %4898 = vmatmul.mubr.msk.bf16.vlgmr.msra.gmra.mrb[108].mxu1 %vm303_vm2, %v5815_v50  ;;  %4934 = vmatpush3.bf16.msra.mxu0 %v2016_v51 }
  0xef   : > { %4972 = vmatpush3.bf16.msra.mxu1 %v2016_v51  ;;  %4863 = vmatprep.mubr.msk.bf16.mxu0 %vm5415_vm1, %v7440_v2  ;;  %v1526_v57 = vsel %vm687_vm3, %v1521_v43, %v1525_v44 }
  0xf0   : > { %v377_v62 = vpop.f32.mrb[4].mxu0  ;;  %4901 = vmatprep.mubr.msk.bf16.mxu1 %vm5415_vm1, %v7440_v2  ;;  %5009 = vmatprep.subr.bf16.mxu0 %v7440_v2 }
  0xf1   : > { %v557_v63 = vpop.f32.mrb[4].mxu1  ;;  %v4637_v58 = vpop.f32.mrb[5].mxu0  ;;  %5047 = vmatprep.subr.bf16.mxu1 %v7440_v2 }
  0xf2   : > { %v4675_v1 = vpop.f32.mrb[5].mxu1  ;;  %v380_v3 = vpop.f32.mrb[6].mxu0  ;;  %v5840_v0 = vadd.f32 %v557_v63, %v377_v62 }
  0xf3   : > { %v560_v8 = vpop.f32.mrb[6].mxu1  ;;  %v4638_v9 = vpop.f32.mrb[7].mxu0  ;;  %v5893_v1 = vsel %vm687_vm3, %v1817_v40, %v1821_v48  ;;  %v5930_v40 = vld [vmem:[%s5476_s27 + $0x3c] sm:$0xff]  }
  0xf4   : > { %v4676_v15 = vpop.f32.mrb[7].mxu1  ;;  %v5847_v16 = vadd.f32 %v560_v8, %v380_v3  ;;  %v1823_v3 = vshrl.u32 %v5860_v19, 16  ;;  %v1529_v8 = vor.u32 %v1527_v59, %v1525_v44  ;;  %v1533_v9 = vrot.slane %v1531_v60, 1 }
  0xf5   : > { %4864 = vmatmul.mubr.msk.bf16.gmra.mrb[112].mxu0 %vm303_vm2, %v1510_v4  ;;  %v1827_v4 = vshll.u32 %v5885_v49, 16 }
  0xf6   : > { %4902 = vmatmul.mubr.msk.bf16.gmra.mrb[112].mxu1 %vm303_vm2, %v5843_v10  ;;  %4867 = vmatprep.mubr.msk.bf16.mxu0 %vm5415_vm1, %v7440_v2  ;;  %v1825_v7 = vor.u32 %v1823_v3, %v1821_v48 }
  0xf7   : > { %4905 = vmatprep.mubr.msk.bf16.mxu1 %vm5415_vm1, %v7440_v2  ;;  %v1829_v15 = vrot.slane %v1827_v4, 1 }
  0xf8   : > { %v385_v27 = vpop.f32.mrb[8].mxu0 }
  0xf9   : > { %v565_v13 = vpop.f32.mrb[8].mxu1  ;;  %v4641_v28 = vpop.f32.mrb[9].mxu0 }
  0xfa   : > { %v4679_v29 = vpop.f32.mrb[9].mxu1  ;;  %v388_v30 = vpop.f32.mrb[10].mxu0  ;;  %v5865_v34 = vadd.f32 %v565_v13, %v385_v27  ;;  %v1534_v28 = vsel %vm687_vm3, %v1529_v8, %v1533_v9 }
  0xfb   : > { %v568_v36 = vpop.f32.mrb[10].mxu1  ;;  %v4642_v33 = vpop.f32.mrb[11].mxu0  ;;  %v1535_v29 = vshrl.u32 %v5880_v45, 16 }
  0xfc   : > { %v4680_v41 = vpop.f32.mrb[11].mxu1  ;;  %v5872_v42 = vadd.f32 %v568_v36, %v388_v30  ;;  %v1539_v30 = vshll.u32 %v5905_v12, 16  ;;  %v5918_v36 = vsel %vm687_vm3, %v1825_v7, %v1829_v15  ;;  %v1831_v33 = vshrl.u32 %v5885_v49, 16 }
  0xfd   : > { %4868 = vmatmul.mubr.msk.bf16.gmra.mrb[116].mxu0 %vm303_vm2, %v1518_v31  ;;  %v1537_v43 = vor.u32 %v1535_v29, %v1533_v9  ;;  %v1839_v9 = vshrl.u32 %v5910_v17, 16  ;;  %v5960_v29 = vld [vmem:[%s5471_s24 + $0x44] sm:$0xff]  }
  0xfe   : > { %4906 = vmatmul.mubr.msk.bf16.gmra.mrb[116].mxu1 %vm303_vm2, %v5868_v38  ;;  %4871 = vmatprep.mubr.msk.bf16.mxu0 %vm5415_vm1, %v7440_v2  ;;  %v1541_v44 = vrot.slane %v1539_v30, 1  ;;  %v1833_v48 = vor.u32 %v1831_v33, %v1829_v15 }
  0xff   : > { %4909 = vmatprep.mubr.msk.bf16.mxu1 %vm5415_vm1, %v7440_v2 }
 0x100   : > { %v393_v51 = vpop.f32.mrb[12].mxu0  ;;  %v1542_v60 = vsel %vm687_vm3, %v1537_v43, %v1541_v44  ;;  %v1551_v43 = vshrl.u32 %v5930_v40, 16 }
 0x101   : > { %v573_v46 = vpop.f32.mrb[12].mxu1  ;;  %v4645_v53 = vpop.f32.mrb[13].mxu0 }
 0x102   : > { %v4683_v54 = vpop.f32.mrb[13].mxu1  ;;  %v396_v56 = vpop.f32.mrb[14].mxu0  ;;  %v5890_v62 = vadd.f32 %v573_v46, %v393_v51  ;;  %v1837_v51 = vrot.slane %v1835_v22, 1  ;;  %v5935_v46 = vld [vmem:[%s5471_s24 + $0x3c] sm:$0xff]  }
 0x103   : > { %v576_v63 = vpop.f32.mrb[14].mxu1  ;;  %v4646_v58 = vpop.f32.mrb[15].mxu0  ;;  %v1843_v7 = vshll.u32 %v5935_v46, 16 }
 0x104   : > { %v4684_v5 = vpop.f32.mrb[15].mxu1  ;;  %v5897_v6 = vadd.f32 %v576_v63, %v396_v56  ;;  %v1543_v63 = vshrl.u32 %v5905_v12, 16  ;;  %v1547_v58 = vshll.u32 %v5930_v40, 16  ;;  %v5943_v8 = vsel %vm687_vm3, %v1833_v48, %v1837_v51 }
 0x105   : > { %4872 = vmatmul.mubr.msk.bf16.gmra.mrb[120].mxu0 %vm303_vm2, %v1526_v57 }
 0x106   : > { %4910 = vmatmul.mubr.msk.bf16.gmra.mrb[120].mxu1 %vm303_vm2, %v5893_v1  ;;  %4875 = vmatprep.mubr.msk.bf16.mxu0 %vm5415_vm1, %v7440_v2 }
 0x107   : > { %4913 = vmatprep.mubr.msk.bf16.mxu1 %vm5415_vm1, %v7440_v2 }
 0x108   : > { %v401_v18 = vpop.f32.mrb[16].mxu0 }
 0x109   : > { %v581_v23 = vpop.f32.mrb[16].mxu1  ;;  %v4649_v25 = vpop.f32.mrb[17].mxu0 }
 0x10a   : > { %v4687_v27 = vpop.f32.mrb[17].mxu1  ;;  %v404_v13 = vpop.f32.mrb[18].mxu0  ;;  %v5915_v31 = vadd.f32 %v581_v23, %v401_v18  ;;  %v1545_v23 = vor.u32 %v1543_v63, %v1541_v44  ;;  %v1549_v25 = vrot.slane %v1547_v58, 1 }
 0x10b   : > { %v584_v32 = vpop.f32.mrb[18].mxu1  ;;  %v4650_v24 = vpop.f32.mrb[19].mxu0  ;;  %v5955_v27 = vld [vmem:[%s5476_s27 + $0x44] sm:$0xff]  }
 0x10c   : > { %v4688_v39 = vpop.f32.mrb[19].mxu1  ;;  %v5922_v41 = vadd.f32 %v584_v32, %v404_v13  ;;  %v1841_v13 = vor.u32 %v1839_v9, %v1837_v51  ;;  %v1555_v44 = vshll.u32 %v5955_v27, 16  ;;  %v1553_v63 = vor.u32 %v1551_v43, %v1549_v25 }
 0x10d   : > { %4876 = vmatmul.mubr.msk.bf16.gmra.mrb[124].mxu0 %vm303_vm2, %v1534_v28  ;;  %v1845_v28 = vrot.slane %v1843_v7, 1  ;;  %v1550_v39 = vsel %vm687_vm3, %v1545_v23, %v1549_v25  ;;  %v5985_v7 = vld [vmem:[%s5471_s24 + $0x4c] ss:$0 sps:$4 sm:$0x11]  }
 0x10e   : > { %4914 = vmatmul.mubr.msk.bf16.gmra.mrb[124].mxu1 %vm303_vm2, %v5918_v36  ;;  %4879 = vmatprep.mubr.msk.bf16.mxu0 %vm5415_vm1, %v7440_v2  ;;  %v1557_v58 = vrot.slane %v1555_v44, 1  ;;  %7455 = vst [vmem:[#allocation2_spill] sm:$0xff] %v5985_v7  ;;  %v1855_v44 = vshrl.u32 %v5960_v29, 16 }
 0x10f   : > { %4917 = vmatprep.mubr.msk.bf16.mxu1 %vm5415_vm1, %v7440_v2 }
 0x110   : > { %v409_v53 = vpop.f32.mrb[20].mxu0 }
 0x111   : > { %v589_v54 = vpop.f32.mrb[20].mxu1  ;;  %v4653_v56 = vpop.f32.mrb[21].mxu0 }
 0x112   : > { %v4691_v57 = vpop.f32.mrb[21].mxu1  ;;  %v412_v59 = vpop.f32.mrb[22].mxu0  ;;  %v5940_v3 = vadd.f32 %v589_v54, %v409_v53  ;;  %v5968_v54 = vsel %vm687_vm3, %v1841_v13, %v1845_v28  ;;  %v1847_v56 = vshrl.u32 %v5935_v46, 16 }
 0x113   : > { %v592_v4 = vpop.f32.mrb[22].mxu1  ;;  %v4654_v5 = vpop.f32.mrb[23].mxu0  ;;  %v1851_v57 = vshll.u32 %v5960_v29, 16 }
 0x114   : > { %v4692_v15 = vpop.f32.mrb[23].mxu1  ;;  %v5947_v18 = vadd.f32 %v592_v4, %v412_v59  ;;  %v5980_v4 = vld [vmem:[%s5476_s27 + $0x4c] ss:$0 sps:$4 sm:$0x11]   ;;  %v1849_v5 = vor.u32 %v1847_v56, %v1845_v28 }
 0x115   : > { %4880 = vmatmul.mubr.msk.bf16.gmra.mrb[128].mxu0 %vm303_vm2, %v1542_v60  ;;  %v1853_v9 = vrot.slane %v1851_v57, 1  ;;  %v1563_v25 = vshll.u32 %v5980_v4, 16 }
 0x116   : > { %4918 = vmatmul.mubr.msk.bf16.gmra.mrb[128].mxu1 %vm303_vm2, %v5943_v8  ;;  %4883 = vmatprep.mubr.msk.bf16.mxu0 %vm5415_vm1, %v7440_v2 }
 0x117   : > { %4921 = vmatprep.mubr.msk.bf16.mxu1 %vm5415_vm1, %v7440_v2  ;;  %v5993_v28 = vsel %vm687_vm3, %v1849_v5, %v1853_v9 }
 0x118   : > { %v417_v30 = vpop.f32.mrb[24].mxu0 }
 0x119   : > { %v597_v32 = vpop.f32.mrb[24].mxu1  ;;  %v4657_v24 = vpop.f32.mrb[25].mxu0 }
 0x11a   : > { %v4695_v33 = vpop.f32.mrb[25].mxu1  ;;  %v420_v22 = vpop.f32.mrb[26].mxu0  ;;  %v5965_v48 = vadd.f32 %v597_v32, %v417_v30  ;;  %v1558_v24 = vsel %vm687_vm3, %v1553_v63, %v1557_v58  ;;  %v1857_v63 = vor.u32 %v1855_v44, %v1853_v9  ;;  %v2147_v44 = vrot.slane %v5783_v20, 1 }
 0x11b   : > { %v600_v53 = vpop.f32.mrb[26].mxu1  ;;  %v4658_v51 = vpop.f32.mrb[27].mxu0  ;;  %v1559_v33 = vshrl.u32 %v5955_v27, 16 }
 0x11c   : > { %v4696_v59 = vpop.f32.mrb[27].mxu1  ;;  %v5972_v60 = vadd.f32 %v600_v53, %v420_v22  ;;  %v1859_v53 = vshll.u32 %v5985_v7, 16 }
 0x11d   : > { %4884 = vmatmul.mubr.msk.bf16.gmra.mrb[132].mxu0 %vm303_vm2, %v1550_v39  ;;  %v1561_v57 = vor.u32 %v1559_v33, %v1557_v58  ;;  %v1565_v59 = vrot.slane %v1563_v25, 1 }
 0x11e   : > { %4922 = vmatmul.mubr.msk.bf16.gmra.mrb[132].mxu1 %vm303_vm2, %v5968_v54  ;;  %4887 = vmatprep.mubr.msk.bf16.mxu0 %vm5415_vm1, %v7440_v2  ;;  %v1861_v5 = vrot.slane %v1859_v53, 1 }
 0x11f   : > { %4925 = vmatprep.mubr.msk.bf16.mxu1 %vm5415_vm1, %v7440_v2 }
 0x120   : > { %v425_v15 = vpop.f32.mrb[28].mxu0  ;;  %v6011_v58 = vsel %vm687_vm3, %v1857_v63, %v1861_v5 }
 0x121   : > { %v605_v23 = vpop.f32.mrb[28].mxu1  ;;  %v4661_v13 = vpop.f32.mrb[29].mxu0 }
 0x122   : > { %v4699_v30 = vpop.f32.mrb[29].mxu1  ;;  %v428_v32 = vpop.f32.mrb[30].mxu0  ;;  %v5990_v22 = vadd.f32 %v605_v23, %v425_v15  ;;  %v2141_v23 = vld [vmem:[%s5476_s27 + $0x4] sm:$0xe] }
 0x123   : > { %v608_v39 = vpop.f32.mrb[30].mxu1  ;;  %v4662_v43 = vpop.f32.mrb[31].mxu0  ;;  %v4306_v33 = vcombine.low %v2141_v23, %v5768_v11  ;;  %v4316_v11 = vld [vmem:[%s7435_s2 + $0x14] sm:$0xf] }
 0x124   : > { %v4700_v51 = vpop.f32.mrb[31].mxu1  ;;  %v5997_v56 = vadd.f32 %v608_v39, %v428_v32 }
 0x125   : > { %4888 = vmatmul.mubr.msk.bf16.gmra.mrb[136].mxu0 %vm303_vm2, %v1558_v24  ;;  %v1566_v24 = vsel %vm687_vm3, %v1561_v57, %v1565_v59 }
 0x126   : > { %4926 = vmatmul.mubr.msk.bf16.gmra.mrb[136].mxu1 %vm303_vm2, %v5993_v28  ;;  %4891 = vmatprep.mubr.msk.bf16.mxu0 %vm5415_vm1, %v7440_v2 }
 0x127   : > { %4929 = vmatprep.mubr.msk.bf16.mxu1 %vm5415_vm1, %v7440_v2 }
 0x128   : > { %v433_v15 = vpop.f32.mrb[32].mxu0 }
 0x129   : > { %v613_v13 = vpop.f32.mrb[32].mxu1  ;;  %v4665_v30 = vpop.f32.mrb[33].mxu0 }
 0x12a   : > { %v4703_v32 = vpop.f32.mrb[33].mxu1  ;;  %v436_v39 = vpop.f32.mrb[34].mxu0  ;;  %v6008_v43 = vadd.f32 %v613_v13, %v433_v15 }
 0x12b   : > { %v616_v51 = vpop.f32.mrb[34].mxu1  ;;  %v4666_v7 = vpop.f32.mrb[35].mxu0  ;;  %v2318_v32 = vsel %vm331_vm0, %v4316_v11, 0 }
 0x12c   : > { %7456 = vst [vmem:[#allocation3_spill] sm:$0xff] %v6008_v43  ;;  %v4704_v25 = vpop.f32.mrb[35].mxu1  ;;  %v6014_v9 = vadd.f32 %v616_v51, %v436_v39  ;;  %v2146_v7 = vrot.slane %v4306_v33, 1 }
 0x12d   : > { %4892 = vmatmul.mubr.msk.bf16.gmra.mrb[140].mxu0 %vm303_vm2, %v1566_v24  ;;  %v2149_v24 = vrot.slane %v5799_v35, 1 }
 0x12e   : > { %7457 = vst [vmem:[#allocation4_spill] sm:$0xff] %v6014_v9  ;;  %4930 = vmatmul.mubr.msk.bf16.gmra.mrb[140].mxu1 %vm303_vm2, %v6011_v58  ;;  %4935 = vmatprep.mubr.msk.bf16.mxu0 %vm5415_vm1, %v7440_v2  ;;  %v6030_v30 = vsel %vm2145_vm4, %v2146_v7, %v2147_v44 }
 0x12f   : > { %4973 = vmatprep.mubr.msk.bf16.mxu1 %vm5415_vm1, %v7440_v2 }
 0x130   : > { %v825_v53 = vpop.f32.mrb[36].mxu0 }
 0x131   : > { %v930_v57 = vpop.f32.mrb[36].mxu1  ;;  %v4709_v59 = vpop.f32.mrb[37].mxu0 }
 0x132   : > { %v4747_v63 = vpop.f32.mrb[37].mxu1  ;;  %v828_v5 = vpop.f32.mrb[38].mxu0  ;;  %v6027_v15 = vadd.f32 %v930_v57, %v825_v53  ;;  %v6049_v59 = vsel %vm2145_vm4, %v2147_v44, %v2149_v24 }
 0x133   : > { %v933_v23 = vpop.f32.mrb[38].mxu1  ;;  %v4710_v13 = vpop.f32.mrb[39].mxu0 }
 0x134   : > { %v4748_v20 = vpop.f32.mrb[39].mxu1  ;;  %v6033_v39 = vadd.f32 %v933_v23, %v828_v5  ;;  %v2151_v5 = vrot.slane %v5826_v52, 1  ;;  %v2153_v52 = vrot.slane %v5855_v21, 1  ;;  %v2155_v21 = vrot.slane %v5880_v45, 1 }
 0x135   : > { %4936 = vmatmul.mubr.msk.bf16.vlgmr.msra.gmra.mrb[144].mxu0 %vm303_vm2, %v5815_v50  ;;  %v2157_v45 = vrot.slane %v5905_v12, 1  ;;  %v2159_v12 = vrot.slane %v5930_v40, 1  ;;  %v2161_v40 = vrot.slane %v5955_v27, 1  ;;  %v2163_v27 = vrot.slane %v5980_v4, 1 }
 0x136   : > { %4974 = vmatmul.mubr.msk.bf16.vlgmr.msra.gmra.mrb[144].mxu1 %vm303_vm2, %v6030_v30  ;;  %5010 = vmatpush3.bf16.msra.mxu0 %v2318_v32  ;;  %v7461_v4 = vmov 0.0  }
 0x137   : > { %5048 = vmatpush3.bf16.msra.mxu1 %v2318_v32  ;;  %4939 = vmatprep.mubr.msk.bf16.mxu0 %vm5415_vm1, %v7440_v2 }
 0x138   : > { %v833_v51 = vpop.f32.mrb[40].mxu0  ;;  %4977 = vmatprep.mubr.msk.bf16.mxu1 %vm5415_vm1, %v7440_v2  ;;  %5085 = vmatprep.subr.bf16.mxu0 %v7440_v2 }
 0x139   : > { %v938_v33 = vpop.f32.mrb[40].mxu1  ;;  %v4713_v25 = vpop.f32.mrb[41].mxu0  ;;  %5123 = vmatprep.subr.bf16.mxu1 %v7440_v2 }
 0x13a   : > { %v4751_v50 = vpop.f32.mrb[41].mxu1  ;;  %v836_v7 = vpop.f32.mrb[42].mxu0  ;;  %v6046_v53 = vadd.f32 %v938_v33, %v833_v51  ;;  %v6065_v25 = vsel %vm2145_vm4, %v2149_v24, %v2151_v5 }
 0x13b   : > { %v941_v11 = vpop.f32.mrb[42].mxu1  ;;  %v4714_v57 = vpop.f32.mrb[43].mxu0 }
 0x13c   : > { %v4752_v35 = vpop.f32.mrb[43].mxu1  ;;  %v6051_v63 = vadd.f32 %v941_v11, %v836_v7 }
 0x13d   : > { %4940 = vmatmul.mubr.msk.bf16.gmra.mrb[148].mxu0 %vm303_vm2, %v5843_v10 }
 0x13e   : > { %4978 = vmatmul.mubr.msk.bf16.gmra.mrb[148].mxu1 %vm303_vm2, %v6049_v59  ;;  %4943 = vmatprep.mubr.msk.bf16.mxu0 %vm5415_vm1, %v7440_v2 }
 0x13f   : > { %4981 = vmatprep.mubr.msk.bf16.mxu1 %vm5415_vm1, %v7440_v2 }
 0x140   : > { %v841_v23 = vpop.f32.mrb[44].mxu0 }
 0x141   : > { %v946_v44 = vpop.f32.mrb[44].mxu1  ;;  %v4717_v13 = vpop.f32.mrb[45].mxu0 }
 0x142   : > { %v4755_v32 = vpop.f32.mrb[45].mxu1  ;;  %v844_v20 = vpop.f32.mrb[46].mxu0  ;;  %v6062_v51 = vadd.f32 %v946_v44, %v841_v23 }
 0x143   : > { %v949_v33 = vpop.f32.mrb[46].mxu1  ;;  %v4718_v10 = vpop.f32.mrb[47].mxu0  ;;  %v6081_v32 = vsel %vm2145_vm4, %v2151_v5, %v2153_v52 }
 0x144   : > { %v4756_v50 = vpop.f32.mrb[47].mxu1  ;;  %v6067_v7 = vadd.f32 %v949_v33, %v844_v20 }
 0x145   : > { %4944 = vmatmul.mubr.msk.bf16.gmra.mrb[152].mxu0 %vm303_vm2, %v5868_v38 }
 0x146   : > { %4982 = vmatmul.mubr.msk.bf16.gmra.mrb[152].mxu1 %vm303_vm2, %v6065_v25  ;;  %4947 = vmatprep.mubr.msk.bf16.mxu0 %vm5415_vm1, %v7440_v2 }
 0x147   : > { %4985 = vmatprep.mubr.msk.bf16.mxu1 %vm5415_vm1, %v7440_v2 }
 0x148   : > { %v849_v11 = vpop.f32.mrb[48].mxu0 }
 0x149   : > { %v954_v24 = vpop.f32.mrb[48].mxu1  ;;  %v4721_v57 = vpop.f32.mrb[49].mxu0 }
 0x14a   : > { %v4759_v35 = vpop.f32.mrb[49].mxu1  ;;  %v852_v23 = vpop.f32.mrb[50].mxu0  ;;  %v6078_v44 = vadd.f32 %v954_v24, %v849_v11 }
 0x14b   : > { %v957_v13 = vpop.f32.mrb[50].mxu1  ;;  %v4722_v38 = vpop.f32.mrb[51].mxu0 }
 0x14c   : > { %v4760_v20 = vpop.f32.mrb[51].mxu1  ;;  %v6083_v33 = vadd.f32 %v957_v13, %v852_v23  ;;  %v6097_v23 = vsel %vm2145_vm4, %v2153_v52, %v2155_v21 }
 0x14d   : > { %4948 = vmatmul.mubr.msk.bf16.gmra.mrb[156].mxu0 %vm303_vm2, %v5893_v1 }
 0x14e   : > { %4986 = vmatmul.mubr.msk.bf16.gmra.mrb[156].mxu1 %vm303_vm2, %v6081_v32  ;;  %4951 = vmatprep.mubr.msk.bf16.mxu0 %vm5415_vm1, %v7440_v2 }
 0x14f   : > { %4989 = vmatprep.mubr.msk.bf16.mxu1 %vm5415_vm1, %v7440_v2 }
 0x150   : > { %v857_v10 = vpop.f32.mrb[52].mxu0 }
 0x151   : > { %v962_v5 = vpop.f32.mrb[52].mxu1  ;;  %v4725_v50 = vpop.f32.mrb[53].mxu0 }
 0x152   : > { %v4763_v11 = vpop.f32.mrb[53].mxu1  ;;  %v860_v24 = vpop.f32.mrb[54].mxu0  ;;  %v6094_v57 = vadd.f32 %v962_v5, %v857_v10 }
 0x153   : > { %v965_v35 = vpop.f32.mrb[54].mxu1  ;;  %v4726_v1 = vpop.f32.mrb[55].mxu0 }
 0x154   : > { %v4764_v13 = vpop.f32.mrb[55].mxu1  ;;  %v6099_v38 = vadd.f32 %v965_v35, %v860_v24  ;;  %v6113_v35 = vsel %vm2145_vm4, %v2155_v21, %v2157_v45 }
 0x155   : > { %4952 = vmatmul.mubr.msk.bf16.gmra.mrb[160].mxu0 %vm303_vm2, %v5918_v36 }
 0x156   : > { %4990 = vmatmul.mubr.msk.bf16.gmra.mrb[160].mxu1 %vm303_vm2, %v6097_v23  ;;  %4955 = vmatprep.mubr.msk.bf16.mxu0 %vm5415_vm1, %v7440_v2 }
 0x157   : > { %4993 = vmatprep.mubr.msk.bf16.mxu1 %vm5415_vm1, %v7440_v2 }
 0x158   : > { %v865_v20 = vpop.f32.mrb[56].mxu0 }
 0x159   : > { %v970_v52 = vpop.f32.mrb[56].mxu1  ;;  %v4729_v10 = vpop.f32.mrb[57].mxu0 }
 0x15a   : > { %v4767_v5 = vpop.f32.mrb[57].mxu1  ;;  %v868_v50 = vpop.f32.mrb[58].mxu0  ;;  %v6110_v11 = vadd.f32 %v970_v52, %v865_v20 }
 0x15b   : > { %v973_v24 = vpop.f32.mrb[58].mxu1  ;;  %v4730_v36 = vpop.f32.mrb[59].mxu0 }
 0x15c   : > { %v4768_v1 = vpop.f32.mrb[59].mxu1  ;;  %v6115_v13 = vadd.f32 %v973_v24, %v868_v50  ;;  %v6129_v36 = vsel %vm2145_vm4, %v2157_v45, %v2159_v12 }
 0x15d   : > { %4956 = vmatmul.mubr.msk.bf16.gmra.mrb[164].mxu0 %vm303_vm2, %v5943_v8 }
 0x15e   : > { %4994 = vmatmul.mubr.msk.bf16.gmra.mrb[164].mxu1 %vm303_vm2, %v6113_v35  ;;  %4959 = vmatprep.mubr.msk.bf16.mxu0 %vm5415_vm1, %v7440_v2 }
 0x15f   : > { %4997 = vmatprep.mubr.msk.bf16.mxu1 %vm5415_vm1, %v7440_v2 }
 0x160   : > { %v873_v20 = vpop.f32.mrb[60].mxu0 }
 0x161   : > { %v978_v21 = vpop.f32.mrb[60].mxu1  ;;  %v4733_v52 = vpop.f32.mrb[61].mxu0 }
 0x162   : > { %v4771_v10 = vpop.f32.mrb[61].mxu1  ;;  %v876_v5 = vpop.f32.mrb[62].mxu0  ;;  %v6126_v50 = vadd.f32 %v978_v21, %v873_v20 }
 0x163   : > { %v981_v24 = vpop.f32.mrb[62].mxu1  ;;  %v4734_v8 = vpop.f32.mrb[63].mxu0 }
 0x164   : > { %v4772_v1 = vpop.f32.mrb[63].mxu1  ;;  %v6131_v9 = vadd.f32 %v981_v24, %v876_v5  ;;  %v6145_v8 = vsel %vm2145_vm4, %v2159_v12, %v2161_v40  ;;  %v2443_v12 = vld [vmem:[%s5471_s24 + $0x4] sm:$0xe] }
 0x165   : > { %4960 = vmatmul.mubr.msk.bf16.gmra.mrb[168].mxu0 %vm303_vm2, %v5968_v54  ;;  %7458 = vst [vmem:[#allocation5_spill] sm:$0xff] %v6145_v8 }
 0x166   : > { %4998 = vmatmul.mubr.msk.bf16.gmra.mrb[168].mxu1 %vm303_vm2, %v6129_v36  ;;  %4963 = vmatprep.mubr.msk.bf16.mxu0 %vm5415_vm1, %v7440_v2 }
 0x167   : > { %5001 = vmatprep.mubr.msk.bf16.mxu1 %vm5415_vm1, %v7440_v2 }
 0x168   : > { %v881_v20 = vpop.f32.mrb[64].mxu0 }
 0x169   : > { %v986_v45 = vpop.f32.mrb[64].mxu1  ;;  %v4737_v21 = vpop.f32.mrb[65].mxu0 }
 0x16a   : > { %v4775_v52 = vpop.f32.mrb[65].mxu1  ;;  %v884_v10 = vpop.f32.mrb[66].mxu0  ;;  %v6142_v5 = vadd.f32 %v986_v45, %v881_v20 }
 0x16b   : > { %v989_v54 = vpop.f32.mrb[66].mxu1  ;;  %v4738_v24 = vpop.f32.mrb[67].mxu0 }
 0x16c   : > { %v4776_v1 = vpop.f32.mrb[67].mxu1  ;;  %v6147_v43 = vadd.f32 %v989_v54, %v884_v10 }
 0x16d   : > { %4964 = vmatmul.mubr.msk.bf16.gmra.mrb[172].mxu0 %vm303_vm2, %v5993_v28  ;;  %v6162_v1 = vsel %vm2145_vm4, %v2161_v40, %v2163_v27  ;;  %v2448_v40 = vrot.slane %v5788_v26, 1 }
 0x16e   : > { %7459 = vst [vmem:[#allocation6_spill] sm:$0xff] %v6147_v43  ;;  %5002 = vmatmul.mubr.msk.bf16.gmra.mrb[172].mxu1 %vm303_vm2, %v6145_v8  ;;  %4967 = vmatprep.mubr.msk.bf16.mxu0 %vm5415_vm1, %v7440_v2  ;;  %7460 = vst [vmem:[#allocation7_spill] sm:$0xff] %v6162_v1  ;;  %v4326_v8 = vcombine.low %v2443_v12, %v5772_v14 }
 0x16f   : > { %5005 = vmatprep.mubr.msk.bf16.mxu1 %vm5415_vm1, %v7440_v2 }
 0x170   : > { %v889_v20 = vpop.f32.mrb[68].mxu0 }
 0x171   : > { %v994_v45 = vpop.f32.mrb[68].mxu1  ;;  %v4741_v21 = vpop.f32.mrb[69].mxu0 }
 0x172   : > { %v6159_v52 = vadd.f32 %v994_v45, %v889_v20  ;;  %v4779_v10 = vpop.f32.mrb[69].mxu1  ;;  %v892_v54 = vpop.f32.mrb[70].mxu0  ;;  %v2447_v20 = vrot.slane %v4326_v8, 1 }
 0x173   : > { %v997_v28 = vpop.f32.mrb[70].mxu1  ;;  %v4742_v24 = vpop.f32.mrb[71].mxu0 }
 0x174   : > { %v6165_v43 = vadd.f32 %v997_v28, %v892_v54  ;;  %v4780_v2 = vpop.f32.mrb[71].mxu1  ;;  %v2449_v28 = vsel %vm2145_vm4, %v2447_v20, %v2448_v40 }
 0x175   : > { %4968 = vmatmul.mubr.msk.bf16.gmra.mrb[176].mxu0 %vm303_vm2, %v6011_v58  ;;  %v4336_v2 = vld [vmem:[%s7435_s2 + $0x18] sm:$0xf] }
 0x176   : > { %5006 = vmatmul.mubr.msk.bf16.gmra.mrb[176].mxu1 %vm303_vm2, %v6162_v1  ;;  %5011 = vmatprep.mubr.msk.bf16.mxu0 %vm5415_vm1, %v7461_v4  ;;  %v2732_v24 = vsel %vm331_vm0, %v4336_v2, 0 }
 0x177   : > { %5049 = vmatprep.mubr.msk.bf16.mxu1 %vm5415_vm1, %v7461_v4 }
 0x178   : > { %v1040_v27 = vpop.f32.mrb[72].mxu0 }
 0x179   : > { %v6180_v14 = vadd.f32 %v1040_v27, %v5812_v47  ;;  %v1333_v58 = vpop.f32.mrb[72].mxu1  ;;  %v4785_v12 = vpop.f32.mrb[73].mxu0 }
 0x17a   : > { %v6183_v45 = vadd.f32 %v1333_v58, %v6027_v15  ;;  %v4823_v21 = vpop.f32.mrb[73].mxu1  ;;  %v1043_v10 = vpop.f32.mrb[74].mxu0 }
 0x17b   : > { %v6186_v54 = vadd.f32 %v1043_v10, %v5820_v55  ;;  %v1336_v8 = vpop.f32.mrb[74].mxu1  ;;  %v4786_v26 = vpop.f32.mrb[75].mxu0  ;;  %v2450_v55 = vrot.slane %v5804_v37, 1 }
 0x17c   : > { %v6191_v1 = vadd.f32 %v1336_v8, %v6033_v39  ;;  %v4824_v47 = vpop.f32.mrb[75].mxu1 }
 0x17d   : > { %5012 = vmatmul.mubr.msk.bf16.vlgmr.msra.gmra.mrb[180].mxu0 %vm303_vm2, %v6030_v30  ;;  %v2451_v10 = vsel %vm2145_vm4, %v2448_v40, %v2450_v55 }
 0x17e   : > { %5050 = vmatmul.mubr.msk.bf16.vlgmr.msra.gmra.mrb[180].mxu1 %vm303_vm2, %v2449_v28  ;;  %5086 = vmatpush3.bf16.msra.mxu0 %v2732_v24 }
 0x17f   : > { %5124 = vmatpush3.bf16.msra.mxu1 %v2732_v24  ;;  %5015 = vmatprep.mubr.msk.bf16.mxu0 %vm5415_vm1, %v7461_v4 }
 0x180   : > { %v1048_v15 = vpop.f32.mrb[76].mxu0  ;;  %5053 = vmatprep.mubr.msk.bf16.mxu1 %vm5415_vm1, %v7461_v4  ;;  %5161 = vmatprep.subr.bf16.mxu0 %v7461_v4 }
 0x181   : > { %v6203_v39 = vadd.f32 %v1048_v15, %v5840_v0  ;;  %v1341_v20 = vpop.f32.mrb[76].mxu1  ;;  %v4789_v30 = vpop.f32.mrb[77].mxu0  ;;  %5199 = vmatprep.subr.bf16.mxu1 %v7461_v4 }
 0x182   : > { %v6207_v27 = vadd.f32 %v1341_v20, %v6046_v53  ;;  %v4827_v2 = vpop.f32.mrb[77].mxu1  ;;  %v1051_v58 = vpop.f32.mrb[78].mxu0 }
 0x183   : > { %v6210_v37 = vadd.f32 %v1051_v58, %v5847_v16  ;;  %v1344_v12 = vpop.f32.mrb[78].mxu1  ;;  %v4790_v21 = vpop.f32.mrb[79].mxu0  ;;  %v2452_v16 = vrot.slane %v5831_v61, 1 }
 0x184   : > { %v6214_v8 = vadd.f32 %v1344_v12, %v6051_v63  ;;  %v4828_v0 = vpop.f32.mrb[79].mxu1  ;;  %v6252_v12 = vld [vmem:[%s5476_s27 + $0x18] sm:$0xff]  }
 0x185   : > { %5016 = vmatmul.mubr.msk.bf16.gmra.mrb[184].mxu0 %vm303_vm2, %v6049_v59  ;;  %v2453_v61 = vsel %vm2145_vm4, %v2450_v55, %v2452_v16 }
 0x186   : > { %5054 = vmatmul.mubr.msk.bf16.gmra.mrb[184].mxu1 %vm303_vm2, %v2451_v10  ;;  %5019 = vmatprep.mubr.msk.bf16.mxu0 %vm5415_vm1, %v7461_v4 }
 0x187   : > { %5057 = vmatprep.mubr.msk.bf16.mxu1 %vm5415_vm1, %v7461_v4 }
 0x188   : > { %v1056_v53 = vpop.f32.mrb[80].mxu0 }
 0x189   : > { %v6225_v40 = vadd.f32 %v1056_v53, %v5865_v34  ;;  %v1349_v63 = vpop.f32.mrb[80].mxu1  ;;  %v4793_v26 = vpop.f32.mrb[81].mxu0 }
 0x18a   : > { %v6228_v28 = vadd.f32 %v1349_v63, %v6062_v51  ;;  %v4831_v59 = vpop.f32.mrb[81].mxu1  ;;  %v1059_v24 = vpop.f32.mrb[82].mxu0  ;;  %v6246_v51 = vld [vmem:[%s5476_s27 + $0x20] sm:$0xff]  }
 0x18b   : > { %v6231_v47 = vadd.f32 %v1059_v24, %v5872_v42  ;;  %v1352_v15 = vpop.f32.mrb[82].mxu1  ;;  %v4794_v20 = vpop.f32.mrb[83].mxu0  ;;  %v2454_v42 = vrot.slane %v5860_v19, 1  ;;  %v3256_v21 = vshll.u32 %v6246_v51, 16  ;;  %v3244_v59 = vshrl.u32 %v6252_v12, 16 }
 0x18c   : > { %v6235_v30 = vadd.f32 %v1352_v15, %v6067_v7  ;;  %v4832_v34 = vpop.f32.mrb[83].mxu1  ;;  %v3247_v24 = vshll.u32 %v6252_v12, 16 }
 0x18d   : > { %5020 = vmatmul.mubr.msk.bf16.gmra.mrb[188].mxu0 %vm303_vm2, %v6065_v25  ;;  %v3253_v25 = vshrl.u32 %v6246_v51, 16  ;;  %v2455_v26 = vsel %vm2145_vm4, %v2452_v16, %v2454_v42  ;;  %v3246_v16 = vrot.slane %v3244_v59, 1 }
 0x18e   : > { %5058 = vmatmul.mubr.msk.bf16.gmra.mrb[188].mxu1 %vm303_vm2, %v2453_v61  ;;  %5023 = vmatprep.mubr.msk.bf16.mxu0 %vm5415_vm1, %v7461_v4  ;;  %v3258_v61 = vrot.slane %v3256_v21, 2  ;;  %v3249_v34 = vrot.slane %v3247_v24, 2 }
 0x18f   : > { %5061 = vmatprep.mubr.msk.bf16.mxu1 %vm5415_vm1, %v7461_v4 }
 0x190   : > { %v1064_v55 = vpop.f32.mrb[84].mxu0  ;;  %v6291_v24 = vor.u32 %v3249_v34, %v3246_v16 }
 0x191   : > { %v6249_v7 = vadd.f32 %v1064_v55, %v5890_v62  ;;  %v1357_v2 = vpop.f32.mrb[84].mxu1  ;;  %v4797_v58 = vpop.f32.mrb[85].mxu0 }
 0x192   : > { %v6257_v10 = vadd.f32 %v1357_v2, %v6078_v44  ;;  %v4835_v0 = vpop.f32.mrb[85].mxu1  ;;  %v1067_v53 = vpop.f32.mrb[86].mxu0  ;;  %v3255_v44 = vrot.slane %v3253_v25, 1  ;;  %7462 = vst [vmem:[#allocation8_spill] sm:$0xff] %v6291_v24 }
 0x193   : > { %v6260_v19 = vadd.f32 %v1067_v53, %v5897_v6  ;;  %v1360_v63 = vpop.f32.mrb[86].mxu1  ;;  %v4798_v62 = vpop.f32.mrb[87].mxu0  ;;  %v2456_v6 = vrot.slane %v5885_v49, 1 }
 0x194   : > { %v6266_v15 = vadd.f32 %v1360_v63, %v6083_v33  ;;  %v4836_v20 = vpop.f32.mrb[87].mxu1  ;;  %v6277_v33 = vld [vmem:[%s5476_s27 + $0x28] sm:$0xff]   ;;  %v3259_v25 = vor.u32 %v3258_v61, %v3255_v44 }
 0x195   : > { %5024 = vmatmul.mubr.msk.bf16.gmra.mrb[192].mxu0 %vm303_vm2, %v6081_v32  ;;  %v3262_v21 = vshrl.u32 %v6277_v33, 16  ;;  %v3265_v0 = vshll.u32 %v6277_v33, 16 }
 0x196   : > { %5062 = vmatmul.mubr.msk.bf16.gmra.mrb[192].mxu1 %vm303_vm2, %v2455_v26  ;;  %5027 = vmatprep.mubr.msk.bf16.mxu0 %vm5415_vm1, %v7461_v4 }
 0x197   : > { %5065 = vmatprep.mubr.msk.bf16.mxu1 %vm5415_vm1, %v7461_v4  ;;  %v3267_v61 = vrot.slane %v3265_v0, 2 }
 0x198   : > { %v1072_v55 = vpop.f32.mrb[88].mxu0 }
 0x199   : > { %v6280_v2 = vadd.f32 %v1072_v55, %v5915_v31  ;;  %v1365_v32 = vpop.f32.mrb[88].mxu1  ;;  %v4801_v58 = vpop.f32.mrb[89].mxu0  ;;  %v2457_v31 = vsel %vm2145_vm4, %v2454_v42, %v2456_v6  ;;  %v6309_v42 = vld [vmem:[%s5476_s27 + $0x30] sm:$0xff]  }
 0x19a   : > { %v6285_v53 = vadd.f32 %v1365_v32, %v6094_v57  ;;  %v4839_v63 = vpop.f32.mrb[89].mxu1  ;;  %v1075_v49 = vpop.f32.mrb[90].mxu0  ;;  %v3264_v57 = vrot.slane %v3262_v21, 1  ;;  %v3271_v58 = vshrl.u32 %v6309_v42, 16  ;;  %v3274_v21 = vshll.u32 %v6309_v42, 16 }
 0x19b   : > { %v6288_v62 = vadd.f32 %v1075_v49, %v5922_v41  ;;  %v1368_v26 = vpop.f32.mrb[90].mxu1  ;;  %v4802_v59 = vpop.f32.mrb[91].mxu0  ;;  %v6300_v41 = vsel %vm3225_vm5, %v6291_v24, %v3259_v25 }
 0x19c   : > { %v6294_v20 = vadd.f32 %v1368_v26, %v6099_v38  ;;  %v4840_v44 = vpop.f32.mrb[91].mxu1  ;;  %7463 = vst [vmem:[#allocation9_spill] sm:$0xff] %v6300_v41  ;;  %v2458_v38 = vrot.slane %v5910_v17, 1  ;;  %v3268_v32 = vor.u32 %v3267_v61, %v3264_v57  ;;  %v3273_v57 = vrot.slane %v3271_v58, 1 }
 0x19d   : > { %5028 = vmatmul.mubr.msk.bf16.gmra.mrb[196].mxu0 %vm303_vm2, %v6097_v23 }
 0x19e   : > { %5066 = vmatmul.mubr.msk.bf16.gmra.mrb[196].mxu1 %vm303_vm2, %v2457_v31  ;;  %5031 = vmatprep.mubr.msk.bf16.mxu0 %vm5415_vm1, %v7461_v4  ;;  %v6329_v61 = vsel %vm3225_vm5, %v3259_v25, %v3268_v32 }
 0x19f   : > { %5069 = vmatprep.mubr.msk.bf16.mxu1 %vm5415_vm1, %v7461_v4  ;;  %7464 = vst [vmem:[#allocation10_spill] sm:$0xff] %v6329_v61 }
 0x1a0   : > { %v1080_v16 = vpop.f32.mrb[92].mxu0 }
 0x1a1   : > { %v6312_v23 = vadd.f32 %v1080_v16, %v5940_v3  ;;  %v1373_v34 = vpop.f32.mrb[92].mxu1  ;;  %v4805_v55 = vpop.f32.mrb[93].mxu0  ;;  %v2459_v3 = vsel %vm2145_vm4, %v2456_v6, %v2458_v38 }
 0x1a2   : > { %v6317_v0 = vadd.f32 %v1373_v34, %v6110_v11  ;;  %v4843_v63 = vpop.f32.mrb[93].mxu1  ;;  %v1083_v49 = vpop.f32.mrb[94].mxu0  ;;  %v3276_v11 = vrot.slane %v3274_v21, 2 }
 0x1a3   : > { %v6320_v17 = vadd.f32 %v1083_v49, %v5947_v18  ;;  %v1376_v26 = vpop.f32.mrb[94].mxu1  ;;  %v4806_v59 = vpop.f32.mrb[95].mxu0  ;;  %v2460_v18 = vrot.slane %v5935_v46, 1 }
 0x1a4   : > { %v6324_v31 = vadd.f32 %v1376_v26, %v6115_v13  ;;  %v4844_v44 = vpop.f32.mrb[95].mxu1  ;;  %v6338_v13 = vld [vmem:[%s5476_s27 + $0x38] sm:$0xff]   ;;  %v3277_v25 = vor.u32 %v3276_v11, %v3273_v57 }
 0x1a5   : > { %5032 = vmatmul.mubr.msk.bf16.gmra.mrb[200].mxu0 %vm303_vm2, %v6113_v35  ;;  %v3280_v55 = vshrl.u32 %v6338_v13, 16  ;;  %v3283_v58 = vshll.u32 %v6338_v13, 16 }
 0x1a6   : > { %5070 = vmatmul.mubr.msk.bf16.gmra.mrb[200].mxu1 %vm303_vm2, %v2459_v3  ;;  %5035 = vmatprep.mubr.msk.bf16.mxu0 %vm5415_vm1, %v7461_v4  ;;  %v6358_v11 = vsel %vm3225_vm5, %v3268_v32, %v3277_v25 }
 0x1a7   : > { %5073 = vmatprep.mubr.msk.bf16.mxu1 %vm5415_vm1, %v7461_v4  ;;  %v3282_v57 = vrot.slane %v3280_v55, 1  ;;  %7465 = vst [vmem:[#allocation11_spill] sm:$0xff] %v6358_v11  ;;  %v7474_v11 = vld [vmem:[#allocation4_spill] sm:$0xff] }
 0x1a8   : > { %v1088_v6 = vpop.f32.mrb[96].mxu0 }
 0x1a9   : > { %v6341_v35 = vadd.f32 %v1088_v6, %v5965_v48  ;;  %v1381_v16 = vpop.f32.mrb[96].mxu1  ;;  %v4809_v34 = vpop.f32.mrb[97].mxu0  ;;  %v2461_v48 = vsel %vm2145_vm4, %v2458_v38, %v2460_v18 }
 0x1aa   : > { %v6346_v21 = vadd.f32 %v1381_v16, %v6126_v50  ;;  %v4847_v63 = vpop.f32.mrb[97].mxu1  ;;  %v1091_v49 = vpop.f32.mrb[98].mxu0  ;;  %v3285_v50 = vrot.slane %v3283_v58, 2 }
 0x1ab   : > { %v6349_v46 = vadd.f32 %v1091_v49, %v5972_v60  ;;  %v1384_v26 = vpop.f32.mrb[98].mxu1  ;;  %v4810_v59 = vpop.f32.mrb[99].mxu0  ;;  %v2462_v60 = vrot.slane %v5960_v29, 1 }
 0x1ac   : > { %v6353_v3 = vadd.f32 %v1384_v26, %v6131_v9  ;;  %v4848_v44 = vpop.f32.mrb[99].mxu1  ;;  %v6367_v9 = vld [vmem:[%s5476_s27 + $0x40] sm:$0xff]   ;;  %v3286_v32 = vor.u32 %v3285_v50, %v3282_v57  ;;  %v7467_v50 = vld [vmem:[#allocation5_spill] sm:$0xff] }
 0x1ad   : > { %5036 = vmatmul.mubr.msk.bf16.gmra.mrb[204].mxu0 %vm303_vm2, %v6129_v36  ;;  %v3289_v34 = vshrl.u32 %v6367_v9, 16  ;;  %v3292_v55 = vshll.u32 %v6367_v9, 16 }
 0x1ae   : > { %5074 = vmatmul.mubr.msk.bf16.gmra.mrb[204].mxu1 %vm303_vm2, %v2461_v48  ;;  %5039 = vmatprep.mubr.msk.bf16.mxu0 %vm5415_vm1, %v7461_v4  ;;  %v7466_v48 = vld [vmem:[#allocation6_spill] sm:$0xff] }
 0x1af   : > { %5077 = vmatprep.mubr.msk.bf16.mxu1 %vm5415_vm1, %v7461_v4 }
 0x1b0   : > { %v1096_v38 = vpop.f32.mrb[100].mxu0 }
 0x1b1   : > { %v6370_v36 = vadd.f32 %v1096_v38, %v5990_v22  ;;  %v1389_v6 = vpop.f32.mrb[100].mxu1  ;;  %v4813_v16 = vpop.f32.mrb[101].mxu0  ;;  %v2463_v22 = vsel %vm2145_vm4, %v2460_v18, %v2462_v60  ;;  %v3291_v38 = vrot.slane %v3289_v34, 1  ;;  %v7470_v34 = vld [vmem:[#allocation3_spill] sm:$0xff] }
 0x1b2   : > { %v6375_v58 = vadd.f32 %v1389_v6, %v6142_v5  ;;  %v4851_v63 = vpop.f32.mrb[101].mxu1  ;;  %v1099_v49 = vpop.f32.mrb[102].mxu0  ;;  %v3294_v5 = vrot.slane %v3292_v55, 2  ;;  %v6387_v6 = vsel %vm3225_vm5, %v3277_v25, %v3286_v32  ;;  %v6396_v16 = vld [vmem:[%s5476_s27 + $0x48] sm:$0xff]  }
 0x1b3   : > { %v6378_v29 = vadd.f32 %v1099_v49, %v5997_v56  ;;  %v1392_v26 = vpop.f32.mrb[102].mxu1  ;;  %v4814_v59 = vpop.f32.mrb[103].mxu0  ;;  %7468 = vst [vmem:[#allocation6_spill] sm:$0xff] %v6387_v6  ;;  %v7469_v56 = vld [vmem:[#allocation2_spill] sm:$0xff]  ;;  %v6410_v6 = vld [vmem:[%s5476_s27 + $0x10] sm:$0xff]  }
 0x1b4   : > { %v6382_v44 = vadd.f32 %v1392_v26, %v7466_v48  ;;  %v4852_v57 = vpop.f32.mrb[103].mxu1  ;;  %v2464_v18 = vrot.slane %v7469_v56, 1  ;;  %v3295_v26 = vor.u32 %v3294_v5, %v3291_v38  ;;  %v3298_v59 = vshrl.u32 %v6396_v16, 16  ;;  %v6407_v56 = vld [vmem:[%s5476_s27 + $0x8] sm:$0xfe]   ;;  %7473 = vst [vmem:[#allocation3_spill] sm:$0xff] %v6410_v6 }
 0x1b5   : > { %5040 = vmatmul.mubr.msk.bf16.gmra.mrb[208].mxu0 %vm303_vm2, %v7467_v50  ;;  %v5386_v5 = vld [vmem:[%s5471_s24 + $0x8] sm:$0xfe]  }
 0x1b6   : > { %5078 = vmatmul.mubr.msk.bf16.gmra.mrb[208].mxu1 %vm303_vm2, %v2463_v22  ;;  %5043 = vmatprep.mubr.msk.bf16.mxu0 %vm5415_vm1, %v7461_v4  ;;  %v3301_v22 = vshll.u32 %v6396_v16, 16  ;;  %v2465_v38 = vsel %vm2145_vm4, %v2462_v60, %v2464_v18 }
 0x1b7   : > { %5081 = vmatprep.mubr.msk.bf16.mxu1 %vm5415_vm1, %v7461_v4 }
 0x1b8   : > { %v1104_v63 = vpop.f32.mrb[104].mxu0  ;;  %v3303_v24 = vrot.slane %v3301_v22, 2 }
 0x1b9   : > { %v6399_v55 = vadd.f32 %v1104_v63, %v7470_v34  ;;  %v1397_v25 = vpop.f32.mrb[104].mxu1  ;;  %v4817_v49 = vpop.f32.mrb[105].mxu0 }
 0x1ba   : > { %v6404_v48 = vadd.f32 %v1397_v25, %v6159_v52  ;;  %v4855_v57 = vpop.f32.mrb[105].mxu1  ;;  %v1107_v50 = vpop.f32.mrb[106].mxu0  ;;  %v6418_v49 = vld [vmem:[%s5471_s24 + $0x10] sm:$0xff]   ;;  %v7477_v25 = vld [vmem:[#allocation7_spill] sm:$0xff] }
 0x1bb   : > { %7471 = vst [vmem:[#allocation5_spill] sm:$0xff] %v6399_v55  ;;  %v6413_v63 = vadd.f32 %v1107_v50, %v7474_v11  ;;  %v1400_v34 = vpop.f32.mrb[106].mxu1  ;;  %v4818_v61 = vpop.f32.mrb[107].mxu0  ;;  %v3300_v57 = vrot.slane %v3298_v59, 1  ;;  %v2686_v11 = vrot.slane %v6410_v6, 1  ;;  %v2925_v60 = vrot.slane %v6418_v49, 1 }
 0x1bc   : > { %7472 = vst [vmem:[#allocation2_spill] sm:$0xff] %v6404_v48  ;;  %v6421_v41 = vadd.f32 %v1400_v34, %v6165_v43  ;;  %v4856_v52 = vpop.f32.mrb[107].mxu1  ;;  %v6426_v48 = vsel %vm3225_vm5, %v3286_v32, %v3295_v26  ;;  %v2685_v61 = vrot.slane %v6407_v56, 1  ;;  %v2924_v43 = vrot.slane %v5386_v5, 1  ;;  %v4375_v32 = vld [vmem:[%s7435_s2 + $0x1c] sm:$0xf] }
 0x1bd   : > { %7475 = vst [vmem:[#allocation4_spill] sm:$0xff] %v6413_v63  ;;  %5044 = vmatmul.mubr.msk.bf16.gmra.mrb[212].mxu0 %vm303_vm2, %v7477_v25  ;;  %7478 = vst [vmem:[#allocation7_spill] sm:$0xff] %v6426_v48  ;;  %v6442_v34 = vor.u32 %v3303_v24, %v3300_v57 }
 0x1be   : > { %7476 = vst [vmem:[#allocation12_spill] sm:$0xff] %v6421_v41  ;;  %5082 = vmatmul.mubr.msk.bf16.gmra.mrb[212].mxu1 %vm303_vm2, %v2465_v38  ;;  %5087 = vmatprep.mubr.msk.bf16.mxu0 %vm5415_vm1, %v7461_v4  ;;  %v2687_v48 = vsel %vm2145_vm4, %v2685_v61, %v2686_v11  ;;  %v6452_v6 = vsel %vm2145_vm4, %v2924_v43, %v2925_v60 }
 0x1bf   : > { %5125 = vmatprep.mubr.msk.bf16.mxu1 %vm5415_vm1, %v7461_v4  ;;  %7479 = vst [vmem:[#allocation13_spill] sm:$0xff] %v6442_v34  ;;  %v6464_v57 = vsel %vm3225_vm5, %v3295_v26, %v6442_v34  ;;  %v3606_v26 = vshrl.u32 %v6418_v49, 16 }
 0x1c0   : > { %v1631_v18 = vpop.f32.mrb[108].mxu0  ;;  %7480 = vst [vmem:[#allocation14_spill] sm:$0xff] %v6464_v57 }
 0x1c1   : > { %v6440_v59 = vadd.f32 %v1631_v18, %v6180_v14  ;;  %v1924_v22 = vpop.f32.mrb[108].mxu1  ;;  %v4861_v50 = vpop.f32.mrb[109].mxu0  ;;  %v3096_v14 = vsel %vm331_vm0, %v4375_v32, 0  ;;  %v6456_v18 = vld [vmem:[%s5471_s24 + $0x18] sm:$0xff]  }
 0x1c2   : > { %v6445_v38 = vadd.f32 %v1924_v22, %v6183_v45  ;;  %v4899_v52 = vpop.f32.mrb[109].mxu1  ;;  %v1634_v25 = vpop.f32.mrb[110].mxu0 }
 0x1c3   : > { %v6449_v41 = vadd.f32 %v1634_v25, %v6186_v54  ;;  %v1927_v63 = vpop.f32.mrb[110].mxu1  ;;  %v4862_v55 = vpop.f32.mrb[111].mxu0  ;;  %v2688_v54 = vrot.slane %v6252_v12, 1 }
 0x1c4   : > { %v6459_v24 = vadd.f32 %v1927_v63, %v6191_v1  ;;  %v4900_v45 = vpop.f32.mrb[111].mxu1  ;;  %v2927_v1 = vrot.slane %v6456_v18, 1  ;;  %v3598_v55 = vshrl.u32 %v5386_v5, 16  ;;  %v3601_v63 = vshll.u32 %v5386_v5, 16 }
 0x1c5   : > { %5088 = vmatmul.mubr.msk.bf16.vlgmr.msra.gmra.mrb[216].mxu0 %vm303_vm2, %v2687_v48  ;;  %v3609_v48 = vshll.u32 %v6418_v49, 16  ;;  %v2689_v52 = vsel %vm2145_vm4, %v2686_v11, %v2688_v54 }
 0x1c6   : > { %5126 = vmatmul.mubr.msk.bf16.vlgmr.msra.gmra.mrb[216].mxu1 %vm303_vm2, %v6452_v6  ;;  %5162 = vmatpush3.bf16.msra.mxu0 %v3096_v14  ;;  %v6489_v49 = vsel %vm2145_vm4, %v2925_v60, %v2927_v1 }
 0x1c7   : > { %5200 = vmatpush3.bf16.msra.mxu1 %v3096_v14  ;;  %5091 = vmatprep.mubr.msk.bf16.mxu0 %vm5415_vm1, %v7461_v4 }
 0x1c8   : > { %v1639_v61 = vpop.f32.mrb[112].mxu0  ;;  %5129 = vmatprep.mubr.msk.bf16.mxu1 %vm5415_vm1, %v7461_v4  ;;  %5237 = vmatprep.subr.bf16.mxu0 %v7461_v4 }
 0x1c9   : > { %v6478_v12 = vadd.f32 %v1639_v61, %v6203_v39  ;;  %v1932_v43 = vpop.f32.mrb[112].mxu1  ;;  %v4865_v32 = vpop.f32.mrb[113].mxu0  ;;  %5275 = vmatprep.subr.bf16.mxu1 %v7461_v4  ;;  %v5391_v39 = vld [vmem:[%s5471_s24 + $0x20] sm:$0xff]   ;;  %v3600_v61 = vrot.slane %v3598_v55, 1 }
 0x1ca   : > { %v6482_v5 = vadd.f32 %v1932_v43, %v6207_v27  ;;  %v4903_v22 = vpop.f32.mrb[113].mxu1  ;;  %v1642_v50 = vpop.f32.mrb[114].mxu0  ;;  %v3603_v32 = vrot.slane %v3601_v63, 2  ;;  %v3608_v43 = vrot.slane %v3606_v26, 1  ;;  %v2929_v11 = vrot.slane %v5391_v39, 1 }
 0x1cb   : > { %v6486_v25 = vadd.f32 %v1642_v50, %v6210_v37  ;;  %v1935_v14 = vpop.f32.mrb[114].mxu1  ;;  %v4866_v45 = vpop.f32.mrb[115].mxu0  ;;  %v3611_v22 = vrot.slane %v3609_v48, 2  ;;  %v2690_v37 = vrot.slane %v6246_v51, 1  ;;  %v3615_v63 = vshrl.u32 %v6456_v18, 16 }
 0x1cc   : > { %v6493_v34 = vadd.f32 %v1935_v14, %v6214_v8  ;;  %v4904_v27 = vpop.f32.mrb[115].mxu1  ;;  %v3604_v60 = vor.u32 %v3603_v32, %v3600_v61  ;;  %v3618_v26 = vshll.u32 %v6456_v18, 16  ;;  %v5393_v18 = vld [vmem:[%s5471_s24 + $0x28] sm:$0xff]  }
 0x1cd   : > { %5092 = vmatmul.mubr.msk.bf16.gmra.mrb[220].mxu0 %vm303_vm2, %v2689_v52  ;;  %v3612_v55 = vor.u32 %v3611_v22, %v3608_v43  ;;  %v2691_v27 = vsel %vm2145_vm4, %v2688_v54, %v2690_v37  ;;  %v6516_v22 = vsel %vm2145_vm4, %v2927_v1, %v2929_v11 }
 0x1ce   : > { %5130 = vmatmul.mubr.msk.bf16.gmra.mrb[220].mxu1 %vm303_vm2, %v6489_v49  ;;  %5095 = vmatprep.mubr.msk.bf16.mxu0 %vm5415_vm1, %v7461_v4 }
 0x1cf   : > { %5133 = vmatprep.mubr.msk.bf16.mxu1 %vm5415_vm1, %v7461_v4 }
 0x1d0   : > { %v1647_v8 = vpop.f32.mrb[116].mxu0 }
 0x1d1   : > { %v6506_v48 = vadd.f32 %v1647_v8, %v6225_v40  ;;  %v1940_v50 = vpop.f32.mrb[116].mxu1  ;;  %v4869_v52 = vpop.f32.mrb[117].mxu0 }
 0x1d2   : > { %v6509_v14 = vadd.f32 %v1940_v50, %v6228_v28  ;;  %v4907_v51 = vpop.f32.mrb[117].mxu1  ;;  %v1650_v45 = vpop.f32.mrb[118].mxu0  ;;  %v3617_v52 = vrot.slane %v3615_v63, 1  ;;  %v3620_v28 = vrot.slane %v3618_v26, 2  ;;  %v6524_v50 = vsel %vm3225_vm5, %v3604_v60, %v3612_v55 }
 0x1d3   : > { %v6513_v61 = vadd.f32 %v1650_v45, %v6231_v47  ;;  %v1943_v32 = vpop.f32.mrb[118].mxu1  ;;  %v4870_v43 = vpop.f32.mrb[119].mxu0  ;;  %7481 = vst [vmem:[#allocation15_spill] sm:$0xff] %v6524_v50  ;;  %v2692_v47 = vrot.slane %v6277_v33, 1  ;;  %v3624_v63 = vshrl.u32 %v5391_v39, 16  ;;  %v3627_v26 = vshll.u32 %v5391_v39, 16 }
 0x1d4   : > { %v6520_v40 = vadd.f32 %v1943_v32, %v6235_v30  ;;  %v4908_v8 = vpop.f32.mrb[119].mxu1  ;;  %v2931_v30 = vrot.slane %v5393_v18, 1  ;;  %v3621_v1 = vor.u32 %v3620_v28, %v3617_v52  ;;  %v5395_v39 = vld [vmem:[%s5471_s24 + $0x30] sm:$0xff]  }
 0x1d5   : > { %5096 = vmatmul.mubr.msk.bf16.gmra.mrb[224].mxu0 %vm303_vm2, %v2691_v27  ;;  %v2693_v33 = vsel %vm2145_vm4, %v2690_v37, %v2692_v47 }
 0x1d6   : > { %5134 = vmatmul.mubr.msk.bf16.gmra.mrb[224].mxu1 %vm303_vm2, %v6516_v22  ;;  %5099 = vmatprep.mubr.msk.bf16.mxu0 %vm5415_vm1, %v7461_v4  ;;  %v6544_v52 = vsel %vm2145_vm4, %v2929_v11, %v2931_v30  ;;  %v3633_v11 = vshrl.u32 %v5393_v18, 16 }
 0x1d7   : > { %5137 = vmatprep.mubr.msk.bf16.mxu1 %vm5415_vm1, %v7461_v4 }
 0x1d8   : > { %v1655_v54 = vpop.f32.mrb[120].mxu0 }
 0x1d9   : > { %v6534_v60 = vadd.f32 %v1655_v54, %v6249_v7  ;;  %v1948_v51 = vpop.f32.mrb[120].mxu1  ;;  %v4873_v45 = vpop.f32.mrb[121].mxu0  ;;  %v3626_v54 = vrot.slane %v3624_v63, 1 }
 0x1da   : > { %v6537_v27 = vadd.f32 %v1948_v51, %v6257_v10  ;;  %v4911_v32 = vpop.f32.mrb[121].mxu1  ;;  %v1658_v43 = vpop.f32.mrb[122].mxu0  ;;  %v3629_v10 = vrot.slane %v3627_v26, 2  ;;  %v6552_v51 = vsel %vm3225_vm5, %v3612_v55, %v3621_v1 }
 0x1db   : > { %v6541_v8 = vadd.f32 %v1658_v43, %v6260_v19  ;;  %v1951_v50 = vpop.f32.mrb[122].mxu1  ;;  %v4874_v57 = vpop.f32.mrb[123].mxu0  ;;  %7482 = vst [vmem:[#allocation16_spill] sm:$0xff] %v6552_v51  ;;  %v2694_v19 = vrot.slane %v6309_v42, 1 }
 0x1dc   : > { %v6548_v7 = vadd.f32 %v1951_v50, %v6266_v15  ;;  %v4912_v28 = vpop.f32.mrb[123].mxu1  ;;  %v2933_v15 = vrot.slane %v5395_v39, 1  ;;  %v3630_v37 = vor.u32 %v3629_v10, %v3626_v54  ;;  %v3636_v50 = vshll.u32 %v5393_v18, 16  ;;  %v5397_v18 = vld [vmem:[%s5471_s24 + $0x38] sm:$0xff]  }
 0x1dd   : > { %5100 = vmatmul.mubr.msk.bf16.gmra.mrb[228].mxu0 %vm303_vm2, %v2693_v33  ;;  %v2695_v42 = vsel %vm2145_vm4, %v2692_v47, %v2694_v19 }
 0x1de   : > { %5138 = vmatmul.mubr.msk.bf16.gmra.mrb[228].mxu1 %vm303_vm2, %v6544_v52  ;;  %5103 = vmatprep.mubr.msk.bf16.mxu0 %vm5415_vm1, %v7461_v4  ;;  %v6572_v54 = vsel %vm2145_vm4, %v2931_v30, %v2933_v15 }
 0x1df   : > { %5141 = vmatprep.mubr.msk.bf16.mxu1 %vm5415_vm1, %v7461_v4 }
 0x1e0   : > { %v1663_v57 = vpop.f32.mrb[124].mxu0 }
 0x1e1   : > { %v6562_v55 = vadd.f32 %v1663_v57, %v6280_v2  ;;  %v1956_v63 = vpop.f32.mrb[124].mxu1  ;;  %v4877_v26 = vpop.f32.mrb[125].mxu0  ;;  %v3635_v57 = vrot.slane %v3633_v11, 1  ;;  %v3645_v11 = vshll.u32 %v5395_v39, 16 }
 0x1e2   : > { %v6565_v45 = vadd.f32 %v1956_v63, %v6285_v53  ;;  %v4915_v32 = vpop.f32.mrb[125].mxu1  ;;  %v1666_v43 = vpop.f32.mrb[126].mxu0  ;;  %v3638_v53 = vrot.slane %v3636_v50, 2  ;;  %v6580_v63 = vsel %vm3225_vm5, %v3621_v1, %v3630_v37 }
 0x1e3   : > { %v6569_v33 = vadd.f32 %v1666_v43, %v6288_v62  ;;  %v1959_v28 = vpop.f32.mrb[126].mxu1  ;;  %v4878_v51 = vpop.f32.mrb[127].mxu0  ;;  %7483 = vst [vmem:[#allocation17_spill] sm:$0xff] %v6580_v63  ;;  %v2696_v62 = vrot.slane %v6338_v13, 1 }
 0x1e4   : > { %v6576_v2 = vadd.f32 %v1959_v28, %v6294_v20  ;;  %v4916_v10 = vpop.f32.mrb[127].mxu1  ;;  %v2935_v20 = vrot.slane %v5397_v18, 1  ;;  %v3639_v30 = vor.u32 %v3638_v53, %v3635_v57  ;;  %v3642_v51 = vshrl.u32 %v5395_v39, 16  ;;  %v5399_v39 = vld [vmem:[%s5471_s24 + $0x40] sm:$0xff]  }
 0x1e5   : > { %5104 = vmatmul.mubr.msk.bf16.gmra.mrb[232].mxu0 %vm303_vm2, %v2695_v42  ;;  %v2697_v13 = vsel %vm2145_vm4, %v2694_v19, %v2696_v62 }
 0x1e6   : > { %5142 = vmatmul.mubr.msk.bf16.gmra.mrb[232].mxu1 %vm303_vm2, %v6572_v54  ;;  %5107 = vmatprep.mubr.msk.bf16.mxu0 %vm5415_vm1, %v7461_v4  ;;  %v6600_v57 = vsel %vm2145_vm4, %v2933_v15, %v2935_v20 }
 0x1e7   : > { %5145 = vmatprep.mubr.msk.bf16.mxu1 %vm5415_vm1, %v7461_v4 }
 0x1e8   : > { %v1671_v47 = vpop.f32.mrb[128].mxu0 }
 0x1e9   : > { %v6590_v1 = vadd.f32 %v1671_v47, %v6312_v23  ;;  %v1964_v50 = vpop.f32.mrb[128].mxu1  ;;  %v4881_v26 = vpop.f32.mrb[129].mxu0  ;;  %v3644_v47 = vrot.slane %v3642_v51, 1  ;;  %v3654_v51 = vshll.u32 %v5397_v18, 16 }
 0x1ea   : > { %v6593_v32 = vadd.f32 %v1964_v50, %v6317_v0  ;;  %v4919_v43 = vpop.f32.mrb[129].mxu1  ;;  %v1674_v42 = vpop.f32.mrb[130].mxu0  ;;  %v3647_v0 = vrot.slane %v3645_v11, 2  ;;  %v6608_v50 = vsel %vm3225_vm5, %v3630_v37, %v3639_v30 }
 0x1eb   : > { %v6597_v28 = vadd.f32 %v1674_v42, %v6320_v17  ;;  %v1967_v10 = vpop.f32.mrb[130].mxu1  ;;  %v4882_v63 = vpop.f32.mrb[131].mxu0  ;;  %7484 = vst [vmem:[#allocation18_spill] sm:$0xff] %v6608_v50  ;;  %v2698_v17 = vrot.slane %v6367_v9, 1 }
 0x1ec   : > { %v6604_v23 = vadd.f32 %v1967_v10, %v6324_v31  ;;  %v4920_v53 = vpop.f32.mrb[131].mxu1  ;;  %v2937_v31 = vrot.slane %v5399_v39, 1  ;;  %v3648_v15 = vor.u32 %v3647_v0, %v3644_v47  ;;  %v3651_v63 = vshrl.u32 %v5397_v18, 16  ;;  %v6631_v18 = vld [vmem:[%s5471_s24 + $0x48] sm:$0xff]  }
 0x1ed   : > { %5108 = vmatmul.mubr.msk.bf16.gmra.mrb[236].mxu0 %vm303_vm2, %v2697_v13  ;;  %v2699_v9 = vsel %vm2145_vm4, %v2696_v62, %v2698_v17 }
 0x1ee   : > { %5146 = vmatmul.mubr.msk.bf16.gmra.mrb[236].mxu1 %vm303_vm2, %v6600_v57  ;;  %5111 = vmatprep.mubr.msk.bf16.mxu0 %vm5415_vm1, %v7461_v4  ;;  %v6628_v47 = vsel %vm2145_vm4, %v2935_v20, %v2937_v31  ;;  %v6638_v62 = vsel %vm3225_vm5, %v3639_v30, %v3648_v15  ;;  %v3660_v20 = vshrl.u32 %v5399_v39, 16 }
 0x1ef   : > { %5149 = vmatprep.mubr.msk.bf16.mxu1 %vm5415_vm1, %v7461_v4  ;;  %7485 = vst [vmem:[#allocation19_spill] sm:$0xff] %v6628_v47  ;;  %7486 = vst [vmem:[#allocation20_spill] sm:$0xff] %v6638_v62 }
 0x1f0   : > { %v1679_v19 = vpop.f32.mrb[132].mxu0 }
 0x1f1   : > { %v6618_v37 = vadd.f32 %v1679_v19, %v6341_v35  ;;  %v1972_v11 = vpop.f32.mrb[132].mxu1  ;;  %v4885_v26 = vpop.f32.mrb[133].mxu0  ;;  %v3656_v19 = vrot.slane %v3654_v51, 2  ;;  %v3663_v51 = vshll.u32 %v5399_v39, 16 }
 0x1f2   : > { %v6621_v43 = vadd.f32 %v1972_v11, %v6346_v21  ;;  %v4923_v42 = vpop.f32.mrb[133].mxu1  ;;  %v1682_v13 = vpop.f32.mrb[134].mxu0  ;;  %v3653_v21 = vrot.slane %v3651_v63, 1 }
 0x1f3   : > { %v6625_v10 = vadd.f32 %v1682_v13, %v6349_v46  ;;  %v1975_v53 = vpop.f32.mrb[134].mxu1  ;;  %v4886_v50 = vpop.f32.mrb[135].mxu0  ;;  %v2700_v46 = vrot.slane %v6396_v16, 1  ;;  %v5402_v42 = vld [vmem:[%s5476_s27 + $0x50] ss:$0 sps:$4 sm:$0x11]  }
 0x1f4   : > { %v6634_v35 = vadd.f32 %v1975_v53, %v6353_v3  ;;  %v4924_v0 = vpop.f32.mrb[135].mxu1  ;;  %v2939_v3 = vrot.slane %v6631_v18, 1  ;;  %v3657_v63 = vor.u32 %v3656_v19, %v3653_v21 }
 0x1f5   : > { %5112 = vmatmul.mubr.msk.bf16.gmra.mrb[240].mxu0 %vm303_vm2, %v2699_v9  ;;  %v2701_v53 = vsel %vm2145_vm4, %v2698_v17, %v2700_v46  ;;  %v5403_v0 = vld [vmem:[%s5471_s24 + $0x50] ss:$0 sps:$4 sm:$0x11]  }
 0x1f6   : > { %5150 = vmatmul.mubr.msk.bf16.gmra.mrb[240].mxu1 %vm303_vm2, %v6628_v47  ;;  %5115 = vmatprep.mubr.msk.bf16.mxu0 %vm5415_vm1, %v7461_v4  ;;  %v6661_v39 = vsel %vm2145_vm4, %v2937_v31, %v2939_v3  ;;  %v2941_v17 = vrot.slane %v5403_v0, 1  ;;  %v3227_v31 = vshrl.u32 %v6407_v56, 16 }
 0x1f7   : > { %5153 = vmatprep.mubr.msk.bf16.mxu1 %vm5415_vm1, %v7461_v4  ;;  %7490 = vst [vmem:[#allocation24_spill] sm:$0xff] %v6661_v39 }
 0x1f8   : > { %v1687_v50 = vpop.f32.mrb[136].mxu0 }
 0x1f9   : > { %v6649_v30 = vadd.f32 %v1687_v50, %v6370_v36  ;;  %v1980_v11 = vpop.f32.mrb[136].mxu1  ;;  %v4889_v26 = vpop.f32.mrb[137].mxu0  ;;  %v3662_v50 = vrot.slane %v3660_v20, 1 }
 0x1fa   : > { %v6653_v13 = vadd.f32 %v1980_v11, %v6375_v58  ;;  %v4927_v9 = vpop.f32.mrb[137].mxu1  ;;  %v1690_v16 = vpop.f32.mrb[138].mxu0  ;;  %v3665_v58 = vrot.slane %v3663_v51, 2  ;;  %v6668_v11 = vsel %vm3225_vm5, %v3648_v15, %v3657_v63 }
 0x1fb   : > { %7487 = vst [vmem:[#allocation21_spill] sm:$0xff] %v6649_v30  ;;  %v6658_v62 = vadd.f32 %v1690_v16, %v6378_v29  ;;  %v1983_v47 = vpop.f32.mrb[138].mxu1  ;;  %v4890_v21 = vpop.f32.mrb[139].mxu0  ;;  %7492 = vst [vmem:[#allocation26_spill] sm:$0xff] %v6668_v11  ;;  %v2702_v29 = vrot.slane %v5402_v42, 1  ;;  %v3669_v9 = vshrl.u32 %v6631_v18, 16 }
 0x1fc   : > { %7488 = vst [vmem:[#allocation22_spill] sm:$0xff] %v6653_v13  ;;  %v6664_v36 = vadd.f32 %v1983_v47, %v6382_v44  ;;  %v4928_v19 = vpop.f32.mrb[139].mxu1  ;;  %v3230_v44 = vshll.u32 %v6407_v56, 16  ;;  %v7493_v47 = vld [vmem:[#allocation3_spill] sm:$0xff]  ;;  %v3666_v26 = vor.u32 %v3665_v58, %v3662_v50  ;;  %v3672_v16 = vshll.u32 %v6631_v18, 16  ;;  %v7497_v58 = vld [vmem:[#allocation4_spill] sm:$0xff] }
 0x1fd   : > { %7489 = vst [vmem:[#allocation23_spill] sm:$0xff] %v6658_v62  ;;  %5116 = vmatmul.mubr.msk.bf16.gmra.mrb[244].mxu0 %vm303_vm2, %v2701_v53  ;;  %v3235_v20 = vshrl.u32 %v7493_v47, 16  ;;  %v3238_v15 = vshll.u32 %v7493_v47, 16  ;;  %v7494_v53 = vld [vmem:[#allocation5_spill] sm:$0xff]  ;;  %v7496_v19 = vld [vmem:[#allocation2_spill] sm:$0xff]  ;;  %v6690_v47 = vsel %vm2145_vm4, %v2939_v3, %v2941_v17  ;;  %v3229_v50 = vrot.slane %v3227_v31, 1 }
 0x1fe   : > { %7491 = vst [vmem:[#allocation25_spill] sm:$0xff] %v6664_v36  ;;  %5154 = vmatmul.mubr.msk.bf16.gmra.mrb[244].mxu1 %vm303_vm2, %v6661_v39  ;;  %5119 = vmatprep.mubr.msk.bf16.mxu0 %vm5415_vm1, %v7461_v4  ;;  %v2703_v36 = vsel %vm2145_vm4, %v2700_v46, %v2702_v29  ;;  %v6700_v46 = vsel %vm3225_vm5, %v3657_v63, %v3666_v26  ;;  %v4395_v17 = vld [vmem:[%s7435_s2 + $0x20] sm:$0xf] }
 0x1ff   : > { %5157 = vmatprep.mubr.msk.bf16.mxu1 %vm5415_vm1, %v7461_v4 }
 0x200   : > { %v1695_v51 = vpop.f32.mrb[140].mxu0 }
 0x201   : > { %v6683_v42 = vadd.f32 %v1695_v51, %v7494_v53  ;;  %v1988_v0 = vpop.f32.mrb[140].mxu1  ;;  %v4893_v21 = vpop.f32.mrb[141].mxu0  ;;  %v3232_v51 = vrot.slane %v3230_v44, 2  ;;  %v3237_v53 = vrot.slane %v3235_v20, 1 }
 0x202   : > { %v6686_v11 = vadd.f32 %v1988_v0, %v7496_v19  ;;  %v4931_v39 = vpop.f32.mrb[141].mxu1  ;;  %v1698_v56 = vpop.f32.mrb[142].mxu0  ;;  %v7498_v21 = vld [vmem:[#allocation12_spill] sm:$0xff]  ;;  %v3674_v19 = vrot.slane %v3672_v16, 2 }
 0x203   : > { %7495 = vst [vmem:[#allocation3_spill] sm:$0xff] %v6683_v42  ;;  %v6693_v62 = vadd.f32 %v1698_v56, %v7497_v58  ;;  %v1991_v18 = vpop.f32.mrb[142].mxu1  ;;  %v4894_v13 = vpop.f32.mrb[143].mxu0  ;;  %v3240_v42 = vrot.slane %v3238_v15, 2  ;;  %v3671_v39 = vrot.slane %v3669_v9, 1  ;;  %v3233_v3 = vor.u32 %v3232_v51, %v3229_v50 }
 0x204   : > { %v6696_v30 = vadd.f32 %v1991_v18, %v7498_v21  ;;  %v4932_v0 = vpop.f32.mrb[143].mxu1  ;;  %v3468_v58 = vsel %vm331_vm0, %v4395_v17, 0 }
 0x205   : > { %5120 = vmatmul.mubr.msk.bf16.gmra.mrb[248].mxu0 %vm303_vm2, %v2703_v36  ;;  %v3241_v13 = vor.u32 %v3240_v42, %v3237_v53  ;;  %v6711_v36 = vor.u32 %v3674_v19, %v3671_v39 }
 0x206   : > { %5158 = vmatmul.mubr.msk.bf16.gmra.mrb[248].mxu1 %vm303_vm2, %v6690_v47  ;;  %5163 = vmatprep.mubr.msk.bf16.mxu0 %vm5415_vm1, %v7461_v4 }
 0x207   : > { %5201 = vmatprep.mubr.msk.bf16.mxu1 %vm5415_vm1, %v7461_v4  ;;  %v6723_v50 = vsel %vm3225_vm5, %v3233_v3, %v3241_v13  ;;  %v7499_v3 = vld [vmem:[#allocation8_spill] sm:$0xff] }
 0x208   : > { %v2052_v29 = vpop.f32.mrb[144].mxu0 }
 0x209   : > { %v6714_v63 = vadd.f32 %v2052_v29, %v6440_v59  ;;  %v2226_v31 = vpop.f32.mrb[144].mxu1  ;;  %v4937_v44 = vpop.f32.mrb[145].mxu0  ;;  %v6752_v29 = vsel %vm3225_vm5, %v3241_v13, %v7499_v3 }
 0x20a   : > { %v6717_v20 = vadd.f32 %v2226_v31, %v6445_v38  ;;  %v4975_v15 = vpop.f32.mrb[145].mxu1  ;;  %v2055_v9 = vpop.f32.mrb[146].mxu0  ;;  %v6733_v38 = vsel %vm3225_vm5, %v3666_v26, %v6711_v36 }
 0x20b   : > { %v6720_v16 = vadd.f32 %v2055_v9, %v6449_v41  ;;  %v2229_v42 = vpop.f32.mrb[146].mxu1  ;;  %v4938_v56 = vpop.f32.mrb[147].mxu0 }
 0x20c   : > { %v6727_v59 = vadd.f32 %v2229_v42, %v6459_v24  ;;  %v4976_v18 = vpop.f32.mrb[147].mxu1 }
 0x20d   : > { %5164 = vmatmul.mubr.msk.bf16.vlgmr.msra.gmra.mrb[252].mxu0 %vm303_vm2, %v6452_v6 }
 0x20e   : > { %5202 = vmatmul.mubr.msk.bf16.vlgmr.msra.gmra.mrb[252].mxu1 %vm303_vm2, %v6723_v50  ;;  %5238 = vmatpush3.bf16.msra.mxu0 %v3468_v58 }
 0x20f   : > { %5276 = vmatpush3.bf16.msra.mxu1 %v3468_v58  ;;  %5167 = vmatprep.mubr.msk.bf16.mxu0 %vm5415_vm1, %v7461_v4 }
 0x210   : > { %v2060_v41 = vpop.f32.mrb[148].mxu0  ;;  %5205 = vmatprep.mubr.msk.bf16.mxu1 %vm5415_vm1, %v7461_v4 }
 0x211   : > { %v6742_v24 = vadd.f32 %v2060_v41, %v6478_v12  ;;  %v2234_v6 = vpop.f32.mrb[148].mxu1  ;;  %v4941_v51 = vpop.f32.mrb[149].mxu0 }
 0x212   : > { %v6745_v26 = vadd.f32 %v2234_v6, %v6482_v5  ;;  %v4979_v53 = vpop.f32.mrb[149].mxu1  ;;  %v2063_v21 = vpop.f32.mrb[150].mxu0 }
 0x213   : > { %v6748_v0 = vadd.f32 %v2063_v21, %v6486_v25  ;;  %v2237_v39 = vpop.f32.mrb[150].mxu1  ;;  %v4942_v19 = vpop.f32.mrb[151].mxu0 }
 0x214   : > { %v6755_v17 = vadd.f32 %v2237_v39, %v6493_v34  ;;  %v4980_v12 = vpop.f32.mrb[151].mxu1 }
 0x215   : > { %5168 = vmatmul.mubr.msk.bf16.gmra.mrb[0].mxu0 %vm303_vm2, %v6489_v49 }
 0x216   : > { %5206 = vmatmul.mubr.msk.bf16.gmra.mrb[0].mxu1 %vm303_vm2, %v6752_v29  ;;  %5171 = vmatprep.mubr.msk.bf16.mxu0 %vm5415_vm1, %v7461_v4 }
 0x217   : > { %5209 = vmatprep.mubr.msk.bf16.mxu1 %vm5415_vm1, %v7461_v4 }
 0x218   : > { %v2068_v5 = vpop.f32.mrb[152].mxu0 }
 0x219   : > { %v6766_v25 = vadd.f32 %v2068_v5, %v6506_v48  ;;  %v2242_v13 = vpop.f32.mrb[152].mxu1  ;;  %v4945_v34 = vpop.f32.mrb[153].mxu0  ;;  %v7500_v48 = vld [vmem:[#allocation9_spill] sm:$0xff] }
 0x21a   : > { %v6769_v31 = vadd.f32 %v2242_v13, %v6509_v14  ;;  %v4983_v44 = vpop.f32.mrb[153].mxu1  ;;  %v2071_v49 = vpop.f32.mrb[154].mxu0 }
 0x21b   : > { %v6772_v15 = vadd.f32 %v2071_v49, %v6513_v61  ;;  %v2245_v9 = vpop.f32.mrb[154].mxu1  ;;  %v4946_v42 = vpop.f32.mrb[155].mxu0 }
 0x21c   : > { %v6775_v56 = vadd.f32 %v2245_v9, %v6520_v40  ;;  %v4984_v58 = vpop.f32.mrb[155].mxu1 }
 0x21d   : > { %5172 = vmatmul.mubr.msk.bf16.gmra.mrb[4].mxu0 %vm303_vm2, %v6516_v22 }
 0x21e   : > { %5210 = vmatmul.mubr.msk.bf16.gmra.mrb[4].mxu1 %vm303_vm2, %v7500_v48  ;;  %5175 = vmatprep.mubr.msk.bf16.mxu0 %vm5415_vm1, %v7461_v4 }
 0x21f   : > { %5213 = vmatprep.mubr.msk.bf16.mxu1 %vm5415_vm1, %v7461_v4 }
 0x220   : > { %v2076_v14 = vpop.f32.mrb[156].mxu0 }
 0x221   : > { %v6786_v61 = vadd.f32 %v2076_v14, %v6534_v60  ;;  %v2250_v18 = vpop.f32.mrb[156].mxu1  ;;  %v4949_v40 = vpop.f32.mrb[157].mxu0  ;;  %v7501_v60 = vld [vmem:[#allocation10_spill] sm:$0xff] }
 0x222   : > { %v6789_v41 = vadd.f32 %v2250_v18, %v6537_v27  ;;  %v4987_v6 = vpop.f32.mrb[157].mxu1  ;;  %v2079_v22 = vpop.f32.mrb[158].mxu0 }
 0x223   : > { %v6792_v51 = vadd.f32 %v2079_v22, %v6541_v8  ;;  %v2253_v53 = vpop.f32.mrb[158].mxu1  ;;  %v4950_v21 = vpop.f32.mrb[159].mxu0 }
 0x224   : > { %v6795_v39 = vadd.f32 %v2253_v53, %v6548_v7  ;;  %v4988_v19 = vpop.f32.mrb[159].mxu1 }
 0x225   : > { %5176 = vmatmul.mubr.msk.bf16.gmra.mrb[8].mxu0 %vm303_vm2, %v6544_v52 }
 0x226   : > { %5214 = vmatmul.mubr.msk.bf16.gmra.mrb[8].mxu1 %vm303_vm2, %v7501_v60  ;;  %5179 = vmatprep.mubr.msk.bf16.mxu0 %vm5415_vm1, %v7461_v4 }
 0x227   : > { %5217 = vmatprep.mubr.msk.bf16.mxu1 %vm5415_vm1, %v7461_v4 }
 0x228   : > { %v2084_v27 = vpop.f32.mrb[160].mxu0 }
 0x229   : > { %v6806_v8 = vadd.f32 %v2084_v27, %v6562_v55  ;;  %v2258_v3 = vpop.f32.mrb[160].mxu1  ;;  %v4953_v7 = vpop.f32.mrb[161].mxu0  ;;  %v7502_v55 = vld [vmem:[#allocation11_spill] sm:$0xff] }
 0x22a   : > { %v6809_v12 = vadd.f32 %v2258_v3, %v6565_v45  ;;  %v4991_v5 = vpop.f32.mrb[161].mxu1  ;;  %v2087_v52 = vpop.f32.mrb[162].mxu0 }
 0x22b   : > { %v6812_v13 = vadd.f32 %v2087_v52, %v6569_v33  ;;  %v2261_v34 = vpop.f32.mrb[162].mxu1  ;;  %v4954_v44 = vpop.f32.mrb[163].mxu0  ;;  %v5404_v52 = vld [vmem:[%s5476_s27 + $0x50] ss:$0 sps:$4 sm:$0x33]  }
 0x22c   : > { %v6815_v49 = vadd.f32 %v2261_v34, %v6576_v2  ;;  %v4992_v9 = vpop.f32.mrb[163].mxu1 }
 0x22d   : > { %5180 = vmatmul.mubr.msk.bf16.gmra.mrb[12].mxu0 %vm303_vm2, %v6572_v54  ;;  %v7504_v9 = vld [vmem:[#allocation19_spill] sm:$0xff] }
 0x22e   : > { %5218 = vmatmul.mubr.msk.bf16.gmra.mrb[12].mxu1 %vm303_vm2, %v7502_v55  ;;  %5183 = vmatprep.mubr.msk.bf16.mxu0 %vm5415_vm1, %v7461_v4 }
 0x22f   : > { %5221 = vmatprep.mubr.msk.bf16.mxu1 %vm5415_vm1, %v7461_v4 }
 0x230   : > { %v2092_v45 = vpop.f32.mrb[164].mxu0 }
 0x231   : > { %v6826_v33 = vadd.f32 %v2092_v45, %v6590_v1  ;;  %v2266_v42 = vpop.f32.mrb[164].mxu1  ;;  %v4957_v2 = vpop.f32.mrb[165].mxu0  ;;  %v7503_v1 = vld [vmem:[#allocation6_spill] sm:$0xff] }
 0x232   : > { %v6829_v58 = vadd.f32 %v2266_v42, %v6593_v32  ;;  %v4995_v14 = vpop.f32.mrb[165].mxu1  ;;  %v2095_v54 = vpop.f32.mrb[166].mxu0  ;;  %v7506_v42 = vld [vmem:[#allocation21_spill] sm:$0xff] }
 0x233   : > { %v6832_v18 = vadd.f32 %v2095_v54, %v6597_v28  ;;  %v2269_v40 = vpop.f32.mrb[166].mxu1  ;;  %v4958_v6 = vpop.f32.mrb[167].mxu0  ;;  %v7507_v54 = vld [vmem:[#allocation22_spill] sm:$0xff] }
 0x234   : > { %v6835_v22 = vadd.f32 %v2269_v40, %v6604_v23  ;;  %v4996_v53 = vpop.f32.mrb[167].mxu1 }
 0x235   : > { %5184 = vmatmul.mubr.msk.bf16.gmra.mrb[16].mxu0 %vm303_vm2, %v6600_v57 }
 0x236   : > { %5222 = vmatmul.mubr.msk.bf16.gmra.mrb[16].mxu1 %vm303_vm2, %v7503_v1  ;;  %5187 = vmatprep.mubr.msk.bf16.mxu0 %vm5415_vm1, %v7461_v4 }
 0x237   : > { %5225 = vmatprep.mubr.msk.bf16.mxu1 %vm5415_vm1, %v7461_v4 }
 0x238   : > { %v2100_v32 = vpop.f32.mrb[168].mxu0 }
 0x239   : > { %v6846_v28 = vadd.f32 %v2100_v32, %v6618_v37  ;;  %v2274_v23 = vpop.f32.mrb[168].mxu1  ;;  %v4961_v21 = vpop.f32.mrb[169].mxu0  ;;  %v7505_v37 = vld [vmem:[#allocation7_spill] sm:$0xff] }
 0x23a   : > { %v6849_v19 = vadd.f32 %v2274_v23, %v6621_v43  ;;  %v4999_v27 = vpop.f32.mrb[169].mxu1  ;;  %v2103_v57 = vpop.f32.mrb[170].mxu0  ;;  %v3307_v43 = vshrl.u32 %v5404_v52, 16  ;;  %v7508_v32 = vld [vmem:[#allocation23_spill] sm:$0xff] }
 0x23b   : > { %v6852_v3 = vadd.f32 %v2103_v57, %v6625_v10  ;;  %v2277_v7 = vpop.f32.mrb[170].mxu1  ;;  %v4962_v5 = vpop.f32.mrb[171].mxu0  ;;  %v3310_v10 = vshll.u32 %v5404_v52, 16 }
 0x23c   : > { %v6856_v34 = vadd.f32 %v2277_v7, %v6634_v35  ;;  %v5000_v44 = vpop.f32.mrb[171].mxu1  ;;  %v3309_v57 = vrot.slane %v3307_v43, 1  ;;  %v7509_v5 = vld [vmem:[#allocation25_spill] sm:$0xff]  ;;  %v7512_v43 = vld [vmem:[#allocation3_spill] sm:$0xff] }
 0x23d   : > { %5188 = vmatmul.mubr.msk.bf16.gmra.mrb[20].mxu0 %vm303_vm2, %v7504_v9  ;;  %v3312_v7 = vrot.slane %v3310_v10, 2  ;;  %v7510_v9 = vld [vmem:[#allocation24_spill] sm:$0xff] }
 0x23e   : > { %5226 = vmatmul.mubr.msk.bf16.gmra.mrb[20].mxu1 %vm303_vm2, %v7505_v37  ;;  %5191 = vmatprep.mubr.msk.bf16.mxu0 %vm5415_vm1, %v7461_v4 }
 0x23f   : > { %5229 = vmatprep.mubr.msk.bf16.mxu1 %vm5415_vm1, %v7461_v4 }
 0x240   : > { %v2108_v45 = vpop.f32.mrb[172].mxu0 }
 0x241   : > { %v6867_v2 = vadd.f32 %v2108_v45, %v7506_v42  ;;  %v2282_v35 = vpop.f32.mrb[172].mxu1  ;;  %v4965_v14 = vpop.f32.mrb[173].mxu0  ;;  %v7511_v45 = vld [vmem:[#allocation14_spill] sm:$0xff]  ;;  %v3313_v42 = vor.u32 %v3312_v7, %v3309_v57 }
 0x242   : > { %v6870_v40 = vadd.f32 %v2282_v35, %v7507_v54  ;;  %v5003_v6 = vpop.f32.mrb[173].mxu1  ;;  %v2111_v53 = vpop.f32.mrb[174].mxu0 }
 0x243   : > { %v6873_v23 = vadd.f32 %v2111_v53, %v7508_v32  ;;  %v2285_v21 = vpop.f32.mrb[174].mxu1  ;;  %v4966_v27 = vpop.f32.mrb[175].mxu0 }
 0x244   : > { %v6876_v52 = vadd.f32 %v2285_v21, %v7509_v5  ;;  %v5004_v44 = vpop.f32.mrb[175].mxu1 }
 0x245   : > { %5192 = vmatmul.mubr.msk.bf16.gmra.mrb[24].mxu0 %vm303_vm2, %v7510_v9  ;;  %v7513_v44 = vld [vmem:[#allocation13_spill] sm:$0xff] }
 0x246   : > { %5230 = vmatmul.mubr.msk.bf16.gmra.mrb[24].mxu1 %vm303_vm2, %v7511_v45  ;;  %5195 = vmatprep.mubr.msk.bf16.mxu0 %vm5415_vm1, %v7461_v4  ;;  %v6897_v9 = vsel %vm3225_vm5, %v7513_v44, %v3313_v42 }
 0x247   : > { %5233 = vmatprep.mubr.msk.bf16.mxu1 %vm5415_vm1, %v7461_v4 }
 0x248   : > { %v2116_v35 = vpop.f32.mrb[176].mxu0 }
 0x249   : > { %v6887_v10 = vadd.f32 %v2116_v35, %v7512_v43  ;;  %v2290_v14 = vpop.f32.mrb[176].mxu1  ;;  %v4969_v54 = vpop.f32.mrb[177].mxu0 }
 0x24a   : > { %v6890_v6 = vadd.f32 %v2290_v14, %v6686_v11  ;;  %v5007_v53 = vpop.f32.mrb[177].mxu1  ;;  %v2119_v32 = vpop.f32.mrb[178].mxu0 }
 0x24b   : > { %v6893_v21 = vadd.f32 %v2119_v32, %v6693_v62  ;;  %v2293_v27 = vpop.f32.mrb[178].mxu1  ;;  %v4970_v5 = vpop.f32.mrb[179].mxu0 }
 0x24c   : > { %v6900_v57 = vadd.f32 %v2293_v27, %v6696_v30  ;;  %v5008_v7 = vpop.f32.mrb[179].mxu1 }
 0x24d   : > { %5196 = vmatmul.mubr.msk.bf16.gmra.mrb[28].mxu0 %vm303_vm2, %v6690_v47 }
 0x24e   : > { %5234 = vmatmul.mubr.msk.bf16.gmra.mrb[28].mxu1 %vm303_vm2, %v6897_v9  ;;  %5239 = vmatprep.mubr.msk.bf16.mxu0 %vm5415_vm1, %v7461_v4 }
 0x24f   : > { %5277 = vmatprep.mubr.msk.bf16.mxu1 %vm5415_vm1, %v7461_v4 }
 0x250   : > { %v2354_v62 = vpop.f32.mrb[180].mxu0 }
 0x251   : > { %v6911_v11 = vadd.f32 %v2354_v62, %v6714_v63  ;;  %v2527_v42 = vpop.f32.mrb[180].mxu1  ;;  %v5013_v30 = vpop.f32.mrb[181].mxu0  ;;  %v7514_v63 = vld [vmem:[#allocation15_spill] sm:$0xff] }
 0x252   : > { %v6914_v35 = vadd.f32 %v2527_v42, %v6717_v20  ;;  %v5051_v43 = vpop.f32.mrb[181].mxu1  ;;  %v2357_v47 = vpop.f32.mrb[182].mxu0 }
 0x253   : > { %v6917_v14 = vadd.f32 %v2357_v47, %v6720_v16  ;;  %v2530_v54 = vpop.f32.mrb[182].mxu1  ;;  %v5014_v53 = vpop.f32.mrb[183].mxu0 }
 0x254   : > { %v6920_v32 = vadd.f32 %v2530_v54, %v6727_v59  ;;  %v5052_v27 = vpop.f32.mrb[183].mxu1 }
 0x255   : > { %5240 = vmatmul.mubr.msk.bf16.vlgmr.msra.gmra.mrb[32].mxu0 %vm303_vm2, %v6723_v50 }
 0x256   : > { %5278 = vmatmul.mubr.msk.bf16.vlgmr.msra.gmra.mrb[32].mxu1 %vm303_vm2, %v7514_v63  ;;  %5243 = vmatprep.mubr.msk.bf16.mxu0 %vm5415_vm1, %v7461_v4 }
 0x257   : > { %5281 = vmatprep.mubr.msk.bf16.mxu1 %vm5415_vm1, %v7461_v4 }
 0x258   : > { %v2362_v20 = vpop.f32.mrb[184].mxu0 }
 0x259   : > { %v6931_v16 = vadd.f32 %v2362_v20, %v6742_v24  ;;  %v2535_v5 = vpop.f32.mrb[184].mxu1  ;;  %v5017_v59 = vpop.f32.mrb[185].mxu0  ;;  %v7515_v24 = vld [vmem:[#allocation16_spill] sm:$0xff] }
 0x25a   : > { %v6934_v44 = vadd.f32 %v2535_v5, %v6745_v26  ;;  %v5055_v7 = vpop.f32.mrb[185].mxu1  ;;  %v2365_v50 = vpop.f32.mrb[186].mxu0 }
 0x25b   : > { %v6937_v62 = vadd.f32 %v2365_v50, %v6748_v0  ;;  %v2538_v42 = vpop.f32.mrb[186].mxu1  ;;  %v5018_v30 = vpop.f32.mrb[187].mxu0 }
 0x25c   : > { %v6940_v43 = vadd.f32 %v2538_v42, %v6755_v17  ;;  %v5056_v47 = vpop.f32.mrb[187].mxu1 }
 0x25d   : > { %5244 = vmatmul.mubr.msk.bf16.gmra.mrb[36].mxu0 %vm303_vm2, %v6752_v29 }
 0x25e   : > { %5282 = vmatmul.mubr.msk.bf16.gmra.mrb[36].mxu1 %vm303_vm2, %v7515_v24  ;;  %5247 = vmatprep.mubr.msk.bf16.mxu0 %vm5415_vm1, %v7461_v4 }
 0x25f   : > { %5285 = vmatprep.mubr.msk.bf16.mxu1 %vm5415_vm1, %v7461_v4 }
 0x260   : > { %v2370_v26 = vpop.f32.mrb[188].mxu0 }
 0x261   : > { %v6951_v0 = vadd.f32 %v2370_v26, %v6766_v25  ;;  %v2543_v54 = vpop.f32.mrb[188].mxu1  ;;  %v5021_v17 = vpop.f32.mrb[189].mxu0  ;;  %v7516_v25 = vld [vmem:[#allocation17_spill] sm:$0xff] }
 0x262   : > { %v6954_v53 = vadd.f32 %v2543_v54, %v6769_v31  ;;  %v5059_v27 = vpop.f32.mrb[189].mxu1  ;;  %v2373_v29 = vpop.f32.mrb[190].mxu0 }
 0x263   : > { %v6957_v63 = vadd.f32 %v2373_v29, %v6772_v15  ;;  %v2546_v20 = vpop.f32.mrb[190].mxu1  ;;  %v5022_v5 = vpop.f32.mrb[191].mxu0 }
 0x264   : > { %v6960_v59 = vadd.f32 %v2546_v20, %v6775_v56  ;;  %v5060_v7 = vpop.f32.mrb[191].mxu1 }
 0x265   : > { %5248 = vmatmul.mubr.msk.bf16.gmra.mrb[40].mxu0 %vm303_vm2, %v7500_v48 }
 0x266   : > { %5286 = vmatmul.mubr.msk.bf16.gmra.mrb[40].mxu1 %vm303_vm2, %v7516_v25  ;;  %5251 = vmatprep.mubr.msk.bf16.mxu0 %vm5415_vm1, %v7461_v4 }
 0x267   : > { %5289 = vmatprep.mubr.msk.bf16.mxu1 %vm5415_vm1, %v7461_v4 }
 0x268   : > { %v2378_v31 = vpop.f32.mrb[192].mxu0 }
 0x269   : > { %v6971_v15 = vadd.f32 %v2378_v31, %v6786_v61  ;;  %v2551_v50 = vpop.f32.mrb[192].mxu1  ;;  %v5025_v56 = vpop.f32.mrb[193].mxu0  ;;  %v7517_v61 = vld [vmem:[#allocation18_spill] sm:$0xff] }
 0x26a   : > { %v6974_v42 = vadd.f32 %v2551_v50, %v6789_v41  ;;  %v5063_v30 = vpop.f32.mrb[193].mxu1  ;;  %v2381_v48 = vpop.f32.mrb[194].mxu0 }
 0x26b   : > { %v6977_v47 = vadd.f32 %v2381_v48, %v6792_v51  ;;  %v2554_v24 = vpop.f32.mrb[194].mxu1  ;;  %v5026_v26 = vpop.f32.mrb[195].mxu0 }
 0x26c   : > { %v6980_v54 = vadd.f32 %v2554_v24, %v6795_v39  ;;  %v5064_v17 = vpop.f32.mrb[195].mxu1 }
 0x26d   : > { %5252 = vmatmul.mubr.msk.bf16.gmra.mrb[44].mxu0 %vm303_vm2, %v7501_v60 }
 0x26e   : > { %5290 = vmatmul.mubr.msk.bf16.gmra.mrb[44].mxu1 %vm303_vm2, %v7517_v61  ;;  %5255 = vmatprep.mubr.msk.bf16.mxu0 %vm5415_vm1, %v7461_v4 }
 0x26f   : > { %5293 = vmatprep.mubr.msk.bf16.mxu1 %vm5415_vm1, %v7461_v4 }
 0x270   : > { %v2386_v41 = vpop.f32.mrb[196].mxu0 }
 0x271   : > { %v6991_v51 = vadd.f32 %v2386_v41, %v6806_v8  ;;  %v2559_v27 = vpop.f32.mrb[196].mxu1  ;;  %v5029_v39 = vpop.f32.mrb[197].mxu0  ;;  %v7518_v8 = vld [vmem:[#allocation20_spill] sm:$0xff] }
 0x272   : > { %v6994_v29 = vadd.f32 %v2559_v27, %v6809_v12  ;;  %v5067_v20 = vpop.f32.mrb[197].mxu1  ;;  %v2389_v60 = vpop.f32.mrb[198].mxu0 }
 0x273   : > { %v6997_v5 = vadd.f32 %v2389_v60, %v6812_v13  ;;  %v2562_v7 = vpop.f32.mrb[198].mxu1  ;;  %v5030_v25 = vpop.f32.mrb[199].mxu0 }
 0x274   : > { %v7000_v31 = vadd.f32 %v2562_v7, %v6815_v49  ;;  %v5068_v50 = vpop.f32.mrb[199].mxu1 }
 0x275   : > { %5256 = vmatmul.mubr.msk.bf16.gmra.mrb[48].mxu0 %vm303_vm2, %v7502_v55  ;;  %v5405_v50 = vld [vmem:[%s5471_s24 + $0x50] ss:$0 sps:$4 sm:$0x33]  }
 0x276   : > { %5294 = vmatmul.mubr.msk.bf16.gmra.mrb[48].mxu1 %vm303_vm2, %v7518_v8  ;;  %5259 = vmatprep.mubr.msk.bf16.mxu0 %vm5415_vm1, %v7461_v4 }
 0x277   : > { %5297 = vmatprep.mubr.msk.bf16.mxu1 %vm5415_vm1, %v7461_v4 }
 0x278   : > { %v2394_v12 = vpop.f32.mrb[200].mxu0 }
 0x279   : > { %v7011_v13 = vadd.f32 %v2394_v12, %v6826_v33  ;;  %v2567_v56 = vpop.f32.mrb[200].mxu1  ;;  %v5033_v49 = vpop.f32.mrb[201].mxu0  ;;  %v7519_v33 = vld [vmem:[#allocation26_spill] sm:$0xff] }
 0x27a   : > { %v7014_v30 = vadd.f32 %v2567_v56, %v6829_v58  ;;  %v5071_v48 = vpop.f32.mrb[201].mxu1  ;;  %v2397_v55 = vpop.f32.mrb[202].mxu0 }
 0x27b   : > { %v7017_v24 = vadd.f32 %v2397_v55, %v6832_v18  ;;  %v2570_v26 = vpop.f32.mrb[202].mxu1  ;;  %v5034_v17 = vpop.f32.mrb[203].mxu0 }
 0x27c   : > { %v7020_v61 = vadd.f32 %v2570_v26, %v6835_v22  ;;  %v5072_v41 = vpop.f32.mrb[203].mxu1 }
 0x27d   : > { %5260 = vmatmul.mubr.msk.bf16.gmra.mrb[52].mxu0 %vm303_vm2, %v7503_v1 }
 0x27e   : > { %5298 = vmatmul.mubr.msk.bf16.gmra.mrb[52].mxu1 %vm303_vm2, %v7519_v33  ;;  %5263 = vmatprep.mubr.msk.bf16.mxu0 %vm5415_vm1, %v7461_v4 }
 0x27f   : > { %5301 = vmatprep.mubr.msk.bf16.mxu1 %vm5415_vm1, %v7461_v4 }
 0x280   : > { %v2402_v58 = vpop.f32.mrb[204].mxu0 }
 0x281   : > { %v7031_v18 = vadd.f32 %v2402_v58, %v6846_v28  ;;  %v2575_v22 = vpop.f32.mrb[204].mxu1  ;;  %v5037_v27 = vpop.f32.mrb[205].mxu0  ;;  %v3678_v28 = vshrl.u32 %v5405_v50, 16 }
 0x282   : > { %v7034_v39 = vadd.f32 %v2575_v22, %v6849_v19  ;;  %v5075_v20 = vpop.f32.mrb[205].mxu1  ;;  %v2405_v1 = vpop.f32.mrb[206].mxu0  ;;  %v3681_v19 = vshll.u32 %v5405_v50, 16 }
 0x283   : > { %v7037_v60 = vadd.f32 %v2405_v1, %v6852_v3  ;;  %v2578_v7 = vpop.f32.mrb[206].mxu1  ;;  %v5038_v25 = vpop.f32.mrb[207].mxu0  ;;  %v3680_v41 = vrot.slane %v3678_v28, 1 }
 0x284   : > { %v7041_v8 = vadd.f32 %v2578_v7, %v6856_v34  ;;  %v5076_v12 = vpop.f32.mrb[207].mxu1  ;;  %v3683_v33 = vrot.slane %v3681_v19, 2 }
 0x285   : > { %5264 = vmatmul.mubr.msk.bf16.gmra.mrb[56].mxu0 %vm303_vm2, %v7505_v37 }
 0x286   : > { %5302 = vmatmul.mubr.msk.bf16.gmra.mrb[56].mxu1 %vm303_vm2, %v6700_v46  ;;  %5267 = vmatprep.mubr.msk.bf16.mxu0 %vm5415_vm1, %v7461_v4 }
 0x287   : > { %5305 = vmatprep.mubr.msk.bf16.mxu1 %vm5415_vm1, %v7461_v4 }
 0x288   : > { %v2410_v3 = vpop.f32.mrb[208].mxu0 }
 0x289   : > { %v7052_v56 = vadd.f32 %v2410_v3, %v6867_v2  ;;  %v2583_v34 = vpop.f32.mrb[208].mxu1  ;;  %v5041_v49 = vpop.f32.mrb[209].mxu0  ;;  %v3684_v2 = vor.u32 %v3683_v33, %v3680_v41 }
 0x28a   : > { %v7055_v48 = vadd.f32 %v2583_v34, %v6870_v40  ;;  %v5079_v37 = vpop.f32.mrb[209].mxu1  ;;  %v2413_v55 = vpop.f32.mrb[210].mxu0 }
 0x28b   : > { %v7058_v46 = vadd.f32 %v2413_v55, %v6873_v23  ;;  %v2586_v26 = vpop.f32.mrb[210].mxu1  ;;  %v5042_v17 = vpop.f32.mrb[211].mxu0 }
 0x28c   : > { %v7061_v58 = vadd.f32 %v2586_v26, %v6876_v52  ;;  %v5080_v22 = vpop.f32.mrb[211].mxu1 }
 0x28d   : > { %5268 = vmatmul.mubr.msk.bf16.gmra.mrb[60].mxu0 %vm303_vm2, %v7511_v45 }
 0x28e   : > { %5306 = vmatmul.mubr.msk.bf16.gmra.mrb[60].mxu1 %vm303_vm2, %v6733_v38  ;;  %5271 = vmatprep.mubr.msk.bf16.mxu0 %vm5415_vm1, %v7461_v4 }
 0x28f   : > { %5309 = vmatprep.mubr.msk.bf16.mxu1 %vm5415_vm1, %v7461_v4  ;;  %v3685_v4 = vsel %vm3225_vm5, %v6711_v36, %v3684_v2 }
 0x290   : > { %v2418_v40 = vpop.f32.mrb[212].mxu0 }
 0x291   : > { %v7072_v23 = vadd.f32 %v2418_v40, %v6887_v10  ;;  %v2591_v52 = vpop.f32.mrb[212].mxu1  ;;  %v5045_v27 = vpop.f32.mrb[213].mxu0 }
 0x292   : > { %v7075_v20 = vadd.f32 %v2591_v52, %v6890_v6  ;;  %v5083_v45 = vpop.f32.mrb[213].mxu1  ;;  %v2421_v1 = vpop.f32.mrb[214].mxu0 }
 0x293   : > { %v7078_v38 = vadd.f32 %v2421_v1, %v6893_v21  ;;  %v2594_v7 = vpop.f32.mrb[214].mxu1  ;;  %v5046_v25 = vpop.f32.mrb[215].mxu0 }
 0x294   : > { %v7083_v50 = vadd.f32 %v2594_v7, %v6900_v57  ;;  %v5084_v10 = vpop.f32.mrb[215].mxu1 }
 0x295   : > { %5272 = vmatmul.mubr.msk.bf16.gmra.mrb[64].mxu0 %vm303_vm2, %v6897_v9 }
 0x296   : > { %5310 = vmatmul.mubr.msk.bf16.gmra.mrb[64].mxu1 %vm303_vm2, %v3685_v4 }
 0x298   : > { %v2768_v6 = vpop.f32.mrb[216].mxu0 }
 0x299   : > { %v7089_v12 = vadd.f32 %v2768_v6, %v6911_v11  ;;  %v3004_v21 = vpop.f32.mrb[216].mxu1  ;;  %v5089_v28 = vpop.f32.mrb[217].mxu0 }
 0x29a   : > { %v7092_v19 = vadd.f32 %v3004_v21, %v6914_v35  ;;  %v5127_v3 = vpop.f32.mrb[217].mxu1  ;;  %v2771_v36 = vpop.f32.mrb[218].mxu0 }
 0x29b   : > { %v7095_v57 = vadd.f32 %v2771_v36, %v6917_v14  ;;  %v3007_v34 = vpop.f32.mrb[218].mxu1  ;;  %v5090_v49 = vpop.f32.mrb[219].mxu0 }
 0x29c   : > { %v7098_v9 = vadd.f32 %v3007_v34, %v6920_v32  ;;  %v5128_v37 = vpop.f32.mrb[219].mxu1 }
 0x2a0   : > { %v2776_v55 = vpop.f32.mrb[220].mxu0 }
 0x2a1   : > { %v7101_v11 = vadd.f32 %v2776_v55, %v6931_v16  ;;  %v3012_v26 = vpop.f32.mrb[220].mxu1  ;;  %v5093_v17 = vpop.f32.mrb[221].mxu0 }
 0x2a2   : > { %v7104_v35 = vadd.f32 %v3012_v26, %v6934_v44  ;;  %v5131_v41 = vpop.f32.mrb[221].mxu1  ;;  %v2779_v33 = vpop.f32.mrb[222].mxu0 }
 0x2a3   : > { %v7107_v14 = vadd.f32 %v2779_v33, %v6937_v62  ;;  %v3015_v22 = vpop.f32.mrb[222].mxu1  ;;  %v5094_v2 = vpop.f32.mrb[223].mxu0 }
 0x2a4   : > { %v7110_v32 = vadd.f32 %v3015_v22, %v6940_v43  ;;  %v5132_v40 = vpop.f32.mrb[223].mxu1 }
 0x2a8   : > { %v2784_v52 = vpop.f32.mrb[224].mxu0 }
 0x2a9   : > { %v7113_v16 = vadd.f32 %v2784_v52, %v6951_v0  ;;  %v3020_v27 = vpop.f32.mrb[224].mxu1  ;;  %v5097_v45 = vpop.f32.mrb[225].mxu0 }
 0x2aa   : > { %v7116_v44 = vadd.f32 %v3020_v27, %v6954_v53  ;;  %v5135_v1 = vpop.f32.mrb[225].mxu1  ;;  %v2787_v7 = vpop.f32.mrb[226].mxu0 }
 0x2ab   : > { %v7119_v62 = vadd.f32 %v2787_v7, %v6957_v63  ;;  %v3023_v25 = vpop.f32.mrb[226].mxu1  ;;  %v5098_v4 = vpop.f32.mrb[227].mxu0 }
 0x2ac   : > { %v7122_v43 = vadd.f32 %v3023_v25, %v6960_v59  ;;  %v5136_v10 = vpop.f32.mrb[227].mxu1 }
 0x2b0   : > { %v2792_v6 = vpop.f32.mrb[228].mxu0 }
 0x2b1   : > { %v7125_v0 = vadd.f32 %v2792_v6, %v6971_v15  ;;  %v3028_v21 = vpop.f32.mrb[228].mxu1  ;;  %v5101_v28 = vpop.f32.mrb[229].mxu0 }
 0x2b2   : > { %v7128_v53 = vadd.f32 %v3028_v21, %v6974_v42  ;;  %v5139_v3 = vpop.f32.mrb[229].mxu1  ;;  %v2795_v36 = vpop.f32.mrb[230].mxu0 }
 0x2b3   : > { %v7131_v63 = vadd.f32 %v2795_v36, %v6977_v47  ;;  %v3031_v34 = vpop.f32.mrb[230].mxu1  ;;  %v5102_v49 = vpop.f32.mrb[231].mxu0 }
 0x2b4   : > { %v7134_v59 = vadd.f32 %v3031_v34, %v6980_v54  ;;  %v5140_v37 = vpop.f32.mrb[231].mxu1 }
 0x2b8   : > { %v2800_v55 = vpop.f32.mrb[232].mxu0 }
 0x2b9   : > { %v7137_v15 = vadd.f32 %v2800_v55, %v6991_v51  ;;  %v3036_v26 = vpop.f32.mrb[232].mxu1  ;;  %v5105_v17 = vpop.f32.mrb[233].mxu0 }
 0x2ba   : > { %v7140_v42 = vadd.f32 %v3036_v26, %v6994_v29  ;;  %v5143_v41 = vpop.f32.mrb[233].mxu1  ;;  %v2803_v33 = vpop.f32.mrb[234].mxu0 }
 0x2bb   : > { %v7143_v47 = vadd.f32 %v2803_v33, %v6997_v5  ;;  %v3039_v22 = vpop.f32.mrb[234].mxu1  ;;  %v5106_v2 = vpop.f32.mrb[235].mxu0 }
 0x2bc   : > { %v7146_v54 = vadd.f32 %v3039_v22, %v7000_v31  ;;  %v5144_v40 = vpop.f32.mrb[235].mxu1 }
 0x2c0   : > { %v2808_v52 = vpop.f32.mrb[236].mxu0 }
 0x2c1   : > { %v7149_v51 = vadd.f32 %v2808_v52, %v7011_v13  ;;  %v3044_v27 = vpop.f32.mrb[236].mxu1  ;;  %v5109_v45 = vpop.f32.mrb[237].mxu0 }
 0x2c2   : > { %v7152_v29 = vadd.f32 %v3044_v27, %v7014_v30  ;;  %v5147_v1 = vpop.f32.mrb[237].mxu1  ;;  %v2811_v7 = vpop.f32.mrb[238].mxu0 }
 0x2c3   : > { %v7155_v5 = vadd.f32 %v2811_v7, %v7017_v24  ;;  %v3047_v25 = vpop.f32.mrb[238].mxu1  ;;  %v5110_v4 = vpop.f32.mrb[239].mxu0 }
 0x2c4   : > { %v7158_v31 = vadd.f32 %v3047_v25, %v7020_v61  ;;  %v5148_v10 = vpop.f32.mrb[239].mxu1 }
 0x2c8   : > { %v2816_v6 = vpop.f32.mrb[240].mxu0 }
 0x2c9   : > { %v7161_v13 = vadd.f32 %v2816_v6, %v7031_v18  ;;  %v3052_v21 = vpop.f32.mrb[240].mxu1  ;;  %v5113_v28 = vpop.f32.mrb[241].mxu0 }
 0x2ca   : > { %v7164_v30 = vadd.f32 %v3052_v21, %v7034_v39  ;;  %v5151_v3 = vpop.f32.mrb[241].mxu1  ;;  %v2819_v36 = vpop.f32.mrb[242].mxu0 }
 0x2cb   : > { %v7167_v24 = vadd.f32 %v2819_v36, %v7037_v60  ;;  %v3055_v34 = vpop.f32.mrb[242].mxu1  ;;  %v5114_v49 = vpop.f32.mrb[243].mxu0 }
 0x2cc   : > { %v7170_v61 = vadd.f32 %v3055_v34, %v7041_v8  ;;  %v5152_v37 = vpop.f32.mrb[243].mxu1 }
 0x2d0   : > { %v2824_v55 = vpop.f32.mrb[244].mxu0 }
 0x2d1   : > { %v7173_v18 = vadd.f32 %v2824_v55, %v7052_v56  ;;  %v3060_v26 = vpop.f32.mrb[244].mxu1  ;;  %v5117_v17 = vpop.f32.mrb[245].mxu0 }
 0x2d2   : > { %v7176_v39 = vadd.f32 %v3060_v26, %v7055_v48  ;;  %v5155_v41 = vpop.f32.mrb[245].mxu1  ;;  %v2827_v33 = vpop.f32.mrb[246].mxu0 }
 0x2d3   : > { %v7179_v60 = vadd.f32 %v2827_v33, %v7058_v46  ;;  %v3063_v22 = vpop.f32.mrb[246].mxu1  ;;  %v5118_v2 = vpop.f32.mrb[247].mxu0 }
 0x2d4   : > { %v7182_v8 = vadd.f32 %v3063_v22, %v7061_v58  ;;  %v5156_v40 = vpop.f32.mrb[247].mxu1 }
 0x2d8   : > { %v2832_v52 = vpop.f32.mrb[248].mxu0 }
 0x2d9   : > { %v7185_v56 = vadd.f32 %v2832_v52, %v7072_v23  ;;  %v3068_v27 = vpop.f32.mrb[248].mxu1  ;;  %v5121_v45 = vpop.f32.mrb[249].mxu0 }
 0x2da   : > { %v7188_v48 = vadd.f32 %v3068_v27, %v7075_v20  ;;  %v5159_v1 = vpop.f32.mrb[249].mxu1  ;;  %v2835_v7 = vpop.f32.mrb[250].mxu0 }
 0x2db   : > { %v7191_v46 = vadd.f32 %v2835_v7, %v7078_v38  ;;  %v3071_v25 = vpop.f32.mrb[250].mxu1  ;;  %v5122_v4 = vpop.f32.mrb[251].mxu0 }
 0x2dc   : > { %v7194_v58 = vadd.f32 %v3071_v25, %v7083_v50  ;;  %v5160_v10 = vpop.f32.mrb[251].mxu1 }
 0x2e0   : > { %v3132_v6 = vpop.f32.mrb[252].mxu0 }
 0x2e1   : > { %v7197_v23 = vadd.f32 %v3132_v6, %v7089_v12  ;;  %v3376_v21 = vpop.f32.mrb[252].mxu1  ;;  %v5165_v28 = vpop.f32.mrb[253].mxu0 }
 0x2e2   : > { %v7200_v20 = vadd.f32 %v3376_v21, %v7092_v19  ;;  %v5203_v3 = vpop.f32.mrb[253].mxu1  ;;  %v3135_v36 = vpop.f32.mrb[254].mxu0 }
 0x2e3   : > { %v7203_v38 = vadd.f32 %v3135_v36, %v7095_v57  ;;  %v3379_v34 = vpop.f32.mrb[254].mxu1  ;;  %v5166_v49 = vpop.f32.mrb[255].mxu0 }
 0x2e4   : > { %v7206_v50 = vadd.f32 %v3379_v34, %v7098_v9  ;;  %v5204_v37 = vpop.f32.mrb[255].mxu1 }
 0x2e8   : > { %v3140_v55 = vpop.f32.mrb[0].mxu0 }
 0x2e9   : > { %v7209_v12 = vadd.f32 %v3140_v55, %v7101_v11  ;;  %v3384_v26 = vpop.f32.mrb[0].mxu1  ;;  %v5169_v17 = vpop.f32.mrb[1].mxu0 }
 0x2ea   : > { %v7212_v19 = vadd.f32 %v3384_v26, %v7104_v35  ;;  %v5207_v41 = vpop.f32.mrb[1].mxu1  ;;  %v3143_v33 = vpop.f32.mrb[2].mxu0 }
 0x2eb   : > { %v7215_v57 = vadd.f32 %v3143_v33, %v7107_v14  ;;  %v3387_v22 = vpop.f32.mrb[2].mxu1  ;;  %v5170_v2 = vpop.f32.mrb[3].mxu0 }
 0x2ec   : > { %v7218_v9 = vadd.f32 %v3387_v22, %v7110_v32  ;;  %v5208_v40 = vpop.f32.mrb[3].mxu1 }
 0x2f0   : > { %v3148_v52 = vpop.f32.mrb[4].mxu0 }
 0x2f1   : > { %v7221_v11 = vadd.f32 %v3148_v52, %v7113_v16  ;;  %v3392_v27 = vpop.f32.mrb[4].mxu1  ;;  %v5173_v45 = vpop.f32.mrb[5].mxu0 }
 0x2f2   : > { %v7224_v35 = vadd.f32 %v3392_v27, %v7116_v44  ;;  %v5211_v1 = vpop.f32.mrb[5].mxu1  ;;  %v3151_v7 = vpop.f32.mrb[6].mxu0 }
 0x2f3   : > { %v7227_v14 = vadd.f32 %v3151_v7, %v7119_v62  ;;  %v3395_v25 = vpop.f32.mrb[6].mxu1  ;;  %v5174_v4 = vpop.f32.mrb[7].mxu0 }
 0x2f4   : > { %v7230_v32 = vadd.f32 %v3395_v25, %v7122_v43  ;;  %v5212_v10 = vpop.f32.mrb[7].mxu1 }
 0x2f8   : > { %v3156_v6 = vpop.f32.mrb[8].mxu0 }
 0x2f9   : > { %v7233_v16 = vadd.f32 %v3156_v6, %v7125_v0  ;;  %v3400_v21 = vpop.f32.mrb[8].mxu1  ;;  %v5177_v28 = vpop.f32.mrb[9].mxu0 }
 0x2fa   : > { %v7236_v44 = vadd.f32 %v3400_v21, %v7128_v53  ;;  %v5215_v3 = vpop.f32.mrb[9].mxu1  ;;  %v3159_v36 = vpop.f32.mrb[10].mxu0 }
 0x2fb   : > { %v7239_v62 = vadd.f32 %v3159_v36, %v7131_v63  ;;  %v3403_v34 = vpop.f32.mrb[10].mxu1  ;;  %v5178_v49 = vpop.f32.mrb[11].mxu0 }
 0x2fc   : > { %v7242_v43 = vadd.f32 %v3403_v34, %v7134_v59  ;;  %v5216_v37 = vpop.f32.mrb[11].mxu1 }
 0x300   : > { %v3164_v55 = vpop.f32.mrb[12].mxu0 }
 0x301   : > { %v7245_v0 = vadd.f32 %v3164_v55, %v7137_v15  ;;  %v3408_v26 = vpop.f32.mrb[12].mxu1  ;;  %v5181_v17 = vpop.f32.mrb[13].mxu0 }
 0x302   : > { %v7248_v53 = vadd.f32 %v3408_v26, %v7140_v42  ;;  %v5219_v41 = vpop.f32.mrb[13].mxu1  ;;  %v3167_v33 = vpop.f32.mrb[14].mxu0 }
 0x303   : > { %v7251_v63 = vadd.f32 %v3167_v33, %v7143_v47  ;;  %v3411_v22 = vpop.f32.mrb[14].mxu1  ;;  %v5182_v2 = vpop.f32.mrb[15].mxu0 }
 0x304   : > { %v7254_v59 = vadd.f32 %v3411_v22, %v7146_v54  ;;  %v5220_v40 = vpop.f32.mrb[15].mxu1 }
 0x308   : > { %v3172_v52 = vpop.f32.mrb[16].mxu0 }
 0x309   : > { %v7257_v15 = vadd.f32 %v3172_v52, %v7149_v51  ;;  %v3416_v27 = vpop.f32.mrb[16].mxu1  ;;  %v5185_v45 = vpop.f32.mrb[17].mxu0 }
 0x30a   : > { %v7260_v42 = vadd.f32 %v3416_v27, %v7152_v29  ;;  %v5223_v1 = vpop.f32.mrb[17].mxu1  ;;  %v3175_v7 = vpop.f32.mrb[18].mxu0 }
 0x30b   : > { %v7263_v47 = vadd.f32 %v3175_v7, %v7155_v5  ;;  %v3419_v25 = vpop.f32.mrb[18].mxu1  ;;  %v5186_v4 = vpop.f32.mrb[19].mxu0 }
 0x30c   : > { %v7266_v54 = vadd.f32 %v3419_v25, %v7158_v31  ;;  %v5224_v10 = vpop.f32.mrb[19].mxu1 }
 0x310   : > { %v3180_v6 = vpop.f32.mrb[20].mxu0 }
 0x311   : > { %v7269_v51 = vadd.f32 %v3180_v6, %v7161_v13  ;;  %v3424_v21 = vpop.f32.mrb[20].mxu1  ;;  %v5189_v28 = vpop.f32.mrb[21].mxu0 }
 0x312   : > { %v7272_v29 = vadd.f32 %v3424_v21, %v7164_v30  ;;  %v5227_v3 = vpop.f32.mrb[21].mxu1  ;;  %v3183_v36 = vpop.f32.mrb[22].mxu0 }
 0x313   : > { %v7275_v5 = vadd.f32 %v3183_v36, %v7167_v24  ;;  %v3427_v34 = vpop.f32.mrb[22].mxu1  ;;  %v5190_v49 = vpop.f32.mrb[23].mxu0 }
 0x314   : > { %v7278_v31 = vadd.f32 %v3427_v34, %v7170_v61  ;;  %v5228_v37 = vpop.f32.mrb[23].mxu1 }
 0x318   : > { %v3188_v55 = vpop.f32.mrb[24].mxu0 }
 0x319   : > { %v7281_v13 = vadd.f32 %v3188_v55, %v7173_v18  ;;  %v3432_v26 = vpop.f32.mrb[24].mxu1  ;;  %v5193_v17 = vpop.f32.mrb[25].mxu0 }
 0x31a   : > { %v7284_v30 = vadd.f32 %v3432_v26, %v7176_v39  ;;  %v5231_v41 = vpop.f32.mrb[25].mxu1  ;;  %v3191_v33 = vpop.f32.mrb[26].mxu0 }
 0x31b   : > { %v7287_v24 = vadd.f32 %v3191_v33, %v7179_v60  ;;  %v3435_v22 = vpop.f32.mrb[26].mxu1  ;;  %v5194_v2 = vpop.f32.mrb[27].mxu0 }
 0x31c   : > { %v7290_v61 = vadd.f32 %v3435_v22, %v7182_v8  ;;  %v5232_v40 = vpop.f32.mrb[27].mxu1 }
 0x320   : > { %v3196_v52 = vpop.f32.mrb[28].mxu0 }
 0x321   : > { %v7293_v18 = vadd.f32 %v3196_v52, %v7185_v56  ;;  %v3440_v27 = vpop.f32.mrb[28].mxu1  ;;  %v5197_v45 = vpop.f32.mrb[29].mxu0  ;;  %v7307_v56 = vld [vmem:[%s7436_s3] ss:$0 sm:$0xff] }
 0x322   : > { %v7296_v39 = vadd.f32 %v3440_v27, %v7188_v48  ;;  %v5235_v1 = vpop.f32.mrb[29].mxu1  ;;  %v3199_v7 = vpop.f32.mrb[30].mxu0 }
 0x323   : > { %v7299_v60 = vadd.f32 %v3199_v7, %v7191_v46  ;;  %v3443_v25 = vpop.f32.mrb[30].mxu1  ;;  %v5198_v4 = vpop.f32.mrb[31].mxu0 }
 0x324   : > { %v7302_v8 = vadd.f32 %v3443_v25, %v7194_v58  ;;  %v5236_v10 = vpop.f32.mrb[31].mxu1 }
 0x328   : > { %v3504_v6 = vpop.f32.mrb[32].mxu0 }
 0x329   : > { %v3575_v48 = vadd.f32 %v3504_v6, %v7197_v23  ;;  %v3747_v21 = vpop.f32.mrb[32].mxu1  ;;  %v5241_v28 = vpop.f32.mrb[33].mxu0 }
 0x32a   : > { %v3818_v3 = vadd.f32 %v3747_v21, %v7200_v20  ;;  %v5279_v46 = vpop.f32.mrb[33].mxu1  ;;  %v3507_v36 = vpop.f32.mrb[34].mxu0 }
 0x32b   : > { %v3843_v34 = vadd.f32 %v7307_v56, %v3575_v48  ;;  %v3576_v58 = vadd.f32 %v3507_v36, %v7203_v38  ;;  %v3750_v49 = vpop.f32.mrb[34].mxu1  ;;  %v5242_v37 = vpop.f32.mrb[35].mxu0 }
 0x32c   : > { %v3879_v55 = vadd.f32 %v7307_v56, %v3818_v3  ;;  %v3819_v26 = vadd.f32 %v3750_v49, %v7206_v50  ;;  %v5280_v17 = vpop.f32.mrb[35].mxu1 }
 0x32d   : > { %v3861_v41 = vmax.f32 %v3843_v34, 0.0  ;;  %v3844_v23 = vadd.f32 %v7307_v56, %v3576_v58 }
 0x32e   : > { %v3897_v33 = vmax.f32 %v3879_v55, 0.0  ;;  %v3880_v22 = vadd.f32 %v7307_v56, %v3819_v26 }
 0x32f   : > { %v3862_v20 = vmax.f32 %v3844_v23, 0.0 }
 0x330   : > { %v3915_v2 = vmax.f32 %v3861_v41, %v3897_v33  ;;  %v3898_v40 = vmax.f32 %v3880_v22, 0.0  ;;  %v3512_v52 = vpop.f32.mrb[36].mxu0 }
 0x331   : > { %v3577_v27 = vadd.f32 %v3512_v52, %v7209_v12  ;;  %v3755_v38 = vpop.f32.mrb[36].mxu1  ;;  %v5245_v45 = vpop.f32.mrb[37].mxu0 }
 0x332   : > { %v3916_v1 = vmax.f32 %v3862_v20, %v3898_v40  ;;  %v3820_v7 = vadd.f32 %v3755_v38, %v7212_v19  ;;  %v5283_v25 = vpop.f32.mrb[37].mxu1  ;;  %v3515_v50 = vpop.f32.mrb[38].mxu0 }
 0x333   : > { %v3845_v4 = vadd.f32 %v7307_v56, %v3577_v27  ;;  %v3578_v10 = vadd.f32 %v3515_v50, %v7215_v57  ;;  %v3758_v6 = vpop.f32.mrb[38].mxu1  ;;  %v5246_v48 = vpop.f32.mrb[39].mxu0 }
 0x334   : > { %v3881_v21 = vadd.f32 %v7307_v56, %v3820_v7  ;;  %v3821_v28 = vadd.f32 %v3758_v6, %v7218_v9  ;;  %v5284_v3 = vpop.f32.mrb[39].mxu1  ;;  %v3936_v17 = vrot.slane %v3916_v1, 1 }
 0x335   : > { %v3863_v46 = vmax.f32 %v3845_v4, 0.0  ;;  %v3846_v12 = vadd.f32 %v7307_v56, %v3578_v10 }
 0x336   : > { %v3899_v36 = vmax.f32 %v3881_v21, 0.0  ;;  %v3882_v19 = vadd.f32 %v7307_v56, %v3821_v28 }
 0x337   : > { %v3864_v34 = vmax.f32 %v3846_v12, 0.0 }
 0x338   : > { %v3917_v58 = vmax.f32 %v3863_v46, %v3899_v36  ;;  %v3900_v49 = vmax.f32 %v3882_v19, 0.0  ;;  %v3520_v37 = vpop.f32.mrb[40].mxu0 }
 0x339   : > { %v3579_v57 = vadd.f32 %v3520_v37, %v7221_v11  ;;  %v3763_v55 = vpop.f32.mrb[40].mxu1  ;;  %v5249_v26 = vpop.f32.mrb[41].mxu0 }
 0x33a   : > { %v3937_v41 = vrot.slane %v3917_v58, 1  ;;  %v3918_v23 = vmax.f32 %v3864_v34, %v3900_v49  ;;  %v3822_v9 = vadd.f32 %v3763_v55, %v7224_v35  ;;  %v5287_v33 = vpop.f32.mrb[41].mxu1  ;;  %v3523_v22 = vpop.f32.mrb[42].mxu0 }
 0x33b   : > { %v3847_v20 = vadd.f32 %v7307_v56, %v3579_v57  ;;  %v3580_v40 = vadd.f32 %v3523_v22, %v7227_v14  ;;  %v3766_v52 = vpop.f32.mrb[42].mxu1  ;;  %v5250_v27 = vpop.f32.mrb[43].mxu0 }
 0x33c   : > { %v3938_v38 = vsel %vm2145_vm4, %v3936_v17, %v3937_v41  ;;  %v3883_v11 = vadd.f32 %v7307_v56, %v3822_v9  ;;  %v3823_v45 = vadd.f32 %v3766_v52, %v7230_v32  ;;  %v5288_v1 = vpop.f32.mrb[43].mxu1  ;;  %v3945_v3 = vrot.slane %v3918_v23, 1 }
 0x33d   : > { %v3940_v7 = vmax.f32 %v3915_v2, %v3938_v38  ;;  %v3865_v25 = vmax.f32 %v3847_v20, 0.0  ;;  %v3848_v35 = vadd.f32 %v7307_v56, %v3580_v40 }
 0x33e   : > { %v3901_v14 = vmax.f32 %v3883_v11, 0.0  ;;  %v3884_v50 = vadd.f32 %v7307_v56, %v3823_v45 }
 0x33f   : > { %v3941_v4 = vpack.c.bf16 %v3940_v7, %v3940_v7  ;;  %v3866_v10 = vmax.f32 %v3848_v35, 0.0 }
 0x340   : > { %v3919_v6 = vmax.f32 %v3865_v25, %v3901_v14  ;;  %v3902_v48 = vmax.f32 %v3884_v50, 0.0  ;;  %v3528_v21 = vpop.f32.mrb[44].mxu0 }
 0x341   : > { %3942 = vst [vmem:[%s7337_s16] sm:$0xf] %v3941_v4  ;;  %v3581_v32 = vadd.f32 %v3528_v21, %v7233_v16  ;;  %v3771_v2 = vpop.f32.mrb[44].mxu1  ;;  %v5253_v28 = vpop.f32.mrb[45].mxu0 }
 0x342   : > { %v3946_v46 = vrot.slane %v3919_v6, 1  ;;  %v3920_v12 = vmax.f32 %v3866_v10, %v3902_v48  ;;  %v3824_v36 = vadd.f32 %v3771_v2, %v7236_v44  ;;  %v5291_v19 = vpop.f32.mrb[45].mxu1  ;;  %v3531_v34 = vpop.f32.mrb[46].mxu0 }
 0x343   : > { %v3849_v49 = vadd.f32 %v7307_v56, %v3581_v32  ;;  %v3582_v37 = vadd.f32 %v3531_v34, %v7239_v62  ;;  %v3774_v57 = vpop.f32.mrb[46].mxu1  ;;  %v5254_v55 = vpop.f32.mrb[47].mxu0 }
 0x344   : > { %v3947_v26 = vsel %vm2145_vm4, %v3945_v3, %v3946_v46  ;;  %v3951_v17 = vmax.f32 %v3918_v23, %v3946_v46  ;;  %v3885_v16 = vadd.f32 %v7307_v56, %v3824_v36  ;;  %v5292_v41 = vpop.f32.mrb[47].mxu1  ;;  %v3825_v22 = vadd.f32 %v3774_v57, %v7242_v43 }
 0x345   : > { %v3950_v9 = vmax.f32 %v3917_v58, %v3947_v26  ;;  %v3867_v33 = vmax.f32 %v3849_v49, 0.0  ;;  %v3850_v44 = vadd.f32 %v7307_v56, %v3582_v37  ;;  %v3969_v35 = vrot.slane %v3920_v12, 1 }
 0x346   : > { %v4438_v20 = vpack.c.bf16 %v3951_v17, %v3951_v17  ;;  %v3903_v40 = vmax.f32 %v3885_v16, 0.0  ;;  %v3886_v62 = vadd.f32 %v7307_v56, %v3825_v22 }
 0x347   : > { %v4437_v52 = vpack.c.bf16 %v3950_v9, %v3950_v9  ;;  %v3868_v27 = vmax.f32 %v3850_v44, 0.0 }
 0x348   : > { %v3963_v23 = vrot.slane %v4438_v20, 5  ;;  %v3921_v11 = vmax.f32 %v3867_v33, %v3903_v40  ;;  %v3536_v45 = vpop.f32.mrb[48].mxu0  ;;  %v3904_v1 = vmax.f32 %v3886_v62, 0.0 }
 0x349   : > { %v4418_v58 = vrot.slane %v4437_v52, 9  ;;  %v3583_v7 = vadd.f32 %v3536_v45, %v7245_v0  ;;  %v3779_v43 = vpop.f32.mrb[48].mxu1  ;;  %v5257_v25 = vpop.f32.mrb[49].mxu0 }
 0x34a   : > { %v3970_v14 = vrot.slane %v3921_v11, 1  ;;  %v3826_v50 = vadd.f32 %v3779_v43, %v7248_v53  ;;  %v5295_v4 = vpop.f32.mrb[49].mxu1  ;;  %v3539_v10 = vpop.f32.mrb[50].mxu0  ;;  %v3922_v21 = vmax.f32 %v3868_v27, %v3904_v1 }
 0x34b   : > { %v3964_v48 = vsel %vm7351_vm8, %v4418_v58, %v3963_v23  ;;  %v3851_v32 = vadd.f32 %v7307_v56, %v3583_v7  ;;  %v3584_v2 = vadd.f32 %v3539_v10, %v7251_v63  ;;  %v3782_v28 = vpop.f32.mrb[50].mxu1  ;;  %v5258_v3 = vpop.f32.mrb[51].mxu0 }
 0x34c   : > { %3966 = vst [vmem:[%s7337_s16 + $0x4] sm:$0xf] %v3964_v48  ;;  %v3971_v0 = vsel %vm2145_vm4, %v3969_v35, %v3970_v14  ;;  %v3975_v46 = vmax.f32 %v3920_v12, %v3970_v14  ;;  %v3887_v36 = vadd.f32 %v7307_v56, %v3826_v50  ;;  %v3827_v53 = vadd.f32 %v3782_v28, %v7254_v59  ;;  %v5296_v19 = vpop.f32.mrb[51].mxu1 }
 0x34d   : > { %v3974_v34 = vmax.f32 %v3919_v6, %v3971_v0  ;;  %v3869_v49 = vmax.f32 %v3851_v32, 0.0  ;;  %v3852_v37 = vadd.f32 %v7307_v56, %v3584_v2  ;;  %v3993_v20 = vrot.slane %v3922_v21, 1 }
 0x34e   : > { %v4440_v57 = vpack.c.bf16 %v3975_v46, %v3975_v46  ;;  %v3905_v55 = vmax.f32 %v3887_v36, 0.0  ;;  %v3888_v63 = vadd.f32 %v7307_v56, %v3827_v53 }
 0x34f   : > { %v4439_v26 = vpack.c.bf16 %v3974_v34, %v3974_v34  ;;  %v3870_v17 = vmax.f32 %v3852_v37, 0.0 }
 0x350   : > { %v3987_v12 = vrot.slane %v4440_v57, 6  ;;  %v3923_v41 = vmax.f32 %v3869_v49, %v3905_v55  ;;  %v3906_v59 = vmax.f32 %v3888_v63, 0.0  ;;  %v3544_v9 = vpop.f32.mrb[52].mxu0 }
 0x351   : > { %v4421_v6 = vrot.slane %v4439_v26, 10  ;;  %v3585_v33 = vadd.f32 %v3544_v9, %v7257_v15  ;;  %v3787_v44 = vpop.f32.mrb[52].mxu1  ;;  %v5261_v22 = vpop.f32.mrb[53].mxu0 }
 0x352   : > { %v3994_v40 = vrot.slane %v3923_v41, 1  ;;  %v3924_v52 = vmax.f32 %v3870_v17, %v3906_v59  ;;  %v3828_v27 = vadd.f32 %v3787_v44, %v7260_v42  ;;  %v5299_v62 = vpop.f32.mrb[53].mxu1  ;;  %v3547_v23 = vpop.f32.mrb[54].mxu0 }
 0x353   : > { %v3988_v45 = vsel %vm7368_vm11, %v4421_v6, %v3987_v12  ;;  %v3853_v58 = vadd.f32 %v7307_v56, %v3585_v33  ;;  %v3586_v1 = vadd.f32 %v3547_v23, %v7263_v47  ;;  %v3790_v7 = vpop.f32.mrb[54].mxu1  ;;  %v5262_v43 = vpop.f32.mrb[55].mxu0 }
 0x354   : > { %3990 = vst [vmem:[%s7337_s16 + $0x8] sm:$0xf] %v3988_v45  ;;  %v3995_v15 = vsel %vm2145_vm4, %v3993_v20, %v3994_v40  ;;  %v3999_v25 = vmax.f32 %v3922_v21, %v3994_v40  ;;  %v3889_v35 = vadd.f32 %v7307_v56, %v3828_v27  ;;  %v3829_v42 = vadd.f32 %v3790_v7, %v7266_v54  ;;  %v5300_v14 = vpop.f32.mrb[55].mxu1 }
 0x355   : > { %v3998_v50 = vmax.f32 %v3921_v11, %v3995_v15  ;;  %v3871_v4 = vmax.f32 %v3853_v58, 0.0  ;;  %v3854_v10 = vadd.f32 %v7307_v56, %v3586_v1 }
 0x356   : > { %v4442_v48 = vpack.c.bf16 %v3999_v25, %v3999_v25  ;;  %v3907_v32 = vmax.f32 %v3889_v35, 0.0  ;;  %v3890_v47 = vadd.f32 %v7307_v56, %v3829_v42 }
 0x357   : > { %v4441_v2 = vpack.c.bf16 %v3998_v50, %v3998_v50  ;;  %v3872_v28 = vmax.f32 %v3854_v10, 0.0 }
 0x358   : > { %v4011_v21 = vrot.slane %v4442_v48, 7  ;;  %v3925_v0 = vmax.f32 %v3871_v4, %v3907_v32  ;;  %v3908_v54 = vmax.f32 %v3890_v47, 0.0  ;;  %v3552_v11 = vpop.f32.mrb[56].mxu0 }
 0x359   : > { %v4424_v46 = vrot.slane %v4441_v2, 11  ;;  %v3587_v36 = vadd.f32 %v3552_v11, %v7269_v51  ;;  %v3795_v53 = vpop.f32.mrb[56].mxu1  ;;  %v5265_v19 = vpop.f32.mrb[57].mxu0 }
 0x35a   : > { %v3926_v34 = vmax.f32 %v3872_v28, %v3908_v54  ;;  %v3830_v49 = vadd.f32 %v3795_v53, %v7272_v29  ;;  %v5303_v37 = vpop.f32.mrb[57].mxu1  ;;  %v3555_v57 = vpop.f32.mrb[58].mxu0  ;;  %v4017_v41 = vrot.slane %v3925_v0, 1 }
 0x35b   : > { %v4012_v55 = vsel %vm7385_vm14, %v4424_v46, %v4011_v21  ;;  %v3855_v63 = vadd.f32 %v7307_v56, %v3587_v36  ;;  %v3588_v26 = vadd.f32 %v3555_v57, %v7275_v5  ;;  %v3798_v17 = vpop.f32.mrb[58].mxu1  ;;  %v5266_v12 = vpop.f32.mrb[59].mxu0 }
 0x35c   : > { %4014 = vst [vmem:[%s7337_s16 + $0xc] sm:$0xf] %v4012_v55  ;;  %v4018_v59 = vrot.slane %v3926_v34, 1  ;;  %v3891_v51 = vadd.f32 %v7307_v56, %v3830_v49  ;;  %v3831_v9 = vadd.f32 %v3798_v17, %v7278_v31  ;;  %v5304_v6 = vpop.f32.mrb[59].mxu1 }
 0x35d   : > { %v3873_v29 = vmax.f32 %v3855_v63, 0.0  ;;  %v3856_v33 = vadd.f32 %v7307_v56, %v3588_v26 }
 0x35e   : > { %v4019_v44 = vsel %vm2145_vm4, %v4017_v41, %v4018_v59  ;;  %v3909_v22 = vmax.f32 %v3891_v51, 0.0  ;;  %v3892_v20 = vadd.f32 %v7307_v56, %v3831_v9 }
 0x35f   : > { %v4021_v5 = vmax.f32 %v3924_v52, %v4019_v44  ;;  %v3874_v40 = vmax.f32 %v3856_v33, 0.0 }
 0x360   : > { %v3927_v27 = vmax.f32 %v3873_v29, %v3909_v22  ;;  %v3910_v62 = vmax.f32 %v3892_v20, 0.0  ;;  %v3560_v23 = vpop.f32.mrb[60].mxu0 }
 0x361   : > { %v4022_v45 = vpack.c.bf16 %v4021_v5, %v4021_v5  ;;  %v3589_v58 = vadd.f32 %v3560_v23, %v7281_v13  ;;  %v3803_v1 = vpop.f32.mrb[60].mxu1  ;;  %v5269_v31 = vpop.f32.mrb[61].mxu0 }
 0x362   : > { %v3928_v7 = vmax.f32 %v3874_v40, %v3910_v62  ;;  %v3832_v43 = vadd.f32 %v3803_v1, %v7284_v30  ;;  %v5307_v15 = vpop.f32.mrb[61].mxu1  ;;  %v3563_v25 = vpop.f32.mrb[62].mxu0  ;;  %v4026_v50 = vrot.slane %v3927_v27, 1 }
 0x363   : > { %4023 = vst [vmem:[%s7337_s16 + $0x10] sm:$0xf] %v4022_v45  ;;  %v3857_v35 = vadd.f32 %v7307_v56, %v3589_v58  ;;  %v3590_v42 = vadd.f32 %v3563_v25, %v7287_v24  ;;  %v3806_v52 = vpop.f32.mrb[62].mxu1  ;;  %v5270_v14 = vpop.f32.mrb[63].mxu0 }
 0x364   : > { %v4027_v4 = vrot.slane %v3928_v7, 1  ;;  %v3893_v10 = vadd.f32 %v7307_v56, %v3832_v43  ;;  %v3833_v13 = vadd.f32 %v3806_v52, %v7290_v61  ;;  %v5308_v48 = vpop.f32.mrb[63].mxu1 }
 0x365   : > { %v3875_v32 = vmax.f32 %v3857_v35, 0.0  ;;  %v3858_v47 = vadd.f32 %v7307_v56, %v3590_v42 }
 0x366   : > { %v4028_v30 = vsel %vm2145_vm4, %v4026_v50, %v4027_v4  ;;  %v4032_v2 = vmax.f32 %v3927_v27, %v4027_v4  ;;  %v3911_v28 = vmax.f32 %v3893_v10, 0.0  ;;  %v3894_v21 = vadd.f32 %v7307_v56, %v3833_v13 }
 0x367   : > { %v4031_v0 = vmax.f32 %v3926_v34, %v4028_v30  ;;  %v3876_v24 = vmax.f32 %v3858_v47, 0.0 }
 0x368   : > { %v4444_v54 = vpack.c.bf16 %v4032_v2, %v4032_v2  ;;  %v3929_v11 = vmax.f32 %v3875_v32, %v3911_v28  ;;  %v3912_v46 = vmax.f32 %v3894_v21, 0.0  ;;  %v3568_v36 = vpop.f32.mrb[64].mxu0 }
 0x369   : > { %v4443_v53 = vpack.c.bf16 %v4031_v0, %v4031_v0  ;;  %v3591_v19 = vadd.f32 %v3568_v36, %v7293_v18  ;;  %v3811_v61 = vpop.f32.mrb[64].mxu1  ;;  %v5273_v49 = vpop.f32.mrb[65].mxu0 }
 0x36a   : > { %v4041_v37 = vrot.slane %v4444_v54, 5  ;;  %v3930_v57 = vmax.f32 %v3876_v24, %v3912_v46  ;;  %v3834_v55 = vadd.f32 %v3811_v61, %v7296_v39  ;;  %v5311_v63 = vpop.f32.mrb[65].mxu1  ;;  %v3571_v26 = vpop.f32.mrb[66].mxu0  ;;  %v4047_v51 = vrot.slane %v3929_v11, 1 }
 0x36b   : > { %v4427_v17 = vrot.slane %v4443_v53, 9  ;;  %v3859_v34 = vadd.f32 %v7307_v56, %v3591_v19  ;;  %v3592_v12 = vadd.f32 %v3571_v26, %v7299_v60  ;;  %v3814_v41 = vpop.f32.mrb[66].mxu1  ;;  %v5274_v59 = vpop.f32.mrb[67].mxu0 }
 0x36c   : > { %v4048_v9 = vrot.slane %v3930_v57, 1  ;;  %v3895_v18 = vadd.f32 %v7307_v56, %v3834_v55  ;;  %v3835_v6 = vadd.f32 %v3814_v41, %v7302_v8  ;;  %v5312_v29 = vpop.f32.mrb[67].mxu1 }
 0x36d   : > { %v4042_v39 = vsel %vm7351_vm8, %v4427_v17, %v4041_v37  ;;  %v3877_v33 = vmax.f32 %v3859_v34, 0.0  ;;  %v3860_v44 = vadd.f32 %v7307_v56, %v3592_v12 }
 0x36e   : > { %4044 = vst [vmem:[%s7337_s16 + $0x14] sm:$0xf] %v4042_v39  ;;  %v4049_v22 = vsel %vm2145_vm4, %v4047_v51, %v4048_v9  ;;  %v4053_v60 = vmax.f32 %v3929_v11, %v4048_v9  ;;  %v3913_v20 = vmax.f32 %v3895_v18, 0.0  ;;  %v3896_v5 = vadd.f32 %v7307_v56, %v3835_v6 }
 0x36f   : > { %v4052_v40 = vmax.f32 %v3928_v7, %v4049_v22  ;;  %v3878_v27 = vmax.f32 %v3860_v44, 0.0 }
 0x370   : > { %v4446_v62 = vpack.c.bf16 %v4053_v60, %v4053_v60  ;;  %v3931_v23 = vmax.f32 %v3877_v33, %v3913_v20  ;;  %v3914_v8 = vmax.f32 %v3896_v5, 0.0 }
 0x371   : > { %v4445_v45 = vpack.c.bf16 %v4052_v40, %v4052_v40 }
 0x372   : > { %v4062_v38 = vrot.slane %v4446_v62, 6  ;;  %v3932_v58 = vmax.f32 %v3878_v27, %v3914_v8  ;;  %v4068_v31 = vrot.slane %v3931_v23, 1 }
 0x373   : > { %v4430_v1 = vrot.slane %v4445_v45, 10 }
 0x374   : > { %v4069_v43 = vrot.slane %v3932_v58, 1 }
 0x375   : > { %v4063_v15 = vsel %vm7368_vm11, %v4430_v1, %v4062_v38 }
 0x376   : > { %4065 = vst [vmem:[%s7337_s16 + $0x18] sm:$0xf] %v4063_v15  ;;  %v4070_v25 = vsel %vm2145_vm4, %v4068_v31, %v4069_v43  ;;  %v4074_v35 = vmax.f32 %v3931_v23, %v4069_v43 }
 0x377   : > { %v4073_v56 = vmax.f32 %v3930_v57, %v4070_v25 }
 0x378   : > { %v4448_v7 = vpack.c.bf16 %v4074_v35, %v4074_v35 }
 0x379   : > { %v4447_v42 = vpack.c.bf16 %v4073_v56, %v4073_v56 }
 0x37a   : > { %v4083_v52 = vrot.slane %v4448_v7, 7 }
 0x37b   : > { %v4433_v14 = vrot.slane %v4447_v42, 11 }
 0x37d   : > { %v4084_v50 = vsel %vm7385_vm14, %v4433_v14, %v4083_v52 }
 0x37e   : > { %4086 = vst [vmem:[%s7337_s16 + $0x1c] sm:$0xf] %v4084_v50 }
 0x37f PF: > { %s14_s15 = sadd.s32 1, %s5412_s15  }
 0x380   : > { %p11_p4 = scmp.ge.s32.totalorder %s14_s15, 4  }
 0x382   :  { %13 = sbr.rel (!%p11_p4) target bundleno = 1 (0x1), region = 77 }

</bundles_post_ra>
